<compile_context>
chip_gen: v5e
topology: v5e:2x2
jax: 0.10.0
libtpu: 0.0.40
codegen_flags: <defaults>
</compile_context>

<pallas_src>
import functools

import jax
import jax.numpy as jnp
from jax.experimental import pallas as pl
from jax.experimental.pallas import tpu as pltpu


def decoder_block_kernel(x_ref, w1_ref, s1_ref, b1_ref, w2_ref, s2_ref, b2_ref,
                         o_ref, pad_ref, *, zero_border_once):
    """Fused conv3x3 -> BN -> ReLU -> conv3x3 -> BN -> (+x) -> ReLU, one image.

    x_ref   : (1, H, W, C)   f32   input block (also the residual branch)
    w*_ref  : (9*C, C)       bf16  conv weights, rows ordered (dy, dx, cin)
    s*/b*   : (1, C)         f32   folded BatchNorm scale / bias
    o_ref   : (1, H, W, C)   f32   output block
    pad_ref : (H+2, W, C)    bf16  staging scratch with zero top/bottom halo rows,
                                   shared by both convolutions
    """
    H = o_ref.shape[1]
    W = o_ref.shape[2]
    C = o_ref.shape[3]

    def zero_halo_rows():
        zrow = jnp.zeros((1, W, C), jnp.bfloat16)
        pad_ref[0:1, :, :] = zrow
        pad_ref[H + 1:H + 2, :, :] = zrow

    if zero_border_once:
        # Single-TensorCore chip: the per-core scratch persists across grid
        # steps and the halo rows are never overwritten, so zero them once.
        pl.when(pl.program_id(0) == 0)(zero_halo_rows)
    else:
        # Megacore / v7x: a core may start at program_id > 0 with uninitialized
        # scratch; re-zero the (cheap, fully aligned) halo rows every step.
        zero_halo_rows()

    def conv3x3(w_ref):
        # Full im2col: one MXU matmul with contraction depth K = 9*C.
        # dy shifts read the zero halo rows; dx shifts are built in registers
        # with zero edge columns (no unaligned / strided scratch accesses).
        zcol = jnp.zeros((H, 1, C), jnp.bfloat16)
        pieces = []
        for dy in range(3):
            slab = pad_ref[dy:dy + H, :, :]                              # (H, W, C) bf16
            pieces.append(jnp.concatenate([zcol, slab[:, :W - 1, :]], axis=1))  # dx=0
            pieces.append(slab)                                                  # dx=1
            pieces.append(jnp.concatenate([slab[:, 1:, :], zcol], axis=1))       # dx=2
        patch = jnp.concatenate(pieces, axis=-1)                         # (H, W, 9C) bf16
        lhs = patch.reshape(H * W, 9 * C)
        return jax.lax.dot_general(
            lhs, w_ref[...],
            (((1,), (0,)), ((), ())),
            preferred_element_type=jnp.float32)                          # (H*W, C) f32

    # conv1: stage x (cast to bf16) in the scratch interior; aligned store.
    pad_ref[1:H + 1, :, :] = x_ref[0].astype(jnp.bfloat16)
    h = conv3x3(w1_ref)
    h = jnp.maximum(h * s1_ref[0] + b1_ref[0], 0.0)                      # bn1 + relu (f32)

    # conv2: reuse the same scratch for the bf16 intermediate.
    pad_ref[1:H + 1, :, :] = h.astype(jnp.bfloat16).reshape(H, W, C)
    out = conv3x3(w2_ref)
    out = out * s2_ref[0] + b2_ref[0]                                    # bn2 (f32)
    out = out.reshape(H, W, C) + x_ref[0]                                # residual (f32)
    o_ref[0] = jnp.maximum(out, 0.0)


def _round_up(a, m):
    return (a + m - 1) // m * m


def _tile_bytes(shape, itemsize, sublane):
    *lead, s2, s1 = shape
    n = itemsize
    for d in lead:
        n *= d
    return n * _round_up(s2, sublane) * _round_up(s1, 128)


def _vmem_bytes_estimate(H, W, C):
    """Tiling-padded working-set estimate: pipeline buffers, persistent scratch,
    and the compiler-allocated in-kernel temporaries."""
    total = 0
    # double-buffered pipeline blocks
    total += 2 * _tile_bytes((1, H, W, C), 4, 8)        # x block
    total += 2 * _tile_bytes((1, H, W, C), 4, 8)        # output block
    total += 2 * 2 * _tile_bytes((9 * C, C), 2, 16)     # conv1 + conv2 weights (bf16)
    total += 2 * 4 * _tile_bytes((1, C), 4, 8)          # BN scales / biases
    # persistent scratch
    total += _tile_bytes((H + 2, W, C), 2, 16)          # bf16 halo scratch
    # in-kernel temporaries (count against vmem_limit_bytes too)
    total += 2 * _tile_bytes((H * W, 9 * C), 2, 16)     # im2col patch + concat staging
    total += 3 * _tile_bytes((H * W, C), 4, 8)          # conv acc / h / out (f32)
    return total


def _single_tensorcore_device():
    """True only for chips known to have one TensorCore per device (v5e/v6e).
    Megacore (v4/v5p) and v7x return False -> halo rows re-zeroed per step."""
    try:
        kind = jax.devices()[0].device_kind.lower()
    except Exception:
        return False
    return any(t in kind for t in ("v5e", "v5 lite", "v5litepod", "v6e", "v6 lite"))


def _vmem_limit_bytes(H, W, C):
    try:
        physical = int(pltpu.get_tpu_info().vmem_capacity_bytes)
    except Exception:
        physical = 64 * 2 ** 20                 # conservative (v7x-sized) fallback
    cap = physical * 4 // 5                     # ~100 MiB on v5e/v6e, ~51 MiB on v7x
    want = max(32 * 2 ** 20, 2 * _vmem_bytes_estimate(H, W, C))
    return int(min(cap, want))


@jax.jit
def decoder_basic_block(x, w1, w2, bn1, bn2):
    """x: (N,H,W,C) f32 NHWC.  w*: (3,3,Cin,Cout) HWIO.  bn*: (gamma, beta, mean, var).

    Eval-mode BatchNorm (running stats).  Conv matmuls use bf16 operands with
    f32 accumulation; BN / residual / ReLU epilogue is f32.
    """
    eps = 1e-5
    x = x.astype(jnp.float32)
    N, H, W, C = x.shape
    Cmid = w1.shape[-1]
    # stride=1 / upsample=None  =>  inplanes == planes (required for the
    # residual add and for sharing one staging scratch between the two convs).
    assert Cmid == C and w1.shape == (3, 3, C, C) and w2.shape == (3, 3, C, C)
    assert W % 8 == 0, "W must be a multiple of 8 (sublane tiling)"

    g1, be1, m1, v1 = bn1
    g2, be2, m2, v2 = bn2
    inv1 = g1 * jax.lax.rsqrt(v1 + eps)
    inv2 = g2 * jax.lax.rsqrt(v2 + eps)
    s1 = inv1.reshape(1, C).astype(jnp.float32)
    b1 = (be1 - m1 * inv1).reshape(1, C).astype(jnp.float32)
    s2 = inv2.reshape(1, C).astype(jnp.float32)
    b2 = (be2 - m2 * inv2).reshape(1, C).astype(jnp.float32)

    # (3, 3, Cin, Cout) -> (9*Cin, Cout): row index (dy*3 + dx)*Cin + cin matches
    # the (dy, dx, cin) column order of the im2col patch built in the kernel.
    w1_r = w1.reshape(9 * C, C).astype(jnp.bfloat16)
    w2_r = w2.reshape(9 * C, C).astype(jnp.bfloat16)

    vmem_limit = _vmem_limit_bytes(H, W, C)
    kernel = functools.partial(decoder_block_kernel,
                               zero_border_once=_single_tensorcore_device())

    return pl.pallas_call(
        kernel,
        out_shape=jax.ShapeDtypeStruct((N, H, W, C), jnp.float32),
        grid_spec=pltpu.PrefetchScalarGridSpec(
            num_scalar_prefetch=0,
            grid=(N,),
            in_specs=[
                pl.BlockSpec((1, H, W, C), lambda n: (n, 0, 0, 0)),      # x
                pl.BlockSpec((9 * C, C), lambda n: (0, 0)),              # w1
                pl.BlockSpec((1, C), lambda n: (0, 0)),                  # s1
                pl.BlockSpec((1, C), lambda n: (0, 0)),                  # b1
                pl.BlockSpec((9 * C, C), lambda n: (0, 0)),              # w2
                pl.BlockSpec((1, C), lambda n: (0, 0)),                  # s2
                pl.BlockSpec((1, C), lambda n: (0, 0)),                  # b2
            ],
            out_specs=pl.BlockSpec((1, H, W, C), lambda n: (n, 0, 0, 0)),
            scratch_shapes=[pltpu.VMEM((H + 2, W, C), jnp.bfloat16)],
        ),
        compiler_params=pltpu.CompilerParams(
            dimension_semantics=("parallel",),
            vmem_limit_bytes=vmem_limit),
    )(x, w1_r, s1, b1, w2_r, s2, b2)


def reference_forward(x, w1, w2, bn1, bn2, conv_dtype=jnp.float32):
    """Pure-JAX reference (eval-mode BN).  conv_dtype=bf16 mirrors the kernel's
    bf16-operand / f32-accumulate matmuls for a tight comparison."""
    eps = 1e-5

    def conv(a, w):
        return jax.lax.conv_general_dilated(
            a.astype(conv_dtype), w.astype(conv_dtype),
            window_strides=(1, 1), padding=((1, 1), (1, 1)),
            dimension_numbers=('NHWC', 'HWIO', 'NHWC'),
            preferred_element_type=jnp.float32)

    def bn(a, p):
        g, b, m, v = p
        return (a - m) / jnp.sqrt(v + eps) * g + b

    out = jax.nn.relu(bn(conv(x, w1), bn1))
    out = bn(conv(out, w2), bn2)
    return jax.nn.relu(out + x)


if __name__ == "__main__":
    # Small shapes consistent with the module (stride=1, upsample=None so
    # inplanes == planes); planes=64 is the canonical ResNet block width.
    N, H, W, C = 2, 16, 16, 64

    key = jax.random.PRNGKey(0)
    kx, kw1, kw2, kg1, kb1, km1, kv1, kg2, kb2, km2, kv2 = jax.random.split(key, 11)

    x = jax.random.normal(kx, (N, H, W, C), dtype=jnp.float32)
    w1 = jax.random.normal(kw1, (3, 3, C, C), dtype=jnp.float32) * 0.1
    w2 = jax.random.normal(kw2, (3, 3, C, C), dtype=jnp.float32) * 0.1

    bn1 = (jax.random.uniform(kg1, (C,), jnp.float32, 0.5, 1.5),
           jax.random.normal(kb1, (C,), jnp.float32) * 0.1,
           jax.random.normal(km1, (C,), jnp.float32) * 0.1,
           jax.random.uniform(kv1, (C,), jnp.float32, 0.5, 1.5))
    bn2 = (jax.random.uniform(kg2, (C,), jnp.float32, 0.5, 1.5),
           jax.random.normal(kb2, (C,), jnp.float32) * 0.1,
           jax.random.normal(km2, (C,), jnp.float32) * 0.1,
           jax.random.uniform(kv2, (C,), jnp.float32, 0.5, 1.5))

    out = jax.block_until_ready(decoder_basic_block(x, w1, w2, bn1, bn2))
    assert out.shape == (N, H, W, C)

    # Tight check against a reference that matches the kernel's bf16-operand /
    # f32-accumulate arithmetic.
    ref_bf16 = reference_forward(x, w1, w2, bn1, bn2, conv_dtype=jnp.bfloat16)
    assert jnp.allclose(out, ref_bf16, atol=3e-2, rtol=1e-2), \
        "mismatch vs bf16-matched reference"

    # Loose sanity check against the full-f32 reference (bf16 quantization
    # noise only; a real bug would be O(1) off).
    ref_f32 = reference_forward(x, w1, w2, bn1, bn2, conv_dtype=jnp.float32)
    assert float(jnp.max(jnp.abs(out - ref_f32))) < 0.5, \
        "too far from f32 reference"

    print("KERNEL_OK")
</pallas_src>

<mosaic_0001>
module attributes {stable_mosaic.version = 11 : i64} {
  func.func @decoder_block_kernel(%arg0: i32, %arg1: memref<1x16x16x64xf32, #tpu.memory_space<vmem>>, %arg2: memref<576x64xbf16, #tpu.memory_space<vmem>>, %arg3: memref<1x64xf32, #tpu.memory_space<vmem>>, %arg4: memref<1x64xf32, #tpu.memory_space<vmem>>, %arg5: memref<576x64xbf16, #tpu.memory_space<vmem>>, %arg6: memref<1x64xf32, #tpu.memory_space<vmem>>, %arg7: memref<1x64xf32, #tpu.memory_space<vmem>>, %arg8: memref<1x16x16x64xf32, #tpu.memory_space<vmem>>, %arg9: memref<18x16x64xbf16, #tpu.memory_space<vmem>>) attributes {dimension_semantics = [#tpu.dimension_semantics<parallel>], iteration_bounds = array<i64: 2>, scalar_prefetch = 0 : i64, scratch_operands = 1 : i64, tpu.core_type = #tpu.core_type<tc>, window_params = [{transform_indices = @transform_0, window_bounds = array<i64: 1, 16, 16, 64>}, {pipeline_mode = #tpu.pipeline_mode<synchronous>, transform_indices = @transform_1, window_bounds = array<i64: 576, 64>}, {pipeline_mode = #tpu.pipeline_mode<synchronous>, transform_indices = @transform_2, window_bounds = array<i64: 1, 64>}, {pipeline_mode = #tpu.pipeline_mode<synchronous>, transform_indices = @transform_3, window_bounds = array<i64: 1, 64>}, {pipeline_mode = #tpu.pipeline_mode<synchronous>, transform_indices = @transform_4, window_bounds = array<i64: 576, 64>}, {pipeline_mode = #tpu.pipeline_mode<synchronous>, transform_indices = @transform_5, window_bounds = array<i64: 1, 64>}, {pipeline_mode = #tpu.pipeline_mode<synchronous>, transform_indices = @transform_6, window_bounds = array<i64: 1, 64>}, {transform_indices = @transform_7, window_bounds = array<i64: 1, 16, 16, 64>}]} {
    %cst = arith.constant 0.000000e+00 : bf16
    %0 = vector.broadcast %cst : bf16 to vector<1x16x64xbf16>
    %c0 = arith.constant 0 : index
    %c0_0 = arith.constant 0 : index
    %c0_1 = arith.constant 0 : index
    %1 = vector.load %arg9[%c0, %c0_0, %c0_1] : memref<18x16x64xbf16, #tpu.memory_space<vmem>>, vector<1x16x64xbf16>
    tpu.vector_store %arg9[%c0, %c0_0, %c0_1], %0 {strides = array<i32>} : memref<18x16x64xbf16, #tpu.memory_space<vmem>>, vector<1x16x64xbf16>,
    %c17 = arith.constant 17 : index
    %c0_2 = arith.constant 0 : index
    %c0_3 = arith.constant 0 : index
    %2 = vector.load %arg9[%c17, %c0_2, %c0_3] : memref<18x16x64xbf16, #tpu.memory_space<vmem>>, vector<1x16x64xbf16>
    tpu.vector_store %arg9[%c17, %c0_2, %c0_3], %0 {strides = array<i32>} : memref<18x16x64xbf16, #tpu.memory_space<vmem>>, vector<1x16x64xbf16>,
    %c0_4 = arith.constant 0 : index
    %c0_5 = arith.constant 0 : index
    %c0_6 = arith.constant 0 : index
    %c0_7 = arith.constant 0 : index
    %3 = vector.load %arg1[%c0_4, %c0_5, %c0_6, %c0_7] : memref<1x16x16x64xf32, #tpu.memory_space<vmem>>, vector<1x16x16x64xf32>
    %4 = vector.shape_cast %3 : vector<1x16x16x64xf32> to vector<16x16x64xf32>
    %5 = arith.truncf %4 : vector<16x16x64xf32> to vector<16x16x64xbf16>
    %c1 = arith.constant 1 : index
    %c0_8 = arith.constant 0 : index
    %c0_9 = arith.constant 0 : index
    %6 = vector.load %arg9[%c1, %c0_8, %c0_9] : memref<18x16x64xbf16, #tpu.memory_space<vmem>>, vector<16x16x64xbf16>
    tpu.vector_store %arg9[%c1, %c0_8, %c0_9], %5 {strides = array<i32>} : memref<18x16x64xbf16, #tpu.memory_space<vmem>>, vector<16x16x64xbf16>,
    %cst_10 = arith.constant 0.000000e+00 : bf16
    %7 = vector.broadcast %cst_10 : bf16 to vector<16x1x64xbf16>
    %c0_11 = arith.constant 0 : index
    %c0_12 = arith.constant 0 : index
    %c0_13 = arith.constant 0 : index
    %8 = vector.load %arg9[%c0_11, %c0_12, %c0_13] : memref<18x16x64xbf16, #tpu.memory_space<vmem>>, vector<16x16x64xbf16>
    %9 = vector.extract_strided_slice %8 {offsets = [0, 0, 0], sizes = [16, 15, 64], strides = [1, 1, 1]} : vector<16x16x64xbf16> to vector<16x15x64xbf16>
    %10 = tpu.concatenate %7, %9 in 1 : vector<16x1x64xbf16>, vector<16x15x64xbf16> -> vector<16x16x64xbf16>
    %11 = vector.extract_strided_slice %8 {offsets = [0, 1, 0], sizes = [16, 15, 64], strides = [1, 1, 1]} : vector<16x16x64xbf16> to vector<16x15x64xbf16>
    %12 = tpu.concatenate %11, %7 in 1 : vector<16x15x64xbf16>, vector<16x1x64xbf16> -> vector<16x16x64xbf16>
    %c1_14 = arith.constant 1 : index
    %c0_15 = arith.constant 0 : index
    %c0_16 = arith.constant 0 : index
    %13 = vector.load %arg9[%c1_14, %c0_15, %c0_16] : memref<18x16x64xbf16, #tpu.memory_space<vmem>>, vector<16x16x64xbf16>
    %14 = vector.extract_strided_slice %13 {offsets = [0, 0, 0], sizes = [16, 15, 64], strides = [1, 1, 1]} : vector<16x16x64xbf16> to vector<16x15x64xbf16>
    %15 = tpu.concatenate %7, %14 in 1 : vector<16x1x64xbf16>, vector<16x15x64xbf16> -> vector<16x16x64xbf16>
    %16 = vector.extract_strided_slice %13 {offsets = [0, 1, 0], sizes = [16, 15, 64], strides = [1, 1, 1]} : vector<16x16x64xbf16> to vector<16x15x64xbf16>
    %17 = tpu.concatenate %16, %7 in 1 : vector<16x15x64xbf16>, vector<16x1x64xbf16> -> vector<16x16x64xbf16>
    %c2 = arith.constant 2 : index
    %c0_17 = arith.constant 0 : index
    %c0_18 = arith.constant 0 : index
    %18 = vector.load %arg9[%c2, %c0_17, %c0_18] : memref<18x16x64xbf16, #tpu.memory_space<vmem>>, vector<16x16x64xbf16>
    %19 = vector.extract_strided_slice %18 {offsets = [0, 0, 0], sizes = [16, 15, 64], strides = [1, 1, 1]} : vector<16x16x64xbf16> to vector<16x15x64xbf16>
    %20 = tpu.concatenate %7, %19 in 1 : vector<16x1x64xbf16>, vector<16x15x64xbf16> -> vector<16x16x64xbf16>
    %21 = vector.extract_strided_slice %18 {offsets = [0, 1, 0], sizes = [16, 15, 64], strides = [1, 1, 1]} : vector<16x16x64xbf16> to vector<16x15x64xbf16>
    %22 = tpu.concatenate %21, %7 in 1 : vector<16x15x64xbf16>, vector<16x1x64xbf16> -> vector<16x16x64xbf16>
    %23 = tpu.concatenate %10, %8, %12, %15, %13, %17, %20, %18, %22 in 2 : vector<16x16x64xbf16>, vector<16x16x64xbf16>, vector<16x16x64xbf16>, vector<16x16x64xbf16>, vector<16x16x64xbf16>, vector<16x16x64xbf16>, vector<16x16x64xbf16>, vector<16x16x64xbf16>, vector<16x16x64xbf16> -> vector<16x16x576xbf16>
    %24 = vector.shape_cast %23 : vector<16x16x576xbf16> to vector<256x576xbf16>
    %c0_19 = arith.constant 0 : index
    %c0_20 = arith.constant 0 : index
    %25 = vector.load %arg2[%c0_19, %c0_20] : memref<576x64xbf16, #tpu.memory_space<vmem>>, vector<576x64xbf16>
    %cst_21 = arith.constant dense<0.000000e+00> : vector<256x64xf32>
    %26 = tpu.matmul %24, %25, %cst_21 {dimension_numbers = #tpu.dot_dimension_numbers<[1], [0], [0], [1], [0, 0, 1, 1], [], []>} : vector<256x576xbf16>, vector<576x64xbf16>, vector<256x64xf32> -> vector<256x64xf32>
    %c0_22 = arith.constant 0 : index
    %c0_23 = arith.constant 0 : index
    %27 = vector.load %arg3[%c0_22, %c0_23] : memref<1x64xf32, #tpu.memory_space<vmem>>, vector<1x64xf32>
    %28 = vector.shape_cast %27 : vector<1x64xf32> to vector<64xf32>
    %29 = vector.shape_cast %28 : vector<64xf32> to vector<1x64xf32>
    %30 = vector.broadcast %29 : vector<1x64xf32> to vector<256x64xf32>
    %31 = arith.mulf %26, %30 : vector<256x64xf32>
    %c0_24 = arith.constant 0 : index
    %c0_25 = arith.constant 0 : index
    %32 = vector.load %arg4[%c0_24, %c0_25] : memref<1x64xf32, #tpu.memory_space<vmem>>, vector<1x64xf32>
    %33 = vector.shape_cast %32 : vector<1x64xf32> to vector<64xf32>
    %34 = vector.shape_cast %33 : vector<64xf32> to vector<1x64xf32>
    %35 = vector.broadcast %34 : vector<1x64xf32> to vector<256x64xf32>
    %36 = arith.addf %31, %35 : vector<256x64xf32>
    %cst_26 = arith.constant 0.000000e+00 : f32
    %37 = vector.broadcast %cst_26 : f32 to vector<256x64xf32>
    %38 = arith.maximumf %36, %37 : vector<256x64xf32>
    %39 = arith.truncf %38 : vector<256x64xf32> to vector<256x64xbf16>
    %40 = vector.shape_cast %39 : vector<256x64xbf16> to vector<16x16x64xbf16>
    %c1_27 = arith.constant 1 : index
    %c0_28 = arith.constant 0 : index
    %c0_29 = arith.constant 0 : index
    %41 = vector.load %arg9[%c1_27, %c0_28, %c0_29] : memref<18x16x64xbf16, #tpu.memory_space<vmem>>, vector<16x16x64xbf16>
    tpu.vector_store %arg9[%c1_27, %c0_28, %c0_29], %40 {strides = array<i32>} : memref<18x16x64xbf16, #tpu.memory_space<vmem>>, vector<16x16x64xbf16>,
    %cst_30 = arith.constant 0.000000e+00 : bf16
    %42 = vector.broadcast %cst_30 : bf16 to vector<16x1x64xbf16>
    %c0_31 = arith.constant 0 : index
    %c0_32 = arith.constant 0 : index
    %c0_33 = arith.constant 0 : index
    %43 = vector.load %arg9[%c0_31, %c0_32, %c0_33] : memref<18x16x64xbf16, #tpu.memory_space<vmem>>, vector<16x16x64xbf16>
    %44 = vector.extract_strided_slice %43 {offsets = [0, 0, 0], sizes = [16, 15, 64], strides = [1, 1, 1]} : vector<16x16x64xbf16> to vector<16x15x64xbf16>
    %45 = tpu.concatenate %42, %44 in 1 : vector<16x1x64xbf16>, vector<16x15x64xbf16> -> vector<16x16x64xbf16>
    %46 = vector.extract_strided_slice %43 {offsets = [0, 1, 0], sizes = [16, 15, 64], strides = [1, 1, 1]} : vector<16x16x64xbf16> to vector<16x15x64xbf16>
    %47 = tpu.concatenate %46, %42 in 1 : vector<16x15x64xbf16>, vector<16x1x64xbf16> -> vector<16x16x64xbf16>
    %c1_34 = arith.constant 1 : index
    %c0_35 = arith.constant 0 : index
    %c0_36 = arith.constant 0 : index
    %48 = vector.load %arg9[%c1_34, %c0_35, %c0_36] : memref<18x16x64xbf16, #tpu.memory_space<vmem>>, vector<16x16x64xbf16>
    %49 = vector.extract_strided_slice %48 {offsets = [0, 0, 0], sizes = [16, 15, 64], strides = [1, 1, 1]} : vector<16x16x64xbf16> to vector<16x15x64xbf16>
    %50 = tpu.concatenate %42, %49 in 1 : vector<16x1x64xbf16>, vector<16x15x64xbf16> -> vector<16x16x64xbf16>
    %51 = vector.extract_strided_slice %48 {offsets = [0, 1, 0], sizes = [16, 15, 64], strides = [1, 1, 1]} : vector<16x16x64xbf16> to vector<16x15x64xbf16>
    %52 = tpu.concatenate %51, %42 in 1 : vector<16x15x64xbf16>, vector<16x1x64xbf16> -> vector<16x16x64xbf16>
    %c2_37 = arith.constant 2 : index
    %c0_38 = arith.constant 0 : index
    %c0_39 = arith.constant 0 : index
    %53 = vector.load %arg9[%c2_37, %c0_38, %c0_39] : memref<18x16x64xbf16, #tpu.memory_space<vmem>>, vector<16x16x64xbf16>
    %54 = vector.extract_strided_slice %53 {offsets = [0, 0, 0], sizes = [16, 15, 64], strides = [1, 1, 1]} : vector<16x16x64xbf16> to vector<16x15x64xbf16>
    %55 = tpu.concatenate %42, %54 in 1 : vector<16x1x64xbf16>, vector<16x15x64xbf16> -> vector<16x16x64xbf16>
    %56 = vector.extract_strided_slice %53 {offsets = [0, 1, 0], sizes = [16, 15, 64], strides = [1, 1, 1]} : vector<16x16x64xbf16> to vector<16x15x64xbf16>
    %57 = tpu.concatenate %56, %42 in 1 : vector<16x15x64xbf16>, vector<16x1x64xbf16> -> vector<16x16x64xbf16>
    %58 = tpu.concatenate %45, %43, %47, %50, %48, %52, %55, %53, %57 in 2 : vector<16x16x64xbf16>, vector<16x16x64xbf16>, vector<16x16x64xbf16>, vector<16x16x64xbf16>, vector<16x16x64xbf16>, vector<16x16x64xbf16>, vector<16x16x64xbf16>, vector<16x16x64xbf16>, vector<16x16x64xbf16> -> vector<16x16x576xbf16>
    %59 = vector.shape_cast %58 : vector<16x16x576xbf16> to vector<256x576xbf16>
    %c0_40 = arith.constant 0 : index
    %c0_41 = arith.constant 0 : index
    %60 = vector.load %arg5[%c0_40, %c0_41] : memref<576x64xbf16, #tpu.memory_space<vmem>>, vector<576x64xbf16>
    %cst_42 = arith.constant dense<0.000000e+00> : vector<256x64xf32>
    %61 = tpu.matmul %59, %60, %cst_42 {dimension_numbers = #tpu.dot_dimension_numbers<[1], [0], [0], [1], [0, 0, 1, 1], [], []>} : vector<256x576xbf16>, vector<576x64xbf16>, vector<256x64xf32> -> vector<256x64xf32>
    %c0_43 = arith.constant 0 : index
    %c0_44 = arith.constant 0 : index
    %62 = vector.load %arg6[%c0_43, %c0_44] : memref<1x64xf32, #tpu.memory_space<vmem>>, vector<1x64xf32>
    %63 = vector.shape_cast %62 : vector<1x64xf32> to vector<64xf32>
    %64 = vector.shape_cast %63 : vector<64xf32> to vector<1x64xf32>
    %65 = vector.broadcast %64 : vector<1x64xf32> to vector<256x64xf32>
    %66 = arith.mulf %61, %65 : vector<256x64xf32>
    %c0_45 = arith.constant 0 : index
    %c0_46 = arith.constant 0 : index
    %67 = vector.load %arg7[%c0_45, %c0_46] : memref<1x64xf32, #tpu.memory_space<vmem>>, vector<1x64xf32>
    %68 = vector.shape_cast %67 : vector<1x64xf32> to vector<64xf32>
    %69 = vector.shape_cast %68 : vector<64xf32> to vector<1x64xf32>
    %70 = vector.broadcast %69 : vector<1x64xf32> to vector<256x64xf32>
    %71 = arith.addf %66, %70 : vector<256x64xf32>
    %72 = vector.shape_cast %71 : vector<256x64xf32> to vector<16x16x64xf32>
    %c0_47 = arith.constant 0 : index
    %c0_48 = arith.constant 0 : index
    %c0_49 = arith.constant 0 : index
    %c0_50 = arith.constant 0 : index
    %73 = vector.load %arg1[%c0_47, %c0_48, %c0_49, %c0_50] : memref<1x16x16x64xf32, #tpu.memory_space<vmem>>, vector<1x16x16x64xf32>
    %74 = vector.shape_cast %73 : vector<1x16x16x64xf32> to vector<16x16x64xf32>
    %75 = arith.addf %72, %74 : vector<16x16x64xf32>
    %cst_51 = arith.constant 0.000000e+00 : f32
    %76 = vector.broadcast %cst_51 : f32 to vector<16x16x64xf32>
    %77 = arith.maximumf %75, %76 : vector<16x16x64xf32>
    %c0_52 = arith.constant 0 : index
    %c0_53 = arith.constant 0 : index
    %c0_54 = arith.constant 0 : index
    %c0_55 = arith.constant 0 : index
    %78 = vector.load %arg8[%c0_52, %c0_53, %c0_54, %c0_55] : memref<1x16x16x64xf32, #tpu.memory_space<vmem>>, vector<1x16x16x64xf32>
    %79 = vector.shape_cast %78 : vector<1x16x16x64xf32> to vector<16x16x64xf32>
    %80 = vector.shape_cast %77 : vector<16x16x64xf32> to vector<1x16x16x64xf32>
    tpu.vector_store %arg8[%c0_52, %c0_53, %c0_54, %c0_55], %80 {strides = array<i32>} : memref<1x16x16x64xf32, #tpu.memory_space<vmem>>, vector<1x16x16x64xf32>,
    return
  }
  func.func @transform_0(%arg0: i32) -> (i32, i32, i32, i32) {
    %c0_i32 = arith.constant 0 : i32
    %c0_i32_0 = arith.constant 0 : i32
    %c0_i32_1 = arith.constant 0 : i32
    %c0_i32_2 = arith.constant 0 : i32
    return %arg0, %c0_i32, %c0_i32_0, %c0_i32_1 : i32, i32, i32, i32
  }
  func.func @transform_1(%arg0: i32) -> (i32, i32) {
    %c0_i32 = arith.constant 0 : i32
    %c0_i32_0 = arith.constant 0 : i32
    %c0_i32_1 = arith.constant 0 : i32
    return %c0_i32, %c0_i32_0 : i32, i32
  }
  func.func @transform_2(%arg0: i32) -> (i32, i32) {
    %c0_i32 = arith.constant 0 : i32
    %c0_i32_0 = arith.constant 0 : i32
    %c0_i32_1 = arith.constant 0 : i32
    return %c0_i32, %c0_i32_0 : i32, i32
  }
  func.func @transform_3(%arg0: i32) -> (i32, i32) {
    %c0_i32 = arith.constant 0 : i32
    %c0_i32_0 = arith.constant 0 : i32
    %c0_i32_1 = arith.constant 0 : i32
    return %c0_i32, %c0_i32_0 : i32, i32
  }
  func.func @transform_4(%arg0: i32) -> (i32, i32) {
    %c0_i32 = arith.constant 0 : i32
    %c0_i32_0 = arith.constant 0 : i32
    %c0_i32_1 = arith.constant 0 : i32
    return %c0_i32, %c0_i32_0 : i32, i32
  }
  func.func @transform_5(%arg0: i32) -> (i32, i32) {
    %c0_i32 = arith.constant 0 : i32
    %c0_i32_0 = arith.constant 0 : i32
    %c0_i32_1 = arith.constant 0 : i32
    return %c0_i32, %c0_i32_0 : i32, i32
  }
  func.func @transform_6(%arg0: i32) -> (i32, i32) {
    %c0_i32 = arith.constant 0 : i32
    %c0_i32_0 = arith.constant 0 : i32
    %c0_i32_1 = arith.constant 0 : i32
    return %c0_i32, %c0_i32_0 : i32, i32
  }
  func.func @transform_7(%arg0: i32) -> (i32, i32, i32, i32) {
    %c0_i32 = arith.constant 0 : i32
    %c0_i32_0 = arith.constant 0 : i32
    %c0_i32_1 = arith.constant 0 : i32
    %c0_i32_2 = arith.constant 0 : i32
    return %arg0, %c0_i32, %c0_i32_0, %c0_i32_1 : i32, i32, i32, i32
  }
}

</mosaic_0001>

<bundles_post_ra>
// kernel: decoder_basic_block.1
= control target key start
LH: loop header
LB: loop body
LE: loop exit
PB: predicated region body
PF: predicated region fallthrough
CT: control target
= control target key end

     0   :  { %12 = vsyncpa [#allocation4], 0  ;;  %s8744_s0 = inlined_call_operand.vmem [shape: f32[2,16,16,64], index: 0, kind: input, shape index: {}]   ;;  %s8745_s1 = inlined_call_operand.vmem [shape: bf16[576,64], index: 1, kind: input, shape index: {}]   ;;  %s8746_s2 = inlined_call_operand.vmem [shape: f32[1,64], index: 2, kind: input, shape index: {}]   ;;  %s8747_s3 = inlined_call_operand.vmem [shape: f32[1,64], index: 3, kind: input, shape index: {}]   ;;  %s8748_s4 = inlined_call_operand.vmem [shape: bf16[576,64], index: 4, kind: input, shape index: {}]   ;;  %s8749_s5 = inlined_call_operand.vmem [shape: f32[1,64], index: 5, kind: input, shape index: {}]   ;;  %s8750_s6 = inlined_call_operand.vmem [shape: f32[1,64], index: 6, kind: input, shape index: {}]   ;;  %s8751_s7 = inlined_call_operand.hbm [shape: f32[2,16,16,64], index: 7, kind: output, shape index: {}]  }
   0x1   :  { %14 = vsyncpa [#allocation4 + $0x1], 0  ;;  %s6190_s24 = smov 0   ;;  %s6192_s25 = smov 0  }
   0x2   :  { %s6194_s26 = smov 0   ;;  %s6196_s27 = smov 0  }
   0x3 LB: > { %s6211_s28 = sadd.s32 4294967295, %s6144_s27   ;;  %s5117_s29 = sadd.s32 4294967294, %s6144_s27   ;;  %s6144_s27 = sphi %s6196_s27, %s8871_s27   ;;  %s6140_s26 = sphi %s6194_s26, %s8870_s26   ;;  %s6136_s25 = sphi %s6192_s25, %s8869_s25   ;;  %s6132_s24 = sphi %s6190_s24, %s8868_s24  }
   0x4   : > { %s6215_s30 = sadd.s32 1, %s6144_s27   ;;  %s179_s8 = sadd.s32 1, %s6140_s26 }
   0x5   : > { %s176_s9 = ssub.s32 %s6144_s27, %s6215_s30  ;;  %p189_p0 = scmp.ne.s32.totalorder %s6140_s26, %s6136_s25 }
   0x6   : > { %p177_p1 = scmp.eq.s32.totalorder %s176_s9, 0  ;;  %p190_p2 = scmp.eq.s32.totalorder %s6211_s28, 1 }
   0x7   : > { %p195_p3 = scmp.ne.s32.totalorder %s6136_s25, %s6132_s24  ;;  %p196_p4 = scmp.eq.s32.totalorder %s5117_s29, 1 }
   0x8   : > { %s6226_s10 = scalar_select %p177_p1, %s6140_s26, %s179_s8  }
   0x9   : > { %p6228_p5 = por %p190_p2, %p189_p0  ;;  %p6232_p6 = por %p196_p4, %p195_p3 }
   0xa   : > { %p5120_p7 = scmp.ge.s32.totalorder %s6144_s27, 1  ;;  %p240_p8 = scmp.lt.s32.totalorder %s6144_s27, 3 }
   0xc   : > { %p241_p9 = pnand %p5120_p7, %p240_p8 }
   0xe   : > { %244 = sbr.rel (%p241_p9) target bundleno = 1210 (0x4ba), region = 48 }
  0x13   : > { %p272_p10 = scmp.lt.s32.totalorder %s6211_s28, 1  ;;  %vm278_vm0 = vcmask 519168   ;;  %v6146_v0 = vmov 0   ;;  %s6147_s18 = smov 64   ;;  %vm621_vm1 = vcmask 1040384   ;;  %vm688_vm4 = vcmask 1047552  }
  0x14   : > { %279 = vst.msk [vmem:[#allocation2] sm:$0xf] %vm278_vm0, %v6146_v0  ;;  %vm622_vm2 = vsmask.f32 256  ;;  %vm689_vm5 = vsmask.f32 7424 }
  0x15   : > { %s273_s13 = scalar_select %p272_p10, %s6211_s28, 1  ;;  %280 = vst.msk [vmem:[#allocation2 + $0x4] sm:$0xf] %vm278_vm0, %v6146_v0  ;;  %vm6302_vm3 = vmand %vm621_vm1, %vm622_vm2  ;;  %vm1508_vm7 = vcmask 523264  }
  0x16   : > { %282 = vst.msk [vmem:[#allocation2 + $0x88] sm:$0xf] %vm278_vm0, %v6146_v0  ;;  %vm6576_vm6 = vmand %vm688_vm4, %vm689_vm5  ;;  %s269_s23 = sand.u32 1, %s6136_s25   ;;  %s6002_s15 = sshll.u32 %s6211_s28, 8 }
  0x17   : > { %s5833_s14 = sshll.u32 %s273_s13, 8  ;;  %283 = vst.msk [vmem:[#allocation2 + $0x8c] sm:$0xf] %vm278_vm0, %v6146_v0  ;;  %s5121_s29 = sshll.u32 %s269_s23, 8 }
  0x18   : > { %s6247_s17 = scalar_lea.vmem %s8744_s0, %s5833_s14  ;;  %s5051_s20 = scalar_lea.hbm %s8751_s7, %s6002_s15 }
  0x19   : > { %v298_v1 = vld [vmem:[%s6247_s17 + $0x70] sm:$0xff]  ;;  %v299_v2 = vld [vmem:[%s6247_s17 + $0x78] sm:$0xff]  ;;  %v300_v8 = vld [vmem:[%s6247_s17 + $0x80] sm:$0xff]  ;;  %s5054_s22 = sshll.u32 %s5051_s20, 4  ;;  %s5040_s28 = scalar_lea.sflag [#allocation4], %s269_s23  ;;  %s5055_s22 = int_to_ptr.hbm [resolvable:$true] %s5054_s22 }
  0x1a   : > { %v302_v3 = vld [vmem:[%s6247_s17 + $0x90] sm:$0xff]  ;;  %v330_v4 = vpack.c.bf16 %v298_v1, %v298_v1  ;;  %v331_v5 = vpack.c.bf16 %v299_v2, %v299_v2  ;;  %v303_v6 = vld [vmem:[%s6247_s17 + $0x98] sm:$0xff]  ;;  %v301_v9 = vld [vmem:[%s6247_s17 + $0x88] sm:$0xff]  ;;  %v332_v13 = vpack.c.bf16 %v300_v8, %v300_v8  ;;  %s6102_s13 = scalar_lea.hbm %s8751_s7, 512 }
  0x1b   : > { %v334_v7 = vpack.c.bf16 %v302_v3, %v302_v3  ;;  %v335_v10 = vpack.c.bf16 %v303_v6, %v303_v6  ;;  %v284_v11 = vld [vmem:[%s6247_s17] sm:$0xff]  ;;  %v285_v14 = vld [vmem:[%s6247_s17 + $0x8] sm:$0xff]  ;;  %v333_v15 = vpack.c.bf16 %v301_v9, %v301_v9  ;;  %v286_v16 = vld [vmem:[%s6247_s17 + $0x10] sm:$0xff] }
  0x1c   : > { %363 = vst.msk [vmem:[#allocation2 + $0x40] sm:$0xf] %vm278_vm0, %v330_v4  ;;  %v6257_v12 = vld [vmem:[#allocation2] sm:$0xff]  ;;  %v316_v17 = vpack.c.bf16 %v284_v11, %v284_v11  ;;  %v287_v18 = vld [vmem:[%s6247_s17 + $0x18] sm:$0xff]  ;;  %v317_v19 = vpack.c.bf16 %v285_v14, %v285_v14  ;;  %v318_v21 = vpack.c.bf16 %v286_v16, %v286_v16  ;;  %v289_v22 = vld [vmem:[%s6247_s17 + $0x28] sm:$0xff] }
  0x1d   : > { %364 = vst.msk [vmem:[#allocation2 + $0x44] sm:$0xf] %vm278_vm0, %v331_v5  ;;  %1348 = vrot.lane.b32.xlu1 %v6257_v12, %s6147_s18  ;;  %v288_v20 = vld [vmem:[%s6247_s17 + $0x20] sm:$0xff]  ;;  %v319_v23 = vpack.c.bf16 %v287_v18, %v287_v18  ;;  %v321_v25 = vpack.c.bf16 %v289_v22, %v289_v22  ;;  %v290_v28 = vld [vmem:[%s6247_s17 + $0x30] sm:$0xff]  ;;  %v291_v29 = vld [vmem:[%s6247_s17 + $0x38] sm:$0xff] }
  0x1e   : > { %367 = vst.msk [vmem:[#allocation2 + $0x50] sm:$0xf] %vm278_vm0, %v334_v7  ;;  %v320_v24 = vpack.c.bf16 %v288_v20, %v288_v20  ;;  %v304_v26 = vld [vmem:[%s6247_s17 + $0xa0] sm:$0xff]  ;;  %v322_v30 = vpack.c.bf16 %v290_v28, %v290_v28  ;;  %v323_v31 = vpack.c.bf16 %v291_v29, %v291_v29  ;;  %v305_v32 = vld [vmem:[%s6247_s17 + $0xa8] sm:$0xff]  ;;  %v306_v52 = vld [vmem:[%s6247_s17 + $0xb0] sm:$0xff] }
  0x1f   : > { %368 = vst.msk [vmem:[#allocation2 + $0x54] sm:$0xf] %vm278_vm0, %v335_v10  ;;  %v336_v34 = vpack.c.bf16 %v304_v26, %v304_v26  ;;  %v337_v39 = vpack.c.bf16 %v305_v32, %v305_v32  ;;  %v292_v46 = vld [vmem:[%s6247_s17 + $0x40] sm:$0xff]  ;;  %v293_v47 = vld [vmem:[%s6247_s17 + $0x48] sm:$0xff]  ;;  %v307_v53 = vld [vmem:[%s6247_s17 + $0xb8] sm:$0xff]  ;;  %v338_v54 = vpack.c.bf16 %v306_v52, %v306_v52 }
  0x20   : > { %365 = vst.msk [vmem:[#allocation2 + $0x48] sm:$0xf] %vm278_vm0, %v332_v13  ;;  %v324_v48 = vpack.c.bf16 %v292_v46, %v292_v46  ;;  %v325_v51 = vpack.c.bf16 %v293_v47, %v293_v47  ;;  %v339_v55 = vpack.c.bf16 %v307_v53, %v307_v53  ;;  %v294_v59 = vld [vmem:[%s6247_s17 + $0x50] sm:$0xff]  ;;  %v295_v60 = vld [vmem:[%s6247_s17 + $0x58] sm:$0xff]  ;;  %v296_v9 = vld [vmem:[%s6247_s17 + $0x60] sm:$0xff] }
  0x21   : > { %366 = vst.msk [vmem:[#allocation2 + $0x4c] sm:$0xf] %vm278_vm0, %v333_v15  ;;  %v326_v0 = vpack.c.bf16 %v294_v59, %v294_v59  ;;  %v327_v1 = vpack.c.bf16 %v295_v60, %v295_v60  ;;  %v297_v10 = vld [vmem:[%s6247_s17 + $0x68] sm:$0xff]  ;;  %v328_v14 = vpack.c.bf16 %v296_v9, %v296_v9  ;;  %v308_v16 = vld [vmem:[%s6247_s17 + $0xc0] sm:$0xff]  ;;  %v5888_v47 = vld [vmem:[%s8745_s1 + $0x30] sm:$0xff] }
  0x22   : > { %349 = vst.msk [vmem:[#allocation2 + $0x8] sm:$0xf] %vm278_vm0, %v316_v17  ;;  %v329_v15 = vpack.c.bf16 %v297_v10, %v297_v10  ;;  %v309_v17 = vld [vmem:[%s6247_s17 + $0xc8] sm:$0xff]  ;;  %v5896_v52 = vld [vmem:[%s8745_s1 + $0x70] sm:$0xff]  ;;  %v5886_v60 = vld [vmem:[%s8745_s1 + $0x20] sm:$0xff] }
  0x23   : > { %350 = vst.msk [vmem:[#allocation2 + $0xc] sm:$0xf] %vm278_vm0, %v317_v19  ;;  %v340_v19 = vpack.c.bf16 %v308_v16, %v308_v16  ;;  %v341_v20 = vpack.c.bf16 %v309_v17, %v309_v17 }
  0x24   : > { %v6274_v27 = vld [vmem:[#allocation2 + $0x40] sm:$0xff]  ;;  %351 = vst.msk [vmem:[#allocation2 + $0x10] sm:$0xf] %vm278_vm0, %v318_v21 }
  0x25   : > { %352 = vst.msk [vmem:[#allocation2 + $0x14] sm:$0xf] %vm278_vm0, %v319_v23  ;;  %1364 = vrot.lane.b32.xlu0 %v6274_v27, %s6147_s18 }
  0x26   : > { %v6283_v33 = vld [vmem:[#allocation2 + $0x50] sm:$0xff]  ;;  %353 = vst.msk [vmem:[#allocation2 + $0x18] sm:$0xf] %vm278_vm0, %v320_v24 }
  0x27   : > { %354 = vst.msk [vmem:[#allocation2 + $0x1c] sm:$0xf] %vm278_vm0, %v321_v25  ;;  %v8762_v35 = vshrl.u32 %v6283_v33, 16  ;;  %v8763_v36 = vshll.u32 %v6283_v33, 16  ;;  %v6334_v61 = vld [vmem:[#allocation2 + $0x50] sm:$0xff] }
  0x28   : > { %v6289_v37 = vld [vmem:[#allocation2 + $0x48] sm:$0xff]  ;;  %355 = vst.msk [vmem:[#allocation2 + $0x20] sm:$0xf] %vm278_vm0, %v322_v30  ;;  %v310_v30 = vld [vmem:[%s6247_s17 + $0xd0] sm:$0xff] }
  0x29   : > { %v6291_v38 = vld [vmem:[#allocation2 + $0x48] sm:$0xff]  ;;  %356 = vst.msk [vmem:[#allocation2 + $0x24] sm:$0xf] %vm278_vm0, %v323_v31  ;;  %v885_v40 = vrot.slane %v8762_v35, 7  ;;  %v8766_v41 = vshrl.u32 %v6289_v37, 16  ;;  %v8767_v42 = vshll.u32 %v6289_v37, 16 }
  0x2a   : > { %1366 = vrot.lane.b32.xlu1 %v6291_v38, %s6147_s18  ;;  %369 = vst.msk [vmem:[#allocation2 + $0x58] sm:$0xf] %vm278_vm0, %v336_v34  ;;  %v6328_v57 = vld [vmem:[#allocation2 + $0x8] sm:$0xff]  ;;  %v311_v31 = vld [vmem:[%s6247_s17 + $0xd8] sm:$0xff] }
  0x2b   : > { %v888_v44 = vor.u32 %v8763_v36, %v885_v40  ;;  %v878_v45 = vrot.slane %v8766_v41, 7  ;;  %370 = vst.msk [vmem:[#allocation2 + $0x5c] sm:$0xf] %vm278_vm0, %v337_v39  ;;  %v5889_v39 = vld [vmem:[%s8745_s1 + $0x38] sm:$0xff]  ;;  %v342_v40 = vpack.c.bf16 %v310_v30, %v310_v30 }
  0x2c   : > { %357 = vst.msk [vmem:[#allocation2 + $0x28] sm:$0xf] %vm278_vm0, %v324_v48  ;;  %v6350_v5 = vld [vmem:[#allocation2 + $0x10] sm:$0xff]  ;;  %6003 = vmatpush.bf16.msra.mxu2 %v5889_v39  ;;  %2085 = vmatpush.bf16.msra.mxu0 %v5889_v39  ;;  %v5897_v48 = vld [vmem:[%s8745_s1 + $0x78] sm:$0xff] }
  0x2d   : > { %v956_v49 = vsel %vm6302_vm3, 0, %v888_v44  ;;  %v881_v50 = vor.u32 %v8767_v42, %v878_v45  ;;  %358 = vst.msk [vmem:[#allocation2 + $0x2c] sm:$0xf] %vm278_vm0, %v325_v51  ;;  %v343_v44 = vpack.c.bf16 %v311_v31, %v311_v31  ;;  %6011 = vmatpush.bf16.msra.mxu3 %v5897_v48  ;;  %2174 = vmatpush.bf16.msra.mxu1 %v5897_v48  ;;  %v6462_v16 = vld [vmem:[#allocation2 + $0x10] sm:$0xff] }
  0x2e   : > { %1414 = vrot.lane.b32.xlu2 %v956_v49, %s6147_s18  ;;  %371 = vst.msk [vmem:[#allocation2 + $0x60] sm:$0xf] %vm278_vm0, %v338_v54  ;;  %v6377_v22 = vld [vmem:[#allocation2 + $0x18] sm:$0xff]  ;;  %v5887_v49 = vld [vmem:[%s8745_s1 + $0x28] sm:$0xff]  ;;  %v5884_v31 = vld [vmem:[%s8745_s1 + $0x10] sm:$0xff] }
  0x2f   : > { %v955_v56 = vsel %vm6302_vm3, 0, %v881_v50  ;;  %372 = vst.msk [vmem:[#allocation2 + $0x64] sm:$0xf] %vm278_vm0, %v339_v55  ;;  %v314_v48 = vld [vmem:[%s6247_s17 + $0xf0] sm:$0xff] }
  0x30   : > { %1412 = vrot.lane.b32.xlu0 %v955_v56, %s6147_s18  ;;  %359 = vst.msk [vmem:[#allocation2 + $0x30] sm:$0xf] %vm278_vm0, %v326_v0  ;;  %v6388_v25 = vld [vmem:[#allocation2 + $0x20] sm:$0xff]  ;;  %6004 = vmatpush.bf16.msra.mxu2 %v5888_v47  ;;  %v6438_v56 = vld [vmem:[#allocation2 + $0x8] sm:$0xff] }
  0x31   : > { %360 = vst.msk [vmem:[#allocation2 + $0x34] sm:$0xf] %vm278_vm0, %v327_v1  ;;  %2086 = vmatpush.bf16.msra.mxu0 %v5888_v47  ;;  %6012 = vmatpush.bf16.msra.mxu3 %v5896_v52  ;;  %v312_v0 = vld [vmem:[%s6247_s17 + $0xe0] sm:$0xff]  ;;  %v313_v1 = vld [vmem:[%s6247_s17 + $0xe8] sm:$0xff]  ;;  %v820_v9 = vshrl.u32 %v6438_v56, 16 }
  0x32   : > { %v6330_v58 = vld [vmem:[#allocation2 + $0x58] sm:$0xff]  ;;  %361 = vst.msk [vmem:[#allocation2 + $0x38] sm:$0xf] %vm278_vm0, %v328_v14  ;;  %2175 = vmatpush.bf16.msra.mxu1 %v5896_v52 }
  0x33   : > { %v8764_v62 = vshrl.u32 %v6330_v58, 16  ;;  %v8765_v63 = vshll.u32 %v6330_v58, 16  ;;  %v6359_v11 = vld [vmem:[#allocation2 + $0x58] sm:$0xff]  ;;  %362 = vst.msk [vmem:[#allocation2 + $0x3c] sm:$0xf] %vm278_vm0, %v329_v15  ;;  %v822_v14 = vrot.slane %v820_v9, 7 }
  0x34   : > { %373 = vst.msk [vmem:[#allocation2 + $0x68] sm:$0xf] %vm278_vm0, %v340_v19  ;;  %v6412_v46 = vld [vmem:[#allocation2 + $0x28] sm:$0xff]  ;;  %6005 = vmatpush.bf16.msra.mxu2 %v5887_v49  ;;  %v823_v15 = vshll.u32 %v6438_v56, 16  ;;  %v5885_v19 = vld [vmem:[%s8745_s1 + $0x18] sm:$0xff] }
  0x35   : > { %v892_v2 = vrot.slane %v8764_v62, 7  ;;  %374 = vst.msk [vmem:[#allocation2 + $0x6c] sm:$0xf] %vm278_vm0, %v341_v20  ;;  %2087 = vmatpush.bf16.msra.mxu0 %v5887_v49  ;;  %v5895_v20 = vld [vmem:[%s8745_s1 + $0x68] sm:$0xff]  ;;  %v315_v49 = vld [vmem:[%s6247_s17 + $0xf8] sm:$0xff]  ;;  %v560_v62 = vshll.u32 %v6291_v38, 16 }
  0x36   : > { %1350 = vrot.lane.b32.xlu2 %v6328_v57, %s6147_s18  ;;  %v6348_v4 = vld [vmem:[#allocation2 + $0x60] sm:$0xff]  ;;  %375 = vst.msk [vmem:[#allocation2 + $0x70] sm:$0xf] %vm278_vm0, %v342_v40  ;;  %v825_v17 = vor.u32 %v823_v15, %v822_v14  ;;  %6013 = vmatpush.bf16.msra.mxu3 %v5895_v20  ;;  %v830_v40 = vshll.u32 %v6462_v16, 16 }
  0x37   : > { %v895_v3 = vor.u32 %v8765_v63, %v892_v2  ;;  %v8760_v7 = vshrl.u32 %v6348_v4, 16  ;;  %v8761_v8 = vshll.u32 %v6348_v4, 16  ;;  %v6382_v23 = vld [vmem:[#allocation2 + $0x60] sm:$0xff]  ;;  %376 = vst.msk [vmem:[#allocation2 + $0x74] sm:$0xf] %vm278_vm0, %v343_v44  ;;  %v6487_v44 = vld [vmem:[#allocation2 + $0x18] sm:$0xff]  ;;  %2176 = vmatpush.bf16.msra.mxu1 %v5895_v20 }
  0x38   : > { %1368 = vrot.lane.b32.xlu0 %v6334_v61, %s6147_s18  ;;  %v6432_v53 = vld [vmem:[#allocation2 + $0x30] sm:$0xff]  ;;  %6006 = vmatpush.bf16.msra.mxu2 %v5886_v60  ;;  %v5882_v14 = vld [vmem:[%s8745_s1] sm:$0xff]  ;;  %v837_v20 = vshll.u32 %v6487_v44, 16 }
  0x39   : > { %v957_v6 = vsel %vm6302_vm3, 0, %v895_v3  ;;  %v899_v13 = vrot.slane %v8760_v7, 7  ;;  %v344_v3 = vpack.c.bf16 %v312_v0, %v312_v0  ;;  %2088 = vmatpush.bf16.msra.mxu0 %v5886_v60  ;;  %v347_v60 = vpack.c.bf16 %v315_v49, %v315_v49 }
  0x3a   : > { %1416 = vrot.lane.b32.xlu1 %v957_v6, %s6147_s18  ;;  %v345_v6 = vpack.c.bf16 %v313_v1, %v313_v1  ;;  %v834_v1 = vshrl.u32 %v6487_v44, 16 }
  0x3b   : > { %v902_v18 = vor.u32 %v8761_v8, %v899_v13  ;;  %377 = vst.msk [vmem:[#allocation2 + $0x78] sm:$0xf] %vm278_vm0, %v344_v3  ;;  %v6457_v13 = vld [vmem:[#allocation2 + $0x38] sm:$0xff]  ;;  %v5883_v3 = vld [vmem:[%s8745_s1 + $0x8] sm:$0xff] }
  0x3c   : > { %v6386_v24 = vld [vmem:[#allocation2 + $0x68] sm:$0xff]  ;;  %378 = vst.msk [vmem:[#allocation2 + $0x7c] sm:$0xf] %vm278_vm0, %v345_v6  ;;  %6007 = vmatpush.bf16.msra.mxu2 %v5885_v19  ;;  %v5893_v6 = vld [vmem:[%s8745_s1 + $0x58] sm:$0xff] }
  0x3d   : > { %v958_v21 = vsel %vm6302_vm3, 0, %v902_v18  ;;  %v8758_v26 = vshrl.u32 %v6386_v24, 16  ;;  %v8759_v28 = vshll.u32 %v6386_v24, 16  ;;  %v6400_v34 = vld [vmem:[#allocation2 + $0x68] sm:$0xff]  ;;  %v827_v18 = vshrl.u32 %v6462_v16, 16  ;;  %2089 = vmatpush.bf16.msra.mxu0 %v5885_v19 }
  0x3e   : > { %1352 = vrot.lane.b32.xlu2 %v6350_v5, %s6147_s18  ;;  %v6425_v50 = vld [vmem:[#allocation2 + $0x70] sm:$0xff]  ;;  %380 = vst.msk [vmem:[#allocation2 + $0x84] sm:$0xf] %vm278_vm0, %v347_v60  ;;  %v836_v19 = vrot.slane %v834_v1, 7 }
  0x3f   : > { %v906_v29 = vrot.slane %v8758_v26, 7  ;;  %v6427_v51 = vld [vmem:[#allocation2 + $0x70] sm:$0xff]  ;;  %v8756_v54 = vshrl.u32 %v6425_v50, 16  ;;  %v8757_v55 = vshll.u32 %v6425_v50, 16  ;;  %v829_v39 = vrot.slane %v827_v18, 7 }
  0x40   : > { %1370 = vrot.lane.b32.xlu0 %v6359_v11, %s6147_s18  ;;  %6008 = vmatpush.bf16.msra.mxu2 %v5884_v31 }
  0x41   : > { %v909_v32 = vor.u32 %v8759_v28, %v906_v29  ;;  %v913_v59 = vrot.slane %v8756_v54, 7  ;;  %v832_v0 = vor.u32 %v830_v40, %v829_v39  ;;  %2090 = vmatpush.bf16.msra.mxu0 %v5884_v31  ;;  %v5892_v31 = vld [vmem:[%s8745_s1 + $0x50] sm:$0xff]  ;;  %v839_v39 = vor.u32 %v837_v20, %v836_v19  ;;  %v5905_v19 = vld [vmem:[%s8745_s1 + $0xb8] sm:$0xff] }
  0x42   : > { %1418 = vrot.lane.b32.xlu1 %v958_v21, %s6147_s18  ;;  %v501_v54 = vshrl.u32 %v6328_v57, 16  ;;  %v965_v28 = vrot.slane %v830_v40, 1 }
  0x43   : > { %v959_v45 = vsel %vm6302_vm3, 0, %v909_v32  ;;  %v916_v2 = vor.u32 %v8757_v55, %v913_v59  ;;  %v6475_v21 = vld [vmem:[#allocation2 + $0x78] sm:$0xff]  ;;  %v947_v32 = vsel %vm6302_vm3, 0, %v825_v17  ;;  %v346_v59 = vpack.c.bf16 %v314_v48, %v314_v48  ;;  %v5891_v48 = vld [vmem:[%s8745_s1 + $0x48] sm:$0xff] }
  0x44   : > { %v8754_v29 = vshrl.u32 %v6475_v21, 16  ;;  %v8755_v30 = vshll.u32 %v6475_v21, 16  ;;  %6009 = vmatpush.bf16.msra.mxu2 %v5883_v3  ;;  %v948_v17 = vsel %vm6302_vm3, 0, %v832_v0 }
  0x45   : > { %v960_v10 = vsel %vm6302_vm3, 0, %v916_v2  ;;  %379 = vst.msk [vmem:[#allocation2 + $0x80] sm:$0xf] %vm278_vm0, %v346_v59  ;;  %2091 = vmatpush.bf16.msra.mxu0 %v5883_v3  ;;  %v949_v59 = vsel %vm6302_vm3, 0, %v839_v39 }
  0x46   : > { %1354 = vrot.lane.b32.xlu2 %v6377_v22, %s6147_s18  ;;  %v920_v47 = vrot.slane %v8754_v29, 7 }
  0x48   : > { %1372 = vrot.lane.b32.xlu0 %v6382_v23, %s6147_s18  ;;  %v923_v52 = vor.u32 %v8755_v30, %v920_v47  ;;  %6010 = vmatpush.bf16.msra.mxu2 %v5882_v14 }
  0x49   : > { %2092 = vmatpush.bf16.msra.mxu0 %v5882_v14 }
  0x4a   : > { %1420 = vrot.lane.b32.xlu1 %v959_v45, %s6147_s18  ;;  %v5894_v45 = vld [vmem:[%s8745_s1 + $0x60] sm:$0xff]  ;;  %v961_v2 = vsel %vm6302_vm3, 0, %v923_v52 }
  0x4b   : > { %6014 = vmatpush.bf16.msra.mxu3 %v5894_v45  ;;  %2177 = vmatpush.bf16.msra.mxu1 %v5894_v45 }
  0x4c   : > { %v6534_v47 = vld [vmem:[#allocation2 + $0x80] sm:$0xff]  ;;  %2263 = vmatpush.bf16.msrb.mxu2 %v5905_v19 }
  0x4d   : > { %v8752_v49 = vshrl.u32 %v6534_v47, 16  ;;  %v8753_v52 = vshll.u32 %v6534_v47, 16 }
  0x4e   : > { %1356 = vrot.lane.b32.xlu2 %v6388_v25, %s6147_s18 }
  0x4f   : > { %6015 = vmatpush.bf16.msra.mxu3 %v5893_v6  ;;  %2178 = vmatpush.bf16.msra.mxu1 %v5893_v6  ;;  %v927_v3 = vrot.slane %v8752_v49, 7  ;;  %v6595_v49 = vld [vmem:[#allocation2 + $0x10] sm:$0xff] }
  0x50   : > { %1374 = vrot.lane.b32.xlu0 %v6400_v34, %s6147_s18 }
  0x51   : > { %v930_v6 = vor.u32 %v8753_v52, %v927_v3 }
  0x52   : > { %1422 = vrot.lane.b32.xlu1 %v960_v10, %s6147_s18  ;;  %v6510_v10 = vld [vmem:[#allocation2 + $0x78] sm:$0xff] }
  0x53   : > { %6016 = vmatpush.bf16.msra.mxu3 %v5892_v31  ;;  %2179 = vmatpush.bf16.msra.mxu1 %v5892_v31  ;;  %v494_v31 = vshrl.u32 %v6257_v12, 16 }
  0x56   : > { %1358 = vrot.lane.b32.xlu2 %v6412_v46, %s6147_s18 }
  0x57   : > { %6017 = vmatpush.bf16.msra.mxu3 %v5891_v48  ;;  %2180 = vmatpush.bf16.msra.mxu1 %v5891_v48  ;;  %v963_v48 = vrot.slane %v823_v15, 1  ;;  %v6580_v15 = vld [vmem:[#allocation2 + $0x28] sm:$0xff] }
  0x58   : > { %1376 = vrot.lane.b32.xlu0 %v6427_v51, %s6147_s18  ;;  %v848_v19 = vshrl.u32 %v6580_v15, 16 }
  0x59   : > { %v964_v3 = vor.u32 %v963_v48, %v820_v9  ;;  %v550_v9 = vshrl.u32 %v6274_v27, 16  ;;  %v5917_v48 = vld [vmem:[%s8745_s1 + $0x118] sm:$0xff] }
  0x5a   : > { %1424 = vrot.lane.b32.xlu1 %v961_v2, %s6147_s18  ;;  %v5890_v2 = vld [vmem:[%s8745_s1 + $0x40] sm:$0xff]  ;;  %2445 = vmatpush.bf16.msrb.mxu0 %v5917_v48 }
  0x5b   : > { %6018 = vmatpush.bf16.msra.mxu3 %v5890_v2  ;;  %2181 = vmatpush.bf16.msra.mxu1 %v5890_v2  ;;  %v497_v2 = vshll.u32 %v6257_v12, 16  ;;  %v552_v52 = vrot.slane %v550_v9, 7 }
  0x5e   : > { %1360 = vrot.lane.b32.xlu2 %v6432_v53, %s6147_s18 }
  0x60   : > { %1378 = vrot.lane.b32.xlu0 %v6510_v10, %s6147_s18 }
  0x66   : > { %1362 = vrot.lane.b32.xlu2 %v6457_v13, %s6147_s18 }
  0x6e   : > { %1396 = vrot.lane.b32.xlu2 %v947_v32, %s6147_s18  ;;  %v6529_v32 = vld [vmem:[#allocation2 + $0x20] sm:$0xff] }
  0x6f   : > { %v841_v45 = vshrl.u32 %v6529_v32, 16  ;;  %v844_v0 = vshll.u32 %v6529_v32, 16 }
  0x71   : > { %v843_v60 = vrot.slane %v841_v45, 7 }
  0x73   : > { %v846_v14 = vor.u32 %v844_v0, %v843_v60  ;;  %v496_v60 = vrot.slane %v494_v31, 7 }
  0x75   : > { %v950_v39 = vsel %vm6302_vm3, 0, %v846_v14  ;;  %v1011_v14 = vsel %vm6576_vm6, %v964_v3, 0  ;;  %v850_v3 = vrot.slane %v848_v19, 7 }
  0x76   : > { %1398 = vrot.lane.b32.xlu2 %v948_v17, %s6147_s18  ;;  %v962_v17 = vsel %vm6302_vm3, 0, %v930_v6  ;;  %1444 = vrot.lane.b32.xlu0 %v1011_v14, %s6147_s18 }
  0x77   : > { %1426 = vrot.lane.b32.xlu1 %v962_v17, %s6147_s18 }
  0x7e   : > { %1400 = vrot.lane.b32.xlu2 %v949_v59, %s6147_s18  ;;  %v5913_v59 = vld [vmem:[%s8745_s1 + $0xf8] sm:$0xff] }
  0x7f   : > { %2352 = vmatpush.bf16.msrb.mxu3 %v5913_v59  ;;  %v851_v59 = vshll.u32 %v6580_v15, 16  ;;  %1476 = vrot.lane.b32.xlu1 %v6595_v49, %s6147_s18 }
  0x81   : > { %v853_v14 = vor.u32 %v851_v59, %v850_v3  ;;  %v5904_v3 = vld [vmem:[%s8745_s1 + $0xb0] sm:$0xff] }
  0x82   : > { %2264 = vmatpush.bf16.msrb.mxu2 %v5904_v3 }
  0x83   : > { %v951_v30 = vsel %vm6302_vm3, 0, %v853_v14  ;;  %v504_v14 = vshll.u32 %v6328_v57, 16 }
  0x86   : > { %1402 = vrot.lane.b32.xlu2 %v950_v39, %s6147_s18  ;;  %v499_v39 = vor.u32 %v497_v2, %v496_v60  ;;  %v553_v60 = vshll.u32 %v6274_v27, 16 }
  0x88   : > { %v6584_v17 = vpop.permute.xlu2 %1414  ;;  %v624_v29 = vsel %vm6302_vm3, 0, %v499_v39  ;;  %v555_v27 = vor.u32 %v553_v60, %v552_v52  ;;  %v503_v39 = vrot.slane %v501_v54, 7  ;;  %v6627_v52 = vld [vmem:[#allocation2 + $0x30] sm:$0xff]  ;;  %v656_v36 = vrot.slane %v553_v60, 1 }
  0x8a   : > { %v506_v7 = vor.u32 %v504_v14, %v503_v39  ;;  %v657_v60 = vor.u32 %v656_v36, %v550_v9  ;;  %v5903_v36 = vld [vmem:[%s8745_s1 + $0xa8] sm:$0xff] }
  0x8b   : > { %2265 = vmatpush.bf16.msrb.mxu2 %v5903_v36  ;;  %v6674_v36 = vld [vmem:[#allocation2 + $0x38] sm:$0xff] }
  0x8e   : > { %1404 = vrot.lane.b32.xlu2 %v951_v30, %s6147_s18  ;;  %v5912_v30 = vld [vmem:[%s8745_s1 + $0xf0] sm:$0xff] }
  0x8f   : > { %v1349_v55 = vpop.permute.xlu1 %1348  ;;  %2353 = vmatpush.bf16.msrb.mxu3 %v5912_v30 }
  0x90   : > { %v1351_v48 = vpop.permute.xlu2 %1350  ;;  %v1511_v26 = vsel %vm1508_vm7, %v624_v29, %v1349_v55  ;;  %v632_v55 = vsel %vm6302_vm3, 0, %v555_v27  ;;  %v966_v29 = vor.u32 %v965_v28, %v827_v18  ;;  %v855_v28 = vshrl.u32 %v6627_v52, 16  ;;  %v6637_v27 = vld [vmem:[#allocation2 + $0x18] sm:$0xff] }
  0x91   : > { %2093 = vmatmul.bf16.vlgmr.msra.gmra.mxu0 %v1511_v26  ;;  %v557_v26 = vshrl.u32 %v6291_v38, 16  ;;  %v858_v18 = vshll.u32 %v6627_v52, 16  ;;  %1478 = vrot.lane.b32.xlu1 %v6637_v27, %s6147_s18  ;;  %v8769_v38 = vshrl.u32 %v6350_v5, 16 }
  0x92   : > { %v1012_v40 = vsel %vm6576_vm6, %v966_v29, 0  ;;  %v857_v39 = vrot.slane %v855_v28, 7  ;;  %v625_v29 = vsel %vm6302_vm3, 0, %v506_v7  ;;  %v699_v7 = vsel %vm6576_vm6, %v657_v60, 0 }
  0x93   : > { %1446 = vrot.lane.b32.xlu0 %v1012_v40, %s6147_s18  ;;  %v559_v30 = vrot.slane %v557_v26, 7  ;;  %v967_v60 = vrot.slane %v837_v20, 1 }
  0x97   : > { %v1365_v3 = vpop.permute.xlu0 %1364 }
  0x98   : > { %v1353_v8 = vpop.permute.xlu2 %1352  ;;  %v1543_v35 = vsel %vm1508_vm7, %v632_v55, %v1365_v3  ;;  %v562_v55 = vor.u32 %v560_v62, %v559_v30  ;;  %v1515_v3 = vsel %vm1508_vm7, %v625_v29, %v1351_v48  ;;  %v510_v29 = vrot.slane %v8769_v38, 7 }
  0x99   : > { %2133 = vmatmul.bf16.vlgmr.msra.gmra.mxu2 %v1543_v35  ;;  %v860_v35 = vor.u32 %v858_v18, %v857_v39 }
  0x9a   : > { %v633_v48 = vsel %vm6302_vm3, 0, %v562_v55  ;;  %v968_v55 = vor.u32 %v967_v60, %v834_v1  ;;  %v8768_v1 = vshrl.u32 %v6674_v36, 16  ;;  %v6691_v60 = vld [vmem:[#allocation2 + $0x20] sm:$0xff] }
  0x9b   : > { %v952_v40 = vsel %vm6302_vm3, 0, %v860_v35  ;;  %v511_v35 = vshll.u32 %v6350_v5, 16  ;;  %1480 = vrot.lane.b32.xlu1 %v6691_v60, %s6147_s18 }
  0x9c   : > { %1406 = vrot.lane.b32.xlu2 %v952_v40, %s6147_s18  ;;  %v1367_v39 = vpop.permute.xlu1 %1366  ;;  %v1013_v20 = vsel %vm6576_vm6, %v968_v55, 0 }
  0x9d   : > { %v1547_v40 = vsel %vm1508_vm7, %v633_v48, %v1367_v39  ;;  %v513_v41 = vor.u32 %v511_v35, %v510_v29  ;;  %1448 = vrot.lane.b32.xlu0 %v1013_v20, %s6147_s18  ;;  %v864_v39 = vrot.slane %v8768_v1, 7  ;;  %v865_v29 = vshll.u32 %v6674_v36, 16 }
  0x9e   : > { %v567_v20 = vshll.u32 %v6334_v61, 16 }
  0xa0   : > { %v6653_v63 = vpop.permute.xlu2 %1354 }
  0xa1   : > { %2098 = vmatmul.bf16.gmra.mxu0 %v1515_v3  ;;  %v5911_v3 = vld [vmem:[%s8745_s1 + $0xe8] sm:$0xff] }
  0xa2   : > { %v1413_v9 = vpop.permute.xlu0 %1412  ;;  %2354 = vmatpush.bf16.msrb.mxu3 %v5911_v3  ;;  %v5902_v3 = vld [vmem:[%s8745_s1 + $0xa0] sm:$0xff] }
  0xa3   : > { %v1607_v30 = vsel %vm1508_vm7, %v699_v7, %v1413_v9  ;;  %v658_v7 = vrot.slane %v560_v62, 1  ;;  %v564_v9 = vshrl.u32 %v6334_v61, 16  ;;  %v5916_v62 = vld [vmem:[%s8745_s1 + $0x110] sm:$0xff]  ;;  %2266 = vmatpush.bf16.msrb.mxu2 %v5902_v3  ;;  %v8771_v61 = vshrl.u32 %v6377_v22, 16 }
  0xa4   : > { %2222 = vmatmul.bf16.vlgmr.msra.gmra.mxu3 %v1607_v30  ;;  %2446 = vmatpush.bf16.msrb.mxu0 %v5916_v62  ;;  %v518_v3 = vshll.u32 %v6377_v22, 16 }
  0xa5   : > { %v659_v48 = vor.u32 %v658_v7, %v557_v26  ;;  %v566_v55 = vrot.slane %v564_v9, 7  ;;  %v626_v26 = vsel %vm6302_vm3, 0, %v513_v41 }
  0xa6   : > { %v1519_v42 = vsel %vm1508_vm7, %v626_v26, %v1353_v8  ;;  %v517_v8 = vrot.slane %v8771_v61, 7  ;;  %v660_v26 = vrot.slane %v567_v20, 1  ;;  %v522_v61 = vshrl.u32 %v6388_v25, 16 }
  0xa7   : > { %v700_v7 = vsel %vm6576_vm6, %v659_v48, 0  ;;  %v569_v38 = vor.u32 %v567_v20, %v566_v55  ;;  %v969_v55 = vrot.slane %v844_v0, 1 }
  0xa8   : > { %v6681_v30 = vpop.permute.xlu2 %1356  ;;  %v1611_v62 = vsel %vm1508_vm7, %v700_v7, %v6584_v17  ;;  %v520_v7 = vor.u32 %v518_v3, %v517_v8  ;;  %v5901_v8 = vld [vmem:[%s8745_s1 + $0x98] sm:$0xff] }
  0xa9   : > { %2138 = vmatmul.bf16.gmra.mxu2 %v1547_v40  ;;  %v867_v40 = vor.u32 %v865_v29, %v864_v39  ;;  %v634_v48 = vsel %vm6302_vm3, 0, %v569_v38  ;;  %v6727_v38 = vld [vmem:[#allocation2 + $0x40] sm:$0xff] }
  0xaa   : > { %v1369_v39 = vpop.permute.xlu0 %1368  ;;  %2267 = vmatpush.bf16.msrb.mxu2 %v5901_v8 }
  0xab   : > { %v953_v1 = vsel %vm6302_vm3, 0, %v867_v40  ;;  %v1551_v17 = vsel %vm1508_vm7, %v634_v48, %v1369_v39  ;;  %v571_v40 = vshrl.u32 %v6359_v11, 16  ;;  %v661_v39 = vor.u32 %v660_v26, %v564_v9 }
  0xac   : > { %1408 = vrot.lane.b32.xlu2 %v953_v1, %s6147_s18  ;;  %v5910_v1 = vld [vmem:[%s8745_s1 + $0xe0] sm:$0xff]  ;;  %v8772_v48 = vshll.u32 %v6727_v38, 16 }
  0xad   : > { %2355 = vmatpush.bf16.msrb.mxu3 %v5910_v1  ;;  %v573_v1 = vrot.slane %v571_v40, 7  ;;  %v701_v26 = vsel %vm6576_vm6, %v661_v39, 0 }
  0xb0   : > { %v6710_v41 = vpop.permute.xlu2 %1358 }
  0xb1   : > { %2103 = vmatmul.bf16.gmra.mxu0 %v1519_v42  ;;  %v970_v42 = vor.u32 %v969_v55, %v841_v45  ;;  %v8770_v45 = vshrl.u32 %v6727_v38, 16  ;;  %v6741_v55 = vld [vmem:[#allocation2 + $0x28] sm:$0xff] }
  0xb2   : > { %1482 = vrot.lane.b32.xlu1 %v6741_v55, %s6147_s18 }
  0xb3   : > { %v1014_v0 = vsel %vm6576_vm6, %v970_v42, 0  ;;  %v871_v20 = vrot.slane %v8770_v45, 7  ;;  %v574_v42 = vshll.u32 %v6359_v11, 16  ;;  %v640_v45 = vrot.slane %v497_v2, 1  ;;  %v1371_v2 = vpop.permute.xlu0 %1370 }
  0xb4   : > { %2227 = vmatmul.bf16.gmra.mxu3 %v1611_v62  ;;  %1450 = vrot.lane.b32.xlu0 %v1014_v0, %s6147_s18  ;;  %v627_v0 = vsel %vm6302_vm3, 0, %v520_v7 }
  0xb5   : > { %v874_v9 = vor.u32 %v8772_v48, %v871_v20  ;;  %v1523_v11 = vsel %vm1508_vm7, %v627_v0, %v6653_v63  ;;  %v576_v20 = vor.u32 %v574_v42, %v573_v1  ;;  %v641_v39 = vor.u32 %v640_v45, %v494_v31 }
  0xb6   : > { %v524_v0 = vrot.slane %v522_v61, 7  ;;  %v971_v1 = vrot.slane %v851_v59, 1 }
  0xb7   : > { %v954_v7 = vsel %vm6302_vm3, 0, %v874_v9  ;;  %v635_v63 = vsel %vm6302_vm3, 0, %v576_v20  ;;  %v525_v9 = vshll.u32 %v6388_v25, 16  ;;  %v691_v31 = vsel %vm6576_vm6, %v641_v39, 0  ;;  %v6793_v39 = vld [vmem:[#allocation2 + $0x30] sm:$0xff] }
  0xb8   : > { %v6734_v62 = vpop.permute.xlu2 %1360  ;;  %1410 = vrot.lane.b32.xlu2 %v954_v7, %s6147_s18  ;;  %v972_v12 = vor.u32 %v971_v1, %v848_v19  ;;  %v1555_v45 = vsel %vm1508_vm7, %v635_v63, %v1371_v2  ;;  %v5900_v2 = vld [vmem:[%s8745_s1 + $0x90] sm:$0xff]  ;;  %v8804_v25 = vshrl.u32 %v6289_v37, 16 }
  0xb9   : > { %2143 = vmatmul.bf16.gmra.mxu2 %v1551_v17  ;;  %v1417_v17 = vpop.permute.xlu1 %1416  ;;  %v527_v59 = vor.u32 %v525_v9, %v524_v0  ;;  %v581_v0 = vshll.u32 %v6382_v23, 16 }
  0xba   : > { %v1615_v8 = vsel %vm1508_vm7, %v701_v26, %v1417_v17  ;;  %v5909_v17 = vld [vmem:[%s8745_s1 + $0xd8] sm:$0xff]  ;;  %v662_v26 = vrot.slane %v574_v42, 1  ;;  %v1015_v7 = vsel %vm6576_vm6, %v972_v12, 0  ;;  %v5915_v42 = vld [vmem:[%s8745_s1 + $0x108] sm:$0xff]  ;;  %1484 = vrot.lane.b32.xlu1 %v6793_v39, %s6147_s18  ;;  %2268 = vmatpush.bf16.msrb.mxu2 %v5900_v2 }
  0xbb   : > { %2356 = vmatpush.bf16.msrb.mxu3 %v5909_v17  ;;  %v628_v1 = vsel %vm6302_vm3, 0, %v527_v59  ;;  %v642_v17 = vrot.slane %v504_v14, 1  ;;  %2447 = vmatpush.bf16.msrb.mxu0 %v5915_v42  ;;  %v1373_v59 = vpop.permute.xlu0 %1372 }
  0xbc   : > { %1452 = vrot.lane.b32.xlu0 %v1015_v7, %s6147_s18 }
  0xc0   : > { %v6763_v48 = vpop.permute.xlu2 %1362 }
  0xc1   : > { %2108 = vmatmul.bf16.gmra.mxu0 %v1523_v11  ;;  %v578_v11 = vshrl.u32 %v6382_v23, 16  ;;  %v529_v23 = vshrl.u32 %v6412_v46, 16 }
  0xc3   : > { %v580_v63 = vrot.slane %v578_v11, 7 }
  0xc4   : > { %2232 = vmatmul.bf16.gmra.mxu3 %v1615_v8  ;;  %v663_v8 = vor.u32 %v662_v26, %v571_v40  ;;  %v1419_v40 = vpop.permute.xlu1 %1418  ;;  %v643_v26 = vor.u32 %v642_v17, %v501_v54  ;;  %v5908_v54 = vld [vmem:[%s8745_s1 + $0xd0] sm:$0xff] }
  0xc5   : > { %2357 = vmatpush.bf16.msrb.mxu3 %v5908_v54 }
  0xc6   : > { %v702_v12 = vsel %vm6576_vm6, %v663_v8, 0  ;;  %v692_v57 = vsel %vm6576_vm6, %v643_v26, 0 }
  0xc7   : > { %v1619_v14 = vsel %vm1508_vm7, %v702_v12, %v1419_v40 }
  0xc8   : > { %v1397_v20 = vpop.permute.xlu2 %1396 }
  0xc9   : > { %v1575_v19 = vsel %vm1508_vm7, %v691_v31, %v1397_v20  ;;  %2148 = vmatmul.bf16.gmra.mxu2 %v1555_v45  ;;  %v1527_v31 = vsel %vm1508_vm7, %v628_v1, %v6681_v30  ;;  %v583_v45 = vor.u32 %v581_v0, %v580_v63  ;;  %v531_v20 = vrot.slane %v529_v23, 7 }
  0xca   : > { %2182 = vmatmul.bf16.vlgmr.msra.gmra.mxu1 %v1575_v19  ;;  %v532_v19 = vshll.u32 %v6412_v46, 16  ;;  %v973_v30 = vrot.slane %v858_v18, 1  ;;  %v664_v63 = vrot.slane %v581_v0, 1  ;;  %v585_v1 = vshrl.u32 %v6400_v34, 16  ;;  %v5899_v0 = vld [vmem:[%s8745_s1 + $0x88] sm:$0xff] }
  0xcb   : > { %v636_v7 = vsel %vm6302_vm3, 0, %v583_v45  ;;  %v588_v45 = vshll.u32 %v6400_v34, 16  ;;  %2269 = vmatpush.bf16.msrb.mxu2 %v5899_v0 }
  0xcc   : > { %v974_v42 = vor.u32 %v973_v30, %v855_v28  ;;  %v1559_v2 = vsel %vm1508_vm7, %v636_v7, %v1373_v59  ;;  %v534_v17 = vor.u32 %v532_v19, %v531_v20  ;;  %v665_v12 = vor.u32 %v664_v63, %v578_v11  ;;  %v6835_v28 = vld [vmem:[#allocation2 + $0x38] sm:$0xff]  ;;  %v1421_v11 = vpop.permute.xlu1 %1420 }
  0xcd   : > { %1486 = vrot.lane.b32.xlu1 %v6835_v28, %s6147_s18  ;;  %v536_v20 = vshrl.u32 %v6432_v53, 16  ;;  %v8798_v30 = vshrl.u32 %v6350_v5, 16  ;;  %v666_v0 = vrot.slane %v588_v45, 1 }
  0xce   : > { %v1016_v40 = vsel %vm6576_vm6, %v974_v42, 0  ;;  %v629_v26 = vsel %vm6302_vm3, 0, %v534_v17  ;;  %v703_v59 = vsel %vm6576_vm6, %v665_v12, 0  ;;  %v8799_v17 = vshrl.u32 %v6674_v36, 16 }
  0xcf   : > { %1454 = vrot.lane.b32.xlu0 %v1016_v40, %s6147_s18  ;;  %v1531_v7 = vsel %vm1508_vm7, %v629_v26, %v6710_v41  ;;  %v538_v42 = vrot.slane %v536_v20, 7  ;;  %v975_v41 = vrot.slane %v865_v29, 1 }
  0xd0   : > { %v1399_v8 = vpop.permute.xlu2 %1398 }
  0xd1   : > { %2113 = vmatmul.bf16.gmra.mxu0 %v1527_v31  ;;  %v1579_v18 = vsel %vm1508_vm7, %v692_v57, %v1399_v8  ;;  %v587_v31 = vrot.slane %v585_v1, 7  ;;  %v1623_v57 = vsel %vm1508_vm7, %v703_v59, %v1421_v11  ;;  %v976_v40 = vor.u32 %v975_v41, %v8799_v17  ;;  %v6880_v59 = vld [vmem:[#allocation2 + $0x40] sm:$0xff] }
  0xd2   : > { %v667_v11 = vor.u32 %v666_v0, %v585_v1  ;;  %v8800_v41 = vshrl.u32 %v6377_v22, 16 }
  0xd3   : > { %v590_v34 = vor.u32 %v588_v45, %v587_v31  ;;  %v592_v31 = vshrl.u32 %v6427_v51, 16  ;;  %v5914_v45 = vld [vmem:[%s8745_s1 + $0x100] sm:$0xff] }
  0xd4   : > { %2237 = vmatmul.bf16.gmra.mxu3 %v1619_v14  ;;  %v644_v14 = vrot.slane %v511_v35, 1  ;;  %v1375_v35 = vpop.permute.xlu0 %1374  ;;  %2448 = vmatpush.bf16.msrb.mxu0 %v5914_v45  ;;  %v1423_v1 = vpop.permute.xlu1 %1422 }
  0xd5   : > { %v637_v54 = vsel %vm6302_vm3, 0, %v590_v34  ;;  %v594_v34 = vrot.slane %v592_v31, 7  ;;  %1488 = vrot.lane.b32.xlu1 %v6880_v59, %s6147_s18 }
  0xd6   : > { %v645_v8 = vor.u32 %v644_v14, %v8798_v30  ;;  %v1563_v12 = vsel %vm1508_vm7, %v637_v54, %v1375_v35  ;;  %v1017_v14 = vsel %vm6576_vm6, %v976_v40, 0  ;;  %v595_v30 = vshll.u32 %v6427_v51, 16 }
  0xd7   : > { %1456 = vrot.lane.b32.xlu0 %v1017_v14, %s6147_s18  ;;  %v704_v35 = vsel %vm6576_vm6, %v667_v11, 0  ;;  %v543_v51 = vshrl.u32 %v6457_v13, 16  ;;  %v546_v40 = vshll.u32 %v6457_v13, 16  ;;  %v8810_v13 = vshrl.u32 %v6348_v4, 16 }
  0xd8   : > { %v1401_v63 = vpop.permute.xlu2 %1400  ;;  %v693_v5 = vsel %vm6576_vm6, %v645_v8, 0  ;;  %v668_v45 = vrot.slane %v595_v30, 1 }
  0xd9   : > { %2153 = vmatmul.bf16.gmra.mxu2 %v1559_v2  ;;  %v539_v2 = vshll.u32 %v6432_v53, 16  ;;  %v1583_v29 = vsel %vm1508_vm7, %v693_v5, %v1401_v63  ;;  %v545_v17 = vrot.slane %v543_v51, 7 }
  0xda   : > { %2187 = vmatmul.bf16.gmra.mxu1 %v1579_v18  ;;  %v5907_v18 = vld [vmem:[%s8745_s1 + $0xc8] sm:$0xff] }
  0xdb   : > { %2358 = vmatpush.bf16.msrb.mxu3 %v5907_v18  ;;  %v541_v26 = vor.u32 %v539_v2, %v538_v42  ;;  %v597_v42 = vor.u32 %v595_v30, %v594_v34 }
  0xdc   : > { %v1377_v5 = vpop.permute.xlu0 %1376 }
  0xdd   : > { %v630_v8 = vsel %vm6302_vm3, 0, %v541_v26  ;;  %v638_v18 = vsel %vm6302_vm3, 0, %v597_v42  ;;  %v8802_v26 = vshrl.u32 %v6727_v38, 16  ;;  %v648_v42 = vrot.slane %v525_v9, 1 }
  0xde   : > { %v1535_v54 = vsel %vm1508_vm7, %v630_v8, %v6734_v62  ;;  %v8801_v62 = vshll.u32 %v6727_v38, 16  ;;  %v1567_v11 = vsel %vm1508_vm7, %v638_v18, %v1377_v5  ;;  %v548_v8 = vor.u32 %v546_v40, %v545_v17 }
  0xdf   : > { %v1144_v9 = vshll.u32 %v6595_v49, 16 }
  0xe0   : > { %v1403_v0 = vpop.permute.xlu2 %1402  ;;  %v631_v30 = vsel %vm6302_vm3, 0, %v548_v8 }
  0xe1   : > { %2118 = vmatmul.bf16.gmra.mxu0 %v1531_v7  ;;  %v5898_v7 = vld [vmem:[%s8745_s1 + $0x80] sm:$0xff]  ;;  %v1539_v5 = vsel %vm1508_vm7, %v631_v30, %v6763_v48 }
  0xe2   : > { %2270 = vmatpush.bf16.msrb.mxu2 %v5898_v7  ;;  %v599_v7 = vshrl.u32 %v6510_v10, 16 }
  0xe4   : > { %2242 = vmatmul.bf16.gmra.mxu3 %v1623_v57  ;;  %v646_v57 = vrot.slane %v518_v3, 1  ;;  %v1627_v3 = vsel %vm1508_vm7, %v704_v35, %v1423_v1  ;;  %v669_v1 = vor.u32 %v668_v45, %v592_v31  ;;  %v601_v35 = vrot.slane %v599_v7, 7  ;;  %v1379_v17 = vpop.permute.xlu0 %1378 }
  0xe6   : > { %v647_v63 = vor.u32 %v646_v57, %v8800_v41  ;;  %v6927_v41 = vld [vmem:[#allocation2 + $0x48] sm:$0xff] }
  0xe7   : > { %1490 = vrot.lane.b32.xlu1 %v6927_v41, %s6147_s18 }
  0xe8   : > { %v694_v22 = vsel %vm6576_vm6, %v647_v63, 0  ;;  %v1425_v63 = vpop.permute.xlu1 %1424  ;;  %v1405_v48 = vpop.permute.xlu2 %1404 }
  0xe9   : > { %2158 = vmatmul.bf16.gmra.mxu2 %v1563_v12  ;;  %v977_v12 = vrot.slane %v8801_v62, 1  ;;  %v1587_v34 = vsel %vm1508_vm7, %v694_v22, %v1403_v0 }
  0xea   : > { %2192 = vmatmul.bf16.gmra.mxu1 %v1583_v29  ;;  %v5906_v29 = vld [vmem:[%s8745_s1 + $0xc0] sm:$0xff] }
  0xeb   : > { %v978_v14 = vor.u32 %v977_v12, %v8802_v26  ;;  %2359 = vmatpush.bf16.msrb.mxu3 %v5906_v29  ;;  %v8803_v12 = vshll.u32 %v6289_v37, 16  ;;  %v650_v37 = vrot.slane %v532_v19, 1  ;;  %v1151_v19 = vshll.u32 %v6637_v27, 16 }
  0xed   : > { %v1018_v57 = vsel %vm6576_vm6, %v978_v14, 0  ;;  %v979_v0 = vrot.slane %v8803_v12, 1  ;;  %v1284_v14 = vrot.slane %v1144_v9, 1 }
  0xee   : > { %1458 = vrot.lane.b32.xlu0 %v1018_v57, %s6147_s18 }
  0xf1   : > { %2123 = vmatmul.bf16.gmra.mxu0 %v1535_v54  ;;  %v602_v54 = vshll.u32 %v6510_v10, 16  ;;  %v649_v10 = vor.u32 %v648_v42, %v522_v61  ;;  %v980_v61 = vor.u32 %v979_v0, %v8804_v25  ;;  %v6961_v42 = vld [vmem:[#allocation2 + $0x50] sm:$0xff] }
  0xf2   : > { %1492 = vrot.lane.b32.xlu1 %v6961_v42, %s6147_s18 }
  0xf3   : > { %v604_v31 = vor.u32 %v602_v54, %v601_v35  ;;  %v695_v22 = vsel %vm6576_vm6, %v649_v10, 0  ;;  %v670_v26 = vrot.slane %v602_v54, 1  ;;  %v1019_v45 = vsel %vm6576_vm6, %v980_v61, 0 }
  0xf4   : > { %2247 = vmatmul.bf16.gmra.mxu3 %v1627_v3  ;;  %v705_v3 = vsel %vm6576_vm6, %v669_v1, 0  ;;  %v1427_v1 = vpop.permute.xlu1 %1426  ;;  %v1286_v10 = vrot.slane %v1151_v19, 1 }
  0xf5   : > { %v1631_v18 = vsel %vm1508_vm7, %v705_v3, %v1425_v63  ;;  %v639_v62 = vsel %vm6302_vm3, 0, %v604_v31  ;;  %v671_v8 = vor.u32 %v670_v26, %v599_v7  ;;  %v1445_v63 = vpop.permute.xlu0 %1444 }
  0xf6   : > { %v1571_v29 = vsel %vm1508_vm7, %v639_v62, %v1379_v17  ;;  %1460 = vrot.lane.b32.xlu0 %v1019_v45, %s6147_s18  ;;  %v1407_v3 = vpop.permute.xlu2 %1406  ;;  %v1638_v31 = vsel %vm1508_vm7, %v6438_v56, %v1445_v63  ;;  %v1148_v17 = vshrl.u32 %v6637_v27, 16  ;;  %v1155_v63 = vshrl.u32 %v6691_v60, 16 }
  0xf7   : > { %v706_v35 = vsel %vm6576_vm6, %v671_v8, 0 }
  0xf8   : > { %v1635_v7 = vsel %vm1508_vm7, %v706_v35, %v1427_v1  ;;  %v1287_v12 = vor.u32 %v1286_v10, %v1148_v17  ;;  %v654_v10 = vrot.slane %v546_v40, 1 }
  0xf9   : > { %2163 = vmatmul.bf16.gmra.mxu2 %v1567_v11  ;;  %v1591_v11 = vsel %vm1508_vm7, %v695_v22, %v1405_v48  ;;  %v652_v48 = vrot.slane %v539_v2, 1  ;;  %v1158_v2 = vshll.u32 %v6691_v60, 16 }
  0xfa   : > { %2197 = vmatmul.bf16.gmra.mxu1 %v1587_v34  ;;  %v1141_v34 = vshrl.u32 %v6595_v49, 16  ;;  %v651_v49 = vor.u32 %v650_v37, %v529_v23  ;;  %v1333_v61 = vsel %vm6576_vm6, %v1287_v12, 0  ;;  %v1150_v37 = vrot.slane %v1148_v17, 7 }
  0xfb   : > { %v653_v27 = vor.u32 %v652_v48, %v536_v20  ;;  %v8806_v20 = vshrl.u32 %v6330_v58, 16  ;;  %v1288_v35 = vrot.slane %v1158_v2, 1  ;;  %v655_v40 = vor.u32 %v654_v10, %v543_v51 }
  0xfc   : > { %v1285_v57 = vor.u32 %v1284_v14, %v1141_v34  ;;  %v1143_v46 = vrot.slane %v1141_v34, 7  ;;  %v1477_v22 = vpop.permute.xlu1 %1476  ;;  %v8805_v14 = vshll.u32 %v6330_v58, 16  ;;  %v1153_v58 = vor.u32 %v1151_v19, %v1150_v37 }
  0xfd   : > { %v697_v53 = vsel %vm6576_vm6, %v653_v27, 0  ;;  %v8809_v27 = vshll.u32 %v6348_v4, 16 }
  0xfe   : > { %v1332_v30 = vsel %vm6576_vm6, %v1285_v57, 0  ;;  %v1146_v62 = vor.u32 %v1144_v9, %v1143_v46  ;;  %v1269_v60 = vsel %vm6302_vm3, 0, %v1153_v58 }
 0x100   : > { %v1268_v56 = vsel %vm6302_vm3, 0, %v1146_v62 }
 0x101   : > { %2128 = vmatmul.bf16.gmra.mxu0 %v1539_v5  ;;  %v696_v5 = vsel %vm6576_vm6, %v651_v49, 0  ;;  %v1687_v9 = vsel %vm1508_vm7, %v1268_v56, %v1477_v22  ;;  %v1165_v56 = vshll.u32 %v6741_v55, 16 }
 0x104   : > { %2252 = vmatmul.bf16.gmra.mxu3 %v1631_v18  ;;  %v1595_v18 = vsel %vm1508_vm7, %v696_v5, %v1407_v3  ;;  %v8807_v5 = vshll.u32 %v6283_v33, 16  ;;  %v1479_v62 = vpop.permute.xlu1 %1478 }
 0x105   : > { %v1447_v26 = vpop.permute.xlu0 %1446 }
 0x106   : > { %v1409_v34 = vpop.permute.xlu2 %1408  ;;  %v1641_v57 = vsel %vm1508_vm7, %v6462_v16, %v1447_v26  ;;  %v1289_v16 = vor.u32 %v1288_v35, %v1155_v63  ;;  %v1162_v35 = vshrl.u32 %v6741_v55, 16 }
 0x107   : > { %v1599_v49 = vsel %vm1508_vm7, %v697_v53, %v1409_v34  ;;  %v1157_v34 = vrot.slane %v1155_v63, 7 }
 0x108   : > { %v1334_v19 = vsel %vm6576_vm6, %v1289_v16, 0 }
 0x109   : > { %2168 = vmatmul.bf16.gmra.mxu2 %v1571_v29  ;;  %v6986_v29 = vld [vmem:[#allocation2 + $0x58] sm:$0xff]  ;;  %v1160_v4 = vor.u32 %v1158_v2, %v1157_v34  ;;  %v7090_v34 = vld [vmem:[#allocation2 + $0x70] sm:$0xff] }
 0x10a   : > { %2202 = vmatmul.bf16.gmra.mxu1 %v1591_v11  ;;  %1494 = vrot.lane.b32.xlu0 %v6986_v29, %s6147_s18  ;;  %v983_v11 = vrot.slane %v8805_v14, 1 }
 0x10b   : > { %v1270_v63 = vsel %vm6302_vm3, 0, %v1160_v4 }
 0x10c   : > { %v984_v8 = vor.u32 %v983_v11, %v8806_v20  ;;  %v698_v11 = vsel %vm6576_vm6, %v655_v40, 0  ;;  %v1290_v20 = vrot.slane %v1165_v56, 1 }
 0x10e   : > { %v6957_v54 = vpop.f32.mrf.mxu0 }
 0x111   : > { %5460 = vmatmul.msk.bf16.vlgmr.msrb.gmra.mxu0 %vm1508_vm7, %v1332_v30 }
 0x112   : > { %v1411_v14 = vpop.permute.xlu2 %1410 }
 0x114   : > { %2257 = vmatmul.bf16.gmra.mxu3 %v1635_v7  ;;  %v1021_v7 = vsel %vm6576_vm6, %v984_v8, 0 }
 0x115   : > { %1464 = vrot.lane.b32.xlu1 %v1021_v7, %s6147_s18  ;;  %v1481_v7 = vpop.permute.xlu1 %1480 }
 0x116   : > { %v6974_v23 = vpop.f32.mrf.mxu0  ;;  %v1695_v2 = vsel %vm1508_vm7, %v1270_v63, %v1481_v7 }
 0x119   : > { %2271 = vmatmul.bf16.vlgmr.msrb.gmra.mxu2 %v1638_v31  ;;  %v981_v31 = vrot.slane %v8807_v5, 1  ;;  %v7057_v5 = vld [vmem:[#allocation2 + $0x68] sm:$0xff] }
 0x11a   : > { %2207 = vmatmul.bf16.gmra.mxu1 %v1595_v18  ;;  %v8808_v18 = vshrl.u32 %v6283_v33, 16  ;;  %v1691_v33 = vsel %vm1508_vm7, %v1269_v60, %v1479_v62  ;;  %v8812_v60 = vshrl.u32 %v6386_v24, 16 }
 0x11c   : > { %v2134_v0 = vpop.f32.mrf.mxu2  ;;  %v982_v17 = vor.u32 %v981_v31, %v8808_v18  ;;  %v8811_v18 = vshll.u32 %v6386_v24, 16 }
 0x11d   : > { %1498 = vrot.lane.b32.xlu1 %v7057_v5, %s6147_s18 }
 0x11e   : > { %v6982_v25 = vpop.f32.mrf.mxu0  ;;  %v1020_v48 = vsel %vm6576_vm6, %v982_v17, 0  ;;  %v987_v17 = vrot.slane %v8811_v18, 1 }
 0x11f   : > { %1462 = vrot.lane.b32.xlu2 %v1020_v48, %s6147_s18  ;;  %v1164_v48 = vrot.slane %v1162_v35, 7 }
 0x121   : > { %5461 = vmatmul.msk.bf16.gmra.mxu0 %vm1508_vm7, %v1333_v61  ;;  %v1449_v61 = vpop.permute.xlu0 %1448  ;;  %v1167_v24 = vor.u32 %v1165_v56, %v1164_v48 }
 0x124   : > { %2360 = vmatmul.bf16.vlgmr.msrb.gmra.mxu3 %v1687_v9  ;;  %v2136_v45 = vpop.f32.mrf.mxu2  ;;  %v985_v9 = vrot.slane %v8809_v27, 1 }
 0x125   : > { %1500 = vrot.lane.b32.xlu1 %v7090_v34, %s6147_s18 }
 0x126   : > { %v7003_v1 = vpop.f32.mrf.mxu0  ;;  %v986_v51 = vor.u32 %v985_v9, %v8810_v13  ;;  %v1483_v13 = vpop.permute.xlu1 %1482 }
 0x127   : > { %v2223_v30 = vpop.f32.mrf.mxu3 }
 0x128   : > { %v7009_v3 = vadd.f32 %v2223_v30, %v2134_v0  ;;  %v1022_v37 = vsel %vm6576_vm6, %v986_v51, 0  ;;  %v1271_v51 = vsel %vm6302_vm3, 0, %v1167_v24 }
 0x129   : > { %2276 = vmatmul.bf16.gmra.mxu2 %v1641_v57  ;;  %v1603_v57 = vsel %vm1508_vm7, %v698_v11, %v1411_v14  ;;  %1466 = vrot.lane.b32.xlu0 %v1022_v37, %s6147_s18  ;;  %v1451_v10 = vpop.permute.xlu0 %1450  ;;  %v1699_v56 = vsel %vm1508_vm7, %v1271_v51, %v1483_v13  ;;  %v8816_v51 = vshrl.u32 %v6475_v21, 16 }
 0x12a   : > { %2212 = vmatmul.bf16.gmra.mxu1 %v1599_v49 }
 0x12c   : > { %v2139_v46 = vpop.f32.mrf.mxu2 }
 0x12e   : > { %v7020_v12 = vpop.f32.mrf.mxu0 }
 0x12f   : > { %v2225_v0 = vpop.f32.mrf.mxu3 }
 0x130   : > { %v7026_v22 = vadd.f32 %v2225_v0, %v2136_v45  ;;  %v1644_v45 = vsel %vm1508_vm7, %v6487_v44, %v1449_v61  ;;  %v1291_v44 = vor.u32 %v1290_v20, %v1162_v35  ;;  %v1647_v0 = vsel %vm1508_vm7, %v6529_v32, %v1451_v10  ;;  %v7074_v61 = vld [vmem:[#allocation2 + $0x60] sm:$0xff] }
 0x131   : > { %5462 = vmatmul.msk.bf16.gmra.mxu0 %vm1508_vm7, %v1334_v19  ;;  %v988_v19 = vor.u32 %v987_v17, %v8812_v60  ;;  %1496 = vrot.lane.b32.xlu2 %v7074_v61, %s6147_s18  ;;  %v1453_v37 = vpop.permute.xlu0 %1452  ;;  %v8813_v35 = vshll.u32 %v6425_v50, 16  ;;  %v1176_v17 = vshrl.u32 %v6835_v28, 16 }
 0x132   : > { %v1335_v16 = vsel %vm6576_vm6, %v1291_v44, 0  ;;  %v1650_v63 = vsel %vm1508_vm7, %v6580_v15, %v1453_v37 }
 0x133   : > { %v1023_v9 = vsel %vm6576_vm6, %v988_v19, 0  ;;  %v989_v4 = vrot.slane %v8813_v35, 1 }
 0x134   : > { %2365 = vmatmul.bf16.gmra.mxu3 %v1691_v33  ;;  %v2141_v26 = vpop.f32.mrf.mxu2  ;;  %1468 = vrot.lane.b32.xlu0 %v1023_v9, %s6147_s18 }
 0x136   : > { %v7042_v53 = vpop.f32.mrf.mxu0 }
 0x137   : > { %v2228_v8 = vpop.f32.mrf.mxu3 }
 0x138   : > { %v7048_v30 = vadd.f32 %v2228_v8, %v2139_v46  ;;  %v1172_v46 = vshll.u32 %v6793_v39, 16 }
 0x139   : > { %2281 = vmatmul.bf16.gmra.mxu2 %v1644_v45 }
 0x13a   : > { %2217 = vmatmul.bf16.gmra.mxu1 %v1603_v57  ;;  %v1292_v33 = vrot.slane %v1172_v46, 1  ;;  %v1179_v57 = vshll.u32 %v6835_v28, 16 }
 0x13c   : > { %v2144_v49 = vpop.f32.mrf.mxu2 }
 0x13e   : > { %v7053_v58 = vpop.f32.mrf.mxu0 }
 0x13f   : > { %v2230_v55 = vpop.f32.mrf.mxu3 }
 0x140   : > { %v7059_v31 = vadd.f32 %v2230_v55, %v2141_v26  ;;  %v1169_v26 = vshrl.u32 %v6793_v39, 16 }
 0x141   : > { %5463 = vmatmul.msk.bf16.gmra.mxu0 %vm1508_vm7, %v1335_v16  ;;  %v1455_v24 = vpop.permute.xlu0 %1454 }
 0x142   : > { %v1293_v32 = vor.u32 %v1292_v33, %v1169_v26  ;;  %v1171_v16 = vrot.slane %v1169_v26, 7  ;;  %v1186_v26 = vshll.u32 %v6880_v59, 16 }
 0x144   : > { %2370 = vmatmul.bf16.gmra.mxu3 %v1695_v2  ;;  %v2146_v62 = vpop.f32.mrf.mxu2  ;;  %v1336_v39 = vsel %vm6576_vm6, %v1293_v32, 0  ;;  %v1294_v2 = vrot.slane %v1179_v57, 1  ;;  %v8815_v32 = vshll.u32 %v6475_v21, 16  ;;  %v1296_v35 = vrot.slane %v1186_v26, 1 }
 0x146   : > { %v7072_v40 = vpop.f32.mrf.mxu0  ;;  %v1295_v60 = vor.u32 %v1294_v2, %v1176_v17 }
 0x147   : > { %v2233_v27 = vpop.f32.mrf.mxu3 }
 0x148   : > { %v7079_v14 = vadd.f32 %v2233_v27, %v2144_v49  ;;  %v8814_v49 = vshrl.u32 %v6425_v50, 16  ;;  %v1174_v50 = vor.u32 %v1172_v46, %v1171_v16  ;;  %v1337_v33 = vsel %vm6576_vm6, %v1295_v60, 0  ;;  %v7119_v27 = vld [vmem:[#allocation2 + $0x78] sm:$0xff] }
 0x149   : > { %2286 = vmatmul.bf16.gmra.mxu2 %v1647_v0  ;;  %v1485_v0 = vpop.permute.xlu1 %1484  ;;  %1502 = vrot.lane.b32.xlu1 %v7119_v27, %s6147_s18  ;;  %v1193_v60 = vshll.u32 %v6927_v41, 16 }
 0x14a   : > { %v990_v7 = vor.u32 %v989_v4, %v8814_v49  ;;  %v1272_v15 = vsel %vm6302_vm3, 0, %v1174_v50  ;;  %v1183_v49 = vshrl.u32 %v6880_v59, 16 }
 0x14b   : > { %v1703_v46 = vsel %vm1508_vm7, %v1272_v15, %v1485_v0 }
 0x14c   : > { %v2149_v11 = vpop.f32.mrf.mxu2  ;;  %v1024_v18 = vsel %vm6576_vm6, %v990_v7, 0 }
 0x14d   : > { %1470 = vrot.lane.b32.xlu0 %v1024_v18, %s6147_s18 }
 0x14e   : > { %v7086_v45 = vpop.f32.mrf.mxu0 }
 0x14f   : > { %v2235_v20 = vpop.f32.mrf.mxu3 }
 0x150   : > { %v7092_v8 = vadd.f32 %v2235_v20, %v2146_v62  ;;  %v1653_v20 = vsel %vm1508_vm7, %v6627_v52, %v1455_v24 }
 0x151   : > { %5464 = vmatmul.msk.bf16.gmra.mxu0 %vm1508_vm7, %v1336_v39  ;;  %v1487_v2 = vpop.permute.xlu1 %1486 }
 0x154   : > { %2375 = vmatmul.bf16.gmra.mxu3 %v1699_v56  ;;  %v2151_v44 = vpop.f32.mrf.mxu2  ;;  %v1178_v56 = vrot.slane %v1176_v17, 7  ;;  %v7148_v17 = vld [vmem:[#allocation2 + $0x80] sm:$0xff] }
 0x155   : > { %1504 = vrot.lane.b32.xlu1 %v7148_v17, %s6147_s18 }
 0x156   : > { %v7105_v55 = vpop.f32.mrf.mxu0  ;;  %v1181_v21 = vor.u32 %v1179_v57, %v1178_v56 }
 0x157   : > { %v2238_v10 = vpop.f32.mrf.mxu3 }
 0x158   : > { %v7110_v62 = vadd.f32 %v2238_v10, %v2149_v11  ;;  %v991_v11 = vrot.slane %v8815_v32, 1  ;;  %v1273_v52 = vsel %vm6302_vm3, 0, %v1181_v21  ;;  %v1190_v32 = vshrl.u32 %v6927_v41, 16 }
 0x159   : > { %2291 = vmatmul.bf16.gmra.mxu2 %v1650_v63  ;;  %v1297_v63 = vor.u32 %v1296_v35, %v1183_v49  ;;  %v1707_v57 = vsel %vm1508_vm7, %v1273_v52, %v1487_v2 }
 0x15a   : > { %v992_v39 = vor.u32 %v991_v11, %v8816_v51  ;;  %v1192_v2 = vrot.slane %v1190_v32, 7 }
 0x15b   : > { %v1338_v18 = vsel %vm6576_vm6, %v1297_v63, 0 }
 0x15c   : > { %v2154_v19 = vpop.f32.mrf.mxu2 }
 0x15e   : > { %v7115_v48 = vpop.f32.mrf.mxu0 }
 0x15f   : > { %v2240_v28 = vpop.f32.mrf.mxu3 }
 0x160   : > { %v7121_v9 = vadd.f32 %v2240_v28, %v2151_v44  ;;  %v1025_v44 = vsel %vm6576_vm6, %v992_v39, 0 }
 0x161   : > { %5465 = vmatmul.msk.bf16.gmra.mxu0 %vm1508_vm7, %v1337_v33  ;;  %1472 = vrot.lane.b32.xlu0 %v1025_v44, %s6147_s18  ;;  %v1185_v33 = vrot.slane %v1183_v49, 7  ;;  %v2183_v49 = vpop.f32.mrf.mxu1 }
 0x164   : > { %2380 = vmatmul.bf16.gmra.mxu3 %v1703_v46  ;;  %v2156_v13 = vpop.f32.mrf.mxu2  ;;  %v1298_v46 = vrot.slane %v1193_v60, 1 }
 0x166   : > { %v7134_v37 = vpop.f32.mrf.mxu0  ;;  %v1299_v51 = vor.u32 %v1298_v46, %v1190_v32 }
 0x167   : > { %v2243_v4 = vpop.f32.mrf.mxu3 }
 0x168   : > { %v7139_v7 = vadd.f32 %v2243_v4, %v2154_v19  ;;  %v1457_v19 = vpop.permute.xlu0 %1456 }
 0x169   : > { %2296 = vmatmul.bf16.gmra.mxu2 %v1653_v20  ;;  %v1656_v15 = vsel %vm1508_vm7, %v6674_v36, %v1457_v19  ;;  %v1489_v20 = vpop.permute.xlu1 %1488  ;;  %v1339_v36 = vsel %vm6576_vm6, %v1299_v51, 0 }
 0x16c   : > { %v2159_v16 = vpop.f32.mrf.mxu2 }
 0x16e   : > { %v7144_v10 = vpop.f32.mrf.mxu0 }
 0x16f   : > { %v2245_v59 = vpop.f32.mrf.mxu3 }
 0x170   : > { %v7150_v50 = vadd.f32 %v2245_v59, %v2156_v13  ;;  %v1188_v13 = vor.u32 %v1186_v26, %v1185_v33  ;;  %v1200_v26 = vshll.u32 %v6961_v42, 16  ;;  %v1459_v21 = vpop.permute.xlu0 %1458  ;;  %v2185_v33 = vpop.f32.mrf.mxu1 }
 0x171   : > { %5466 = vmatmul.msk.bf16.gmra.mxu0 %vm1508_vm7, %v1338_v18 }
 0x172   : > { %v1274_v56 = vsel %vm6302_vm3, 0, %v1188_v13  ;;  %v1300_v18 = vrot.slane %v1200_v26, 1 }
 0x173   : > { %v1711_v41 = vsel %vm1508_vm7, %v1274_v56, %v1489_v20  ;;  %v7191_v56 = vld [vmem:[#allocation2] sm:$0xff] }
 0x174   : > { %2385 = vmatmul.bf16.gmra.mxu3 %v1707_v57  ;;  %v2161_v0 = vpop.f32.mrf.mxu2  ;;  %v1197_v57 = vshrl.u32 %v6961_v42, 16  ;;  %3658 = vrot.lane.b32.xlu2 %v7191_v56, %s6147_s18 }
 0x176   : > { %v7159_v28 = vpop.f32.mrf.mxu0 }
 0x177   : > { %v2248_v24 = vpop.f32.mrf.mxu3 }
 0x178   : > { %v7162_v11 = vadd.f32 %v2248_v24, %v2159_v16  ;;  %v1659_v16 = vsel %vm1508_vm7, %v6727_v38, %v1459_v21  ;;  %v1491_v24 = vpop.permute.xlu1 %1490 }
 0x179   : > { %2301 = vmatmul.bf16.gmra.mxu2 %v1656_v15  ;;  %v1301_v15 = vor.u32 %v1300_v18, %v1197_v57 }
 0x17b   : > { %v1340_v38 = vsel %vm6576_vm6, %v1301_v15, 0 }
 0x17c   : > { %v2164_v39 = vpop.f32.mrf.mxu2 }
 0x17e   : > { %v7166_v35 = vpop.f32.mrf.mxu0 }
 0x17f   : > { %v2250_v4 = vpop.f32.mrf.mxu3 }
 0x180   : > { %v7170_v44 = vadd.f32 %v2250_v4, %v2161_v0  ;;  %v1195_v0 = vor.u32 %v1193_v60, %v1192_v2  ;;  %v1207_v60 = vshll.u32 %v6986_v29, 16  ;;  %v7193_v4 = vpop.f32.mrf.mxu1 }
 0x181   : > { %5467 = vmatmul.msk.bf16.gmra.mxu0 %vm1508_vm7, %v1339_v36 }
 0x182   : > { %v1275_v13 = vsel %vm6302_vm3, 0, %v1195_v0  ;;  %v1302_v2 = vrot.slane %v1207_v60, 1 }
 0x183   : > { %v1715_v42 = vsel %vm1508_vm7, %v1275_v13, %v1491_v24 }
 0x184   : > { %2390 = vmatmul.bf16.gmra.mxu3 %v1711_v41  ;;  %v2166_v63 = vpop.f32.mrf.mxu2  ;;  %v6066_v41 = vld [vmem:[#allocation2 + $0x48] sm:$0xff] }
 0x186   : > { %v7177_v52 = vpop.f32.mrf.mxu0 }
 0x187   : > { %v2253_v59 = vpop.f32.mrf.mxu3 }
 0x188   : > { %v7180_v19 = vadd.f32 %v2253_v59, %v2164_v39  ;;  %v1461_v39 = vpop.permute.xlu0 %1460  ;;  %v1204_v59 = vshrl.u32 %v6986_v29, 16 }
 0x189   : > { %2306 = vmatmul.bf16.gmra.mxu2 %v1659_v16  ;;  %v1662_v21 = vsel %vm1508_vm7, %v6066_v41, %v1461_v39  ;;  %v7207_v39 = vpop.f32.mrf.mxu1 }
 0x18a   : > { %v1303_v24 = vor.u32 %v1302_v2, %v1204_v59  ;;  %v5973_v2 = vld [vmem:[%s8748_s4 + $0x38] sm:$0xff] }
 0x18b   : > { %4394 = vmatpush.bf16.msrb.mxu1 %v5973_v2  ;;  %v2186_v2 = vadd.f32 %v2185_v33, %v6974_v23 }
 0x18c   : > { %v2169_v46 = vpop.f32.mrf.mxu2 }
 0x18e   : > { %v2450_v51 = vpop.f32.mrf.mxu0 }
 0x18f   : > { %v2255_v32 = vpop.f32.mrf.mxu3 }
 0x190   : > { %v7186_v20 = vadd.f32 %v2255_v32, %v2166_v63  ;;  %v1199_v63 = vrot.slane %v1197_v57, 7  ;;  %v1341_v57 = vsel %vm6576_vm6, %v1303_v24, 0  ;;  %v1206_v24 = vrot.slane %v1204_v59, 7  ;;  %v7234_v59 = vld [vmem:[%s8747_s3] ss:$0 sm:$0xff] }
 0x191   : > { %5468 = vmatmul.msk.bf16.gmra.mxu0 %vm1508_vm7, %v1340_v38  ;;  %v1493_v38 = vpop.permute.xlu1 %1492 }
 0x192   : > { %8817 = vst [vmem:[#allocation6_spill] sm:$0xff] %v7186_v20  ;;  %v1202_v15 = vor.u32 %v1200_v26, %v1199_v63  ;;  %v8773_v26 = vshll.u32 %v7074_v61, 16 }
 0x194   : > { %2395 = vmatmul.bf16.gmra.mxu3 %v1715_v42  ;;  %v2171_v36 = vpop.f32.mrf.mxu2  ;;  %v1276_v32 = vsel %vm6302_vm3, 0, %v1202_v15  ;;  %v6067_v15 = vld [vmem:[#allocation2 + $0x50] sm:$0xff] }
 0x195   : > { %v1719_v29 = vsel %vm1508_vm7, %v1276_v32, %v1493_v38  ;;  %v1304_v38 = vrot.slane %v8773_v26, 1 }
 0x196   : > { %v2452_v16 = vpop.f32.mrf.mxu0 }
 0x197   : > { %v2258_v18 = vpop.f32.mrf.mxu3 }
 0x198   : > { %v7199_v0 = vadd.f32 %v2258_v18, %v2169_v46  ;;  %v1463_v46 = vpop.permute.xlu2 %1462 }
 0x199   : > { %2311 = vmatmul.bf16.gmra.mxu2 %v1662_v21  ;;  %v2184_v21 = vadd.f32 %v2183_v49, %v6957_v54  ;;  %v1211_v54 = vshrl.u32 %v7074_v61, 16 }
 0x19a   : > { %8818 = vst [vmem:[#allocation7_spill] sm:$0xff] %v7199_v0 }
 0x19c   : > { %v2272_v13 = vpop.f32.mrf.mxu2 }
 0x19d   : > { %v2273_v18 = vadd.f32 %v2272_v13, %v2184_v21  ;;  %v7229_v13 = vpop.f32.mrf.mxu1  ;;  %v1305_v21 = vor.u32 %v1304_v38, %v1211_v54  ;;  %v1465_v38 = vpop.permute.xlu1 %1464 }
 0x19e   : > { %v7203_v42 = vpop.f32.mrf.mxu0 }
 0x19f   : > { %v2260_v41 = vpop.f32.mrf.mxu3 }
 0x1a0   : > { %v7209_v20 = vadd.f32 %v2260_v41, %v2171_v36  ;;  %v1665_v36 = vsel %vm1508_vm7, %v6067_v15, %v1463_v46  ;;  %v1209_v46 = vor.u32 %v1207_v60, %v1206_v24 }
 0x1a1   : > { %5469 = vmatmul.msk.bf16.gmra.mxu0 %vm1508_vm7, %v1341_v57  ;;  %v7227_v57 = vld [vmem:[%s8746_s2] ss:$0 sm:$0xff] }
 0x1a2   : > { %8819 = vst [vmem:[#allocation8_spill] sm:$0xff] %v7209_v20  ;;  %v1495_v20 = vpop.permute.xlu0 %1494 }
 0x1a4   : > { %2400 = vmatmul.bf16.gmra.mxu3 %v1719_v29  ;;  %v2274_v63 = vpop.f32.mrf.mxu2 }
 0x1a6   : > { %v7219_v41 = vpop.f32.mrf.mxu0 }
 0x1a7   : > { %v2361_v32 = vpop.f32.mrf.mxu3 }
 0x1a8   : > { %v2362_v49 = vadd.f32 %v2361_v32, %v2273_v18  ;;  %v2275_v32 = vadd.f32 %v2274_v63, %v2186_v2  ;;  %v7248_v2 = vpop.f32.mrf.mxu1 }
 0x1a9   : > { %2316 = vmatmul.bf16.gmra.mxu2 %v1665_v36  ;;  %v1277_v36 = vsel %vm6302_vm3, 0, %v1209_v46  ;;  %v2189_v46 = vadd.f32 %v7193_v4, %v6982_v25 }
 0x1aa   : > { %v2451_v29 = vadd.f32 %v2450_v51, %v2362_v49  ;;  %v1342_v49 = vsel %vm6576_vm6, %v1305_v21, 0  ;;  %v1723_v23 = vsel %vm1508_vm7, %v1277_v36, %v1495_v20  ;;  %v5972_v20 = vld [vmem:[%s8748_s4 + $0x30] sm:$0xff]  ;;  %v1213_v36 = vrot.slane %v1211_v54, 7 }
 0x1ab   : > { %4395 = vmatpush.bf16.msrb.mxu1 %v5972_v20  ;;  %v2191_v54 = vadd.f32 %v7207_v39, %v7003_v1 }
 0x1ac   : > { %v2534_v18 = vmul.f32 %v7227_v57, %v2451_v29  ;;  %v2277_v15 = vpop.f32.mrf.mxu2  ;;  %v1221_v29 = vshll.u32 %v7057_v5, 16 }
 0x1ae   : > { %v2570_v26 = vadd.f32 %v7234_v59, %v2534_v18  ;;  %v7241_v51 = vpop.f32.mrf.mxu0  ;;  %v2278_v18 = vadd.f32 %v2277_v15, %v2189_v46  ;;  %v1306_v25 = vrot.slane %v1221_v29, 1  ;;  %v8820_v15 = vshll.u32 %v7074_v61, 16 }
 0x1af   : > { %v2363_v0 = vpop.f32.mrf.mxu3 }
 0x1b0   : > { %v2602_v60 = vmax.f32 %v2570_v26, 0.0  ;;  %v2364_v24 = vadd.f32 %v2363_v0, %v2275_v32  ;;  %v6068_v26 = vld [vmem:[#allocation2 + $0x58] sm:$0xff] }
 0x1b1   : > { %5470 = vmatmul.msk.bf16.gmra.mxu0 %vm1508_vm7, %v1342_v49 }
 0x1b2   : > { %v2634_v33 = vpack.c.bf16 %v2602_v60, %v2602_v60  ;;  %v2453_v63 = vadd.f32 %v2452_v16, %v2364_v24  ;;  %v1668_v16 = vsel %vm1508_vm7, %v6068_v26, %v1465_v38  ;;  %v1218_v60 = vshrl.u32 %v7057_v5, 16  ;;  %v7271_v26 = vpop.f32.mrf.mxu1 }
 0x1b3   : > { %v1216_v38 = vor.u32 %v8820_v15, %v1213_v36  ;;  %v2194_v15 = vadd.f32 %v7229_v13, %v7020_v12 }
 0x1b4   : > { %2666 = vst.msk [vmem:[#allocation2 + $0x8] sm:$0xf] %vm278_vm0, %v2634_v33  ;;  %v2535_v21 = vmul.f32 %v7227_v57, %v2453_v63  ;;  %2405 = vmatmul.bf16.gmra.mxu3 %v1723_v23  ;;  %v2279_v0 = vpop.f32.mrf.mxu2  ;;  %v1307_v46 = vor.u32 %v1306_v25, %v1218_v60  ;;  %v1220_v13 = vrot.slane %v1218_v60, 7 }
 0x1b6   : > { %v2571_v32 = vadd.f32 %v7234_v59, %v2535_v21  ;;  %v7259_v49 = vpop.f32.mrf.mxu0  ;;  %v1343_v36 = vsel %vm6576_vm6, %v1307_v46, 0 }
 0x1b7   : > { %v2366_v4 = vpop.f32.mrf.mxu3 }
 0x1b8   : > { %v2603_v24 = vmax.f32 %v2571_v32, 0.0  ;;  %v2367_v23 = vadd.f32 %v2366_v4, %v2278_v18  ;;  %v2280_v32 = vadd.f32 %v2279_v0, %v2191_v54  ;;  %v1497_v18 = vpop.permute.xlu2 %1496  ;;  %v5971_v54 = vld [vmem:[%s8748_s4 + $0x28] sm:$0xff] }
 0x1b9   : > { %2321 = vmatmul.bf16.gmra.mxu2 %v1668_v16  ;;  %4396 = vmatpush.bf16.msrb.mxu1 %v5971_v54  ;;  %v2196_v54 = vadd.f32 %v7248_v2, %v7042_v53 }
 0x1ba   : > { %v2635_v33 = vpack.c.bf16 %v2603_v24, %v2603_v24  ;;  %v2456_v63 = vadd.f32 %v7203_v42, %v2367_v23  ;;  %v1278_v42 = vsel %vm6302_vm3, 0, %v1216_v38  ;;  %v1467_v23 = vpop.permute.xlu0 %1466 }
 0x1bb   : > { %v1727_v4 = vsel %vm1508_vm7, %v1278_v42, %v1497_v18 }
 0x1bc   : > { %2667 = vst.msk [vmem:[#allocation2 + $0xc] sm:$0xf] %vm278_vm0, %v2635_v33  ;;  %v2536_v21 = vmul.f32 %v7227_v57, %v2456_v63  ;;  %v2282_v20 = vpop.f32.mrf.mxu2  ;;  %v1228_v33 = vshll.u32 %v7090_v34, 16 }
 0x1be   : > { %v2572_v16 = vadd.f32 %v7234_v59, %v2536_v21  ;;  %v7276_v61 = vpop.f32.mrf.mxu0  ;;  %v1308_v42 = vrot.slane %v1228_v33, 1 }
 0x1bf   : > { %v2368_v1 = vpop.f32.mrf.mxu3 }
 0x1c0   : > { %v2604_v39 = vmax.f32 %v2572_v16, 0.0  ;;  %v2369_v25 = vadd.f32 %v2368_v1, %v2280_v32  ;;  %v2283_v16 = vadd.f32 %v2282_v20, %v2194_v15  ;;  %v1223_v15 = vor.u32 %v1221_v29, %v1220_v13 }
 0x1c1   : > { %5471 = vmatmul.msk.bf16.gmra.mxu0 %vm1508_vm7, %v1343_v36 }
 0x1c2   : > { %v2636_v24 = vpack.c.bf16 %v2604_v39, %v2604_v39  ;;  %v2458_v0 = vadd.f32 %v7219_v41, %v2369_v25  ;;  %v6069_v41 = vld [vmem:[#allocation2 + $0x60] sm:$0xff]  ;;  %v1225_v25 = vshrl.u32 %v7090_v34, 16 }
 0x1c3   : > { %v7284_v63 = vld [vmem:[#allocation2 + $0x8] sm:$0xff]  ;;  %v1671_v21 = vsel %vm1508_vm7, %v6069_v41, %v1467_v23 }
 0x1c4   : > { %2668 = vst.msk [vmem:[#allocation2 + $0x10] sm:$0xf] %vm278_vm0, %v2636_v24  ;;  %v2537_v38 = vmul.f32 %v7227_v57, %v2458_v0  ;;  %2410 = vmatmul.bf16.gmra.mxu3 %v1727_v4  ;;  %v2284_v46 = vpop.f32.mrf.mxu2  ;;  %3660 = vrot.lane.b32.xlu2 %v7284_v63, %s6147_s18  ;;  %v2821_v32 = vshll.u32 %v7284_v63, 16  ;;  %v2818_v36 = vshrl.u32 %v7284_v63, 16  ;;  %v2200_v4 = vpop.f32.mrf.mxu1 }
 0x1c6   : > { %v2573_v12 = vadd.f32 %v7234_v59, %v2537_v38  ;;  %v7298_v18 = vpop.f32.mrf.mxu0  ;;  %v2956_v39 = vrot.slane %v2821_v32, 1  ;;  %v1309_v38 = vor.u32 %v1308_v42, %v1225_v25 }
 0x1c7   : > { %v2371_v1 = vpop.f32.mrf.mxu3 }
 0x1c8   : > { %v2605_v24 = vmax.f32 %v2573_v12, 0.0  ;;  %v2372_v20 = vadd.f32 %v2371_v1, %v2283_v16  ;;  %v7308_v60 = vor.u32 %v2956_v39, %v2818_v36  ;;  %v1499_v1 = vpop.permute.xlu1 %1498  ;;  %v1279_v39 = vsel %vm6302_vm3, 0, %v1223_v15 }
 0x1c9   : > { %2326 = vmatmul.bf16.gmra.mxu2 %v1671_v21  ;;  %v2285_v21 = vadd.f32 %v2284_v46, %v2196_v54  ;;  %v1344_v5 = vsel %vm6576_vm6, %v1309_v38, 0  ;;  %v1731_v2 = vsel %vm1508_vm7, %v1279_v39, %v1499_v1  ;;  %v5970_v54 = vld [vmem:[%s8748_s4 + $0x20] sm:$0xff]  ;;  %v1227_v1 = vrot.slane %v1225_v25, 7 }
 0x1ca   : > { %v2637_v0 = vpack.c.bf16 %v2605_v24, %v2605_v24  ;;  %v2461_v23 = vadd.f32 %v7241_v51, %v2372_v20  ;;  %4397 = vmatpush.bf16.msrb.mxu1 %v5970_v54  ;;  %v2201_v54 = vadd.f32 %v2200_v4, %v7072_v40 }
 0x1cc   : > { %2669 = vst.msk [vmem:[#allocation2 + $0x14] sm:$0xf] %vm278_vm0, %v2637_v0  ;;  %v2538_v41 = vmul.f32 %v7227_v57, %v2461_v23  ;;  %v2287_v16 = vpop.f32.mrf.mxu2  ;;  %v2203_v42 = vpop.f32.mrf.mxu1  ;;  %v2199_v23 = vadd.f32 %v7271_v26, %v7053_v58  ;;  %v6070_v26 = vld [vmem:[#allocation2 + $0x68] sm:$0xff] }
 0x1cd   : > { %v1469_v0 = vpop.permute.xlu0 %1468 }
 0x1ce   : > { %v2574_v12 = vadd.f32 %v7234_v59, %v2538_v41  ;;  %v7320_v51 = vpop.f32.mrf.mxu0 }
 0x1cf   : > { %v2373_v29 = vpop.f32.mrf.mxu3 }
 0x1d0   : > { %v2606_v13 = vmax.f32 %v2574_v12, 0.0  ;;  %v2374_v53 = vadd.f32 %v2373_v29, %v2285_v21  ;;  %v2288_v21 = vadd.f32 %v2287_v16, %v2199_v23  ;;  %v1674_v12 = vsel %vm1508_vm7, %v6070_v26, %v1469_v0 }
 0x1d1   : > { %5472 = vmatmul.msk.bf16.gmra.mxu0 %vm1508_vm7, %v1344_v5  ;;  %v1232_v16 = vshrl.u32 %v7119_v27, 16  ;;  %v1230_v23 = vor.u32 %v1228_v33, %v1227_v1  ;;  %v5969_v1 = vld [vmem:[%s8748_s4 + $0x18] sm:$0xff] }
 0x1d2   : > { %v2638_v46 = vpack.c.bf16 %v2606_v13, %v2606_v13  ;;  %v2463_v24 = vadd.f32 %v7259_v49, %v2374_v53  ;;  %v1235_v49 = vshll.u32 %v7119_v27, 16  ;;  %4398 = vmatpush.bf16.msrb.mxu1 %v5969_v1 }
 0x1d3   : > { %v7327_v20 = vld [vmem:[#allocation2 + $0x10] sm:$0xff] }
 0x1d4   : > { %2670 = vst.msk [vmem:[#allocation2 + $0x18] sm:$0xf] %vm278_vm0, %v2638_v46  ;;  %v2539_v15 = vmul.f32 %v7227_v57, %v2463_v24  ;;  %2415 = vmatmul.bf16.gmra.mxu3 %v1731_v2  ;;  %v2289_v38 = vpop.f32.mrf.mxu2  ;;  %3662 = vrot.lane.b32.xlu2 %v7327_v20, %s6147_s18  ;;  %v2828_v41 = vshll.u32 %v7327_v20, 16  ;;  %v2825_v5 = vshrl.u32 %v7327_v20, 16  ;;  %v1310_v13 = vrot.slane %v1235_v49, 1  ;;  %v2205_v26 = vpop.f32.mrf.mxu1 }
 0x1d6   : > { %v2575_v58 = vadd.f32 %v7234_v59, %v2539_v15  ;;  %v7342_v39 = vpop.f32.mrf.mxu0  ;;  %v2958_v53 = vrot.slane %v2828_v41, 1  ;;  %v1311_v15 = vor.u32 %v1310_v13, %v1232_v16 }
 0x1d7   : > { %v2376_v29 = vpop.f32.mrf.mxu3 }
 0x1d8   : > { %v2607_v2 = vmax.f32 %v2575_v58, 0.0  ;;  %v2377_v46 = vadd.f32 %v2376_v29, %v2288_v21  ;;  %v7352_v25 = vor.u32 %v2958_v53, %v2825_v5  ;;  %v1501_v53 = vpop.permute.xlu1 %1500  ;;  %v1345_v34 = vsel %vm6576_vm6, %v1311_v15, 0 }
 0x1d9   : > { %2331 = vmatmul.bf16.gmra.mxu2 %v1674_v12  ;;  %v2290_v12 = vadd.f32 %v2289_v38, %v2201_v54 }
 0x1da   : > { %v2639_v24 = vpack.c.bf16 %v2607_v2, %v2607_v2  ;;  %v2466_v0 = vadd.f32 %v7276_v61, %v2377_v46  ;;  %v1280_v2 = vsel %vm6302_vm3, 0, %v1230_v23  ;;  %v2204_v23 = vadd.f32 %v2203_v42, %v7086_v45  ;;  %v6071_v42 = vld [vmem:[#allocation2 + $0x70] sm:$0xff] }
 0x1db   : > { %v1735_v38 = vsel %vm1508_vm7, %v1280_v2, %v1501_v53 }
 0x1dc   : > { %2671 = vst.msk [vmem:[#allocation2 + $0x1c] sm:$0xf] %vm278_vm0, %v2639_v24  ;;  %v2540_v58 = vmul.f32 %v7227_v57, %v2466_v0  ;;  %v2292_v21 = vpop.f32.mrf.mxu2  ;;  %v1471_v0 = vpop.permute.xlu0 %1470 }
 0x1dd   : > { %v2293_v53 = vadd.f32 %v2292_v21, %v2204_v23  ;;  %v1677_v2 = vsel %vm1508_vm7, %v6071_v42, %v1471_v0 }
 0x1de   : > { %v2576_v29 = vadd.f32 %v7234_v59, %v2540_v58  ;;  %v7363_v61 = vpop.f32.mrf.mxu0  ;;  %v5968_v58 = vld [vmem:[%s8748_s4 + $0x10] sm:$0xff] }
 0x1df   : > { %v2378_v33 = vpop.f32.mrf.mxu3  ;;  %4399 = vmatpush.bf16.msrb.mxu1 %v5968_v58 }
 0x1e0   : > { %v2608_v40 = vmax.f32 %v2576_v29, 0.0  ;;  %v2379_v4 = vadd.f32 %v2378_v33, %v2290_v12  ;;  %v2208_v29 = vpop.f32.mrf.mxu1 }
 0x1e1   : > { %5473 = vmatmul.msk.bf16.gmra.mxu0 %vm1508_vm7, %v1345_v34  ;;  %v1234_v34 = vrot.slane %v1232_v16, 7  ;;  %v5967_v16 = vld [vmem:[%s8748_s4 + $0x8] sm:$0xff] }
 0x1e2   : > { %v2640_v13 = vpack.c.bf16 %v2608_v40, %v2608_v40  ;;  %v2468_v46 = vadd.f32 %v7298_v18, %v2379_v4  ;;  %v1242_v18 = vshll.u32 %v7148_v17, 16  ;;  %v8775_v40 = vshrl.u32 %v7191_v56, 16 }
 0x1e3   : > { %v7373_v24 = vld [vmem:[#allocation2 + $0x18] sm:$0xff]  ;;  %v1237_v42 = vor.u32 %v1235_v49, %v1234_v34  ;;  %4400 = vmatpush.bf16.msrb.mxu1 %v5967_v16  ;;  %v3659_v16 = vpop.permute.xlu2 %3658 }
 0x1e4   : > { %2672 = vst.msk [vmem:[#allocation2 + $0x20] sm:$0xf] %vm278_vm0, %v2640_v13  ;;  %v2541_v15 = vmul.f32 %v7227_v57, %v2468_v46  ;;  %2420 = vmatmul.bf16.gmra.mxu3 %v1735_v38  ;;  %v2294_v54 = vpop.f32.mrf.mxu2  ;;  %3664 = vrot.lane.b32.xlu2 %v7373_v24, %s6147_s18  ;;  %v8774_v12 = vshll.u32 %v7373_v24, 16  ;;  %v2832_v4 = vshrl.u32 %v7373_v24, 16  ;;  %v1312_v38 = vrot.slane %v1242_v18, 1 }
 0x1e5   : > { %v1239_v13 = vshrl.u32 %v7148_v17, 16 }
 0x1e6   : > { %v2577_v45 = vadd.f32 %v7234_v59, %v2541_v15  ;;  %v7387_v33 = vpop.f32.mrf.mxu0  ;;  %v2960_v21 = vrot.slane %v8774_v12, 1 }
 0x1e7   : > { %v2381_v1 = vpop.f32.mrf.mxu3  ;;  %v1313_v12 = vor.u32 %v1312_v38, %v1239_v13  ;;  %v1503_v38 = vpop.permute.xlu1 %1502 }
 0x1e8   : > { %v2609_v46 = vmax.f32 %v2577_v45, 0.0  ;;  %v2382_v23 = vadd.f32 %v2381_v1, %v2293_v53  ;;  %v7401_v0 = vor.u32 %v2960_v21, %v2832_v4  ;;  %v2813_v53 = vrot.slane %v8775_v40, 7 }
 0x1e9   : > { %2336 = vmatmul.bf16.gmra.mxu2 %v1677_v2  ;;  %v8776_v45 = vshll.u32 %v7191_v56, 16  ;;  %v2206_v1 = vadd.f32 %v2205_v26, %v7105_v55  ;;  %v1346_v26 = vsel %vm6576_vm6, %v1313_v12, 0 }
 0x1ea   : > { %v2641_v15 = vpack.c.bf16 %v2609_v46, %v2609_v46  ;;  %v2471_v58 = vadd.f32 %v7320_v51, %v2382_v23  ;;  %v5966_v51 = vld [vmem:[%s8748_s4] sm:$0xff]  ;;  %v1281_v46 = vsel %vm6302_vm3, 0, %v1237_v42 }
 0x1eb   : > { %v2816_v27 = vor.u32 %v8776_v45, %v2813_v53  ;;  %v2295_v49 = vadd.f32 %v2294_v54, %v2206_v1  ;;  %4401 = vmatpush.bf16.msrb.mxu1 %v5966_v51  ;;  %v1473_v51 = vpop.permute.xlu0 %1472  ;;  %v2209_v45 = vadd.f32 %v2208_v29, %v7115_v48 }
 0x1ec   : > { %2673 = vst.msk [vmem:[#allocation2 + $0x24] sm:$0xf] %vm278_vm0, %v2641_v15  ;;  %v2542_v2 = vmul.f32 %v7227_v57, %v2471_v58  ;;  %v2297_v21 = vpop.f32.mrf.mxu2  ;;  %v2210_v58 = vpop.f32.mrf.mxu1 }
 0x1ed   : > { %v2938_v15 = vsel %vm6302_vm3, 0, %v2816_v27 }
 0x1ee   : > { %v2578_v34 = vadd.f32 %v7234_v59, %v2542_v2  ;;  %v7420_v55 = vpop.f32.mrf.mxu0  ;;  %v3820_v1 = vsel %vm1508_vm7, %v2938_v15, %v3659_v16  ;;  %v1739_v2 = vsel %vm1508_vm7, %v1281_v46, %v1503_v38  ;;  %v2298_v38 = vadd.f32 %v2297_v21, %v2209_v45 }
 0x1ef   : > { %v2383_v23 = vpop.f32.mrf.mxu3  ;;  %4402 = vmatmul.bf16.vlgmr.msrb.gmra.mxu1 %v3820_v1 }
 0x1f0   : > { %v2610_v53 = vmax.f32 %v2578_v34, 0.0  ;;  %v2384_v54 = vadd.f32 %v2383_v23, %v2295_v49  ;;  %v1241_v23 = vrot.slane %v1239_v13, 7 }
 0x1f1   : > { %5474 = vmatmul.msk.bf16.gmra.mxu0 %vm1508_vm7, %v1346_v26 }
 0x1f2   : > { %v2642_v42 = vpack.c.bf16 %v2610_v53, %v2610_v53  ;;  %v2473_v40 = vadd.f32 %v7342_v39, %v2384_v54  ;;  %v6072_v39 = vld [vmem:[#allocation2 + $0x78] sm:$0xff]  ;;  %v1244_v13 = vor.u32 %v1242_v18, %v1241_v23 }
 0x1f3   : > { %v7430_v12 = vld [vmem:[#allocation2 + $0x20] sm:$0xff]  ;;  %v1680_v26 = vsel %vm1508_vm7, %v6072_v39, %v1473_v51 }
 0x1f4   : > { %2674 = vst.msk [vmem:[#allocation2 + $0x28] sm:$0xf] %vm278_vm0, %v2642_v42  ;;  %v2543_v27 = vmul.f32 %v7227_v57, %v2473_v40  ;;  %2425 = vmatmul.bf16.gmra.mxu3 %v1739_v2  ;;  %v2299_v49 = vpop.f32.mrf.mxu2  ;;  %3666 = vrot.lane.b32.xlu0 %v7430_v12, %s6147_s18  ;;  %v2842_v34 = vshll.u32 %v7430_v12, 16  ;;  %v2839_v48 = vshrl.u32 %v7430_v12, 16  ;;  %v2213_v45 = vpop.f32.mrf.mxu1  ;;  %v2211_v2 = vadd.f32 %v2210_v58, %v7134_v37 }
 0x1f5   : > { %v1282_v39 = vsel %vm6302_vm3, 0, %v1244_v13  ;;  %v2214_v23 = vadd.f32 %v2213_v45, %v7144_v10 }
 0x1f6   : > { %v2579_v46 = vadd.f32 %v7234_v59, %v2543_v27  ;;  %v2482_v16 = vpop.f32.mrf.mxu0  ;;  %v2962_v40 = vrot.slane %v2842_v34, 1  ;;  %v2300_v27 = vadd.f32 %v2299_v49, %v2211_v2 }
 0x1f7   : > { %v2386_v29 = vpop.f32.mrf.mxu3 }
 0x1f8   : > { %v2611_v15 = vmax.f32 %v2579_v46, 0.0  ;;  %v2387_v53 = vadd.f32 %v2386_v29, %v2298_v38  ;;  %v7445_v54 = vor.u32 %v2962_v40, %v2839_v48  ;;  %v1505_v46 = vpop.permute.xlu1 %1504 }
 0x1f9   : > { %2341 = vmatmul.bf16.gmra.mxu2 %v1680_v26  ;;  %v1743_v17 = vsel %vm1508_vm7, %v1282_v39, %v1505_v46 }
 0x1fa   : > { %v2643_v21 = vpack.c.bf16 %v2611_v15, %v2611_v15  ;;  %v2476_v1 = vadd.f32 %v7363_v61, %v2387_v53 }
 0x1fc   : > { %2675 = vst.msk [vmem:[#allocation2 + $0x2c] sm:$0xf] %vm278_vm0, %v2643_v21  ;;  %v2544_v42 = vmul.f32 %v7227_v57, %v2476_v1  ;;  %v2302_v51 = vpop.f32.mrf.mxu2  ;;  %v2215_v49 = vpop.f32.mrf.mxu1 }
 0x1fd   : > { %v2303_v1 = vadd.f32 %v2302_v51, %v2214_v23  ;;  %v2216_v51 = vadd.f32 %v2215_v49, %v7159_v28 }
 0x1fe   : > { %v2580_v38 = vadd.f32 %v7234_v59, %v2544_v42  ;;  %v2485_v26 = vpop.f32.mrf.mxu0 }
 0x1ff   : > { %v2388_v29 = vpop.f32.mrf.mxu3 }
 0x200   : > { %v2612_v61 = vmax.f32 %v2580_v38, 0.0  ;;  %v2389_v40 = vadd.f32 %v2388_v29, %v2300_v27 }
 0x202   : > { %v2644_v18 = vpack.c.bf16 %v2612_v61, %v2612_v61  ;;  %v2478_v37 = vadd.f32 %v7387_v33, %v2389_v40 }
 0x203   : > { %v7458_v58 = vld [vmem:[#allocation2 + $0x28] sm:$0xff] }
 0x204   : > { %2676 = vst.msk [vmem:[#allocation2 + $0x30] sm:$0xf] %vm278_vm0, %v2644_v18  ;;  %v2545_v15 = vmul.f32 %v7227_v57, %v2478_v37  ;;  %2430 = vmatmul.bf16.gmra.mxu3 %v1743_v17  ;;  %v2304_v53 = vpop.f32.mrf.mxu2  ;;  %3668 = vrot.lane.b32.xlu1 %v7458_v58, %s6147_s18  ;;  %v2849_v21 = vshll.u32 %v7458_v58, 16  ;;  %v2846_v2 = vshrl.u32 %v7458_v58, 16  ;;  %v2218_v40 = vpop.f32.mrf.mxu1  ;;  %v5986_v58 = vld [vmem:[%s8748_s4 + $0xa0] sm:$0xff] }
 0x205   : > { %v2305_v17 = vadd.f32 %v2304_v53, %v2216_v51  ;;  %v2219_v28 = vadd.f32 %v2218_v40, %v7166_v35  ;;  %v5981_v53 = vld [vmem:[%s8748_s4 + $0x78] sm:$0xff] }
 0x206   : > { %v2581_v13 = vadd.f32 %v7234_v59, %v2545_v15  ;;  %v2487_v33 = vpop.f32.mrf.mxu0  ;;  %v2964_v10 = vrot.slane %v2849_v21, 1  ;;  %4483 = vmatpush.bf16.msra.mxu2 %v5981_v53 }
 0x207   : > { %v2391_v42 = vpop.f32.mrf.mxu3 }
 0x208   : > { %v2613_v45 = vmax.f32 %v2581_v13, 0.0  ;;  %v2392_v27 = vadd.f32 %v2391_v42, %v2303_v1  ;;  %v7472_v38 = vor.u32 %v2964_v10, %v2846_v2 }
 0x20a   : > { %v2645_v46 = vpack.c.bf16 %v2613_v45, %v2613_v45  ;;  %v2481_v39 = vadd.f32 %v7420_v55, %v2392_v27 }
 0x20c   : > { %2677 = vst.msk [vmem:[#allocation2 + $0x34] sm:$0xf] %vm278_vm0, %v2645_v46  ;;  %v2546_v29 = vmul.f32 %v7227_v57, %v2481_v39  ;;  %v2307_v61 = vpop.f32.mrf.mxu2  ;;  %v2820_v39 = vrot.slane %v2818_v36, 7 }
 0x20d   : > { %v2308_v27 = vadd.f32 %v2307_v61, %v2219_v28  ;;  %v5989_v28 = vld [vmem:[%s8748_s4 + $0xb8] sm:$0xff] }
 0x20e   : > { %v2582_v18 = vadd.f32 %v7234_v59, %v2546_v29  ;;  %v7479_v23 = vpop.f32.mrf.mxu0  ;;  %4572 = vmatpush.bf16.msra.mxu3 %v5989_v28  ;;  %v2827_v28 = vrot.slane %v2825_v5, 7 }
 0x20f   : > { %v2393_v37 = vpop.f32.mrf.mxu3 }
 0x210   : > { %v2614_v15 = vmax.f32 %v2582_v18, 0.0  ;;  %v2394_v1 = vadd.f32 %v2393_v37, %v2305_v17  ;;  %v2220_v17 = vpop.f32.mrf.mxu1 }
 0x212   : > { %v2646_v13 = vpack.c.bf16 %v2614_v15, %v2614_v15  ;;  %v2483_v42 = vadd.f32 %v2482_v16, %v2394_v1  ;;  %v2823_v1 = vor.u32 %v2821_v32, %v2820_v39 }
 0x213   : > { %v7481_v10 = vld [vmem:[#allocation2 + $0x30] sm:$0xff] }
 0x214   : > { %2678 = vst.msk [vmem:[#allocation2 + $0x38] sm:$0xf] %vm278_vm0, %v2646_v13  ;;  %v2547_v55 = vmul.f32 %v7227_v57, %v2483_v42  ;;  %v2309_v49 = vpop.f32.mrf.mxu2  ;;  %3670 = vrot.lane.b32.xlu2 %v7481_v10, %s6147_s18  ;;  %v2856_v45 = vshll.u32 %v7481_v10, 16  ;;  %v2853_v35 = vshrl.u32 %v7481_v10, 16  ;;  %v2221_v13 = vadd.f32 %v2220_v17, %v7177_v52  ;;  %v5997_v17 = vld [vmem:[%s8748_s4 + $0xf8] sm:$0xff] }
 0x215   : > { %v2939_v63 = vsel %vm6302_vm3, 0, %v2823_v1  ;;  %4661 = vmatpush.bf16.msra.mxu0 %v5997_v17 }
 0x216   : > { %v2583_v16 = vadd.f32 %v7234_v59, %v2547_v55  ;;  %v2966_v51 = vrot.slane %v2856_v45, 1  ;;  %v2492_v18 = vpop.f32.mrf.mxu0  ;;  %v2310_v55 = vadd.f32 %v2309_v49, %v2221_v13 }
 0x217   : > { %v2396_v46 = vpop.f32.mrf.mxu3 }
 0x218   : > { %v2615_v29 = vmax.f32 %v2583_v16, 0.0  ;;  %v2397_v40 = vadd.f32 %v2396_v46, %v2308_v27  ;;  %v7500_v37 = vor.u32 %v2966_v51, %v2853_v35 }
 0x21a   : > { %v2647_v61 = vpack.c.bf16 %v2615_v29, %v2615_v29  ;;  %v2486_v15 = vadd.f32 %v2485_v26, %v2397_v40 }
 0x21c   : > { %2679 = vst.msk [vmem:[#allocation2 + $0x3c] sm:$0xf] %vm278_vm0, %v2647_v61  ;;  %v2548_v36 = vmul.f32 %v7227_v57, %v2486_v15  ;;  %v2312_v42 = vpop.f32.mrf.mxu2  ;;  %v6001_v61 = vld [vmem:[%s8748_s4 + $0x118] sm:$0xff] }
 0x21d   : > { %v2313_v15 = vadd.f32 %v2312_v42, %v7009_v3  ;;  %4754 = vmatpush.bf16.msra.mxu1 %v6001_v61 }
 0x21e   : > { %v2584_v53 = vadd.f32 %v7234_v59, %v2548_v36  ;;  %v3661_v26 = vpop.permute.xlu2 %3660  ;;  %v2495_v29 = vpop.f32.mrf.mxu0 }
 0x21f   : > { %v2398_v27 = vpop.f32.mrf.mxu3  ;;  %v3824_v16 = vsel %vm1508_vm7, %v2939_v63, %v3661_v26  ;;  %v2830_v63 = vor.u32 %v2828_v41, %v2827_v28 }
 0x220   : > { %v2616_v32 = vmax.f32 %v2584_v53, 0.0  ;;  %v2399_v52 = vadd.f32 %v2398_v27, %v2310_v55  ;;  %4407 = vmatmul.bf16.gmra.mxu1 %v3824_v16 }
 0x221   : > { %v2940_v17 = vsel %vm6302_vm3, 0, %v2830_v63 }
 0x222   : > { %v2648_v46 = vpack.c.bf16 %v2616_v32, %v2616_v32  ;;  %v2488_v39 = vadd.f32 %v2487_v33, %v2399_v52 }
 0x223   : > { %v7514_v51 = vld [vmem:[#allocation2 + $0x38] sm:$0xff] }
 0x224   : > { %2680 = vst.msk [vmem:[#allocation2 + $0x40] sm:$0xf] %vm278_vm0, %v2648_v46  ;;  %v2549_v49 = vmul.f32 %v7227_v57, %v2488_v39  ;;  %v2314_v40 = vpop.f32.mrf.mxu2  ;;  %3672 = vrot.lane.b32.xlu0 %v7514_v51, %s6147_s18  ;;  %v2863_v33 = vshll.u32 %v7514_v51, 16  ;;  %v2860_v13 = vshrl.u32 %v7514_v51, 16 }
 0x225   : > { %v2315_v16 = vadd.f32 %v2314_v40, %v7026_v22 }
 0x226   : > { %v2585_v1 = vadd.f32 %v7234_v59, %v2549_v49  ;;  %v2968_v55 = vrot.slane %v2863_v33, 1  ;;  %v2497_v52 = vpop.f32.mrf.mxu0 }
 0x227   : > { %v2401_v36 = vpop.f32.mrf.mxu3 }
 0x228   : > { %v2617_v53 = vmax.f32 %v2585_v1, 0.0  ;;  %v2402_v27 = vadd.f32 %v2401_v36, %v2313_v15  ;;  %v7536_v26 = vor.u32 %v2968_v55, %v2860_v13  ;;  %v5980_v36 = vld [vmem:[%s8748_s4 + $0x70] sm:$0xff] }
 0x229   : > { %4484 = vmatpush.bf16.msra.mxu2 %v5980_v36 }
 0x22a   : > { %v2649_v3 = vpack.c.bf16 %v2617_v53, %v2617_v53  ;;  %v2491_v42 = vadd.f32 %v7479_v23, %v2402_v27 }
 0x22c   : > { %2681 = vst.msk [vmem:[#allocation2 + $0x44] sm:$0xf] %vm278_vm0, %v2649_v3  ;;  %v2550_v32 = vmul.f32 %v7227_v57, %v2491_v42  ;;  %v2317_v5 = vpop.f32.mrf.mxu2  ;;  %v2834_v42 = vrot.slane %v2832_v4, 7  ;;  %v5988_v4 = vld [vmem:[%s8748_s4 + $0xb0] sm:$0xff] }
 0x22d   : > { %v2318_v55 = vadd.f32 %v2317_v5, %v7048_v30  ;;  %4573 = vmatpush.bf16.msra.mxu3 %v5988_v4 }
 0x22e   : > { %v2586_v46 = vadd.f32 %v7234_v59, %v2550_v32  ;;  %v3663_v49 = vpop.permute.xlu2 %3662  ;;  %v2500_v3 = vpop.f32.mrf.mxu0 }
 0x22f   : > { %v2403_v39 = vpop.f32.mrf.mxu3  ;;  %v3828_v20 = vsel %vm1508_vm7, %v2940_v17, %v3663_v49 }
 0x230   : > { %v2618_v61 = vmax.f32 %v2586_v46, 0.0  ;;  %v2404_v23 = vadd.f32 %v2403_v39, %v2315_v16  ;;  %4412 = vmatmul.bf16.gmra.mxu1 %v3828_v20  ;;  %v8821_v39 = vshll.u32 %v7373_v24, 16 }
 0x232   : > { %v2650_v41 = vpack.c.bf16 %v2618_v61, %v2618_v61  ;;  %v2493_v15 = vadd.f32 %v2492_v18, %v2404_v23  ;;  %v2837_v49 = vor.u32 %v8821_v39, %v2834_v42 }
 0x233   : > { %v7548_v1 = vld [vmem:[#allocation2 + $0x40] sm:$0xff] }
 0x234   : > { %2682 = vst.msk [vmem:[#allocation2 + $0x48] sm:$0xf] %vm278_vm0, %v2650_v41  ;;  %v2551_v22 = vmul.f32 %v7227_v57, %v2493_v15  ;;  %v2319_v40 = vpop.f32.mrf.mxu2  ;;  %3674 = vrot.lane.b32.xlu1 %v7548_v1, %s6147_s18  ;;  %v2870_v28 = vshll.u32 %v7548_v1, 16  ;;  %v2867_v53 = vshrl.u32 %v7548_v1, 16  ;;  %v2941_v24 = vsel %vm6302_vm3, 0, %v2837_v49 }
 0x235   : > { %v2320_v23 = vadd.f32 %v2319_v40, %v7059_v31 }
 0x236   : > { %v2587_v18 = vadd.f32 %v7234_v59, %v2551_v22  ;;  %v2970_v63 = vrot.slane %v2870_v28, 1 }
 0x237   : > { %v2406_v27 = vpop.f32.mrf.mxu3 }
 0x238   : > { %v2619_v32 = vmax.f32 %v2587_v18, 0.0  ;;  %v2407_v16 = vadd.f32 %v2406_v27, %v2318_v55  ;;  %v7567_v46 = vor.u32 %v2970_v63, %v2867_v53  ;;  %v2502_v55 = vpop.f32.mrf.mxu0  ;;  %v5996_v63 = vld [vmem:[%s8748_s4 + $0xf0] sm:$0xff] }
 0x239   : > { %4662 = vmatpush.bf16.msra.mxu0 %v5996_v63 }
 0x23a   : > { %v2651_v30 = vpack.c.bf16 %v2619_v32, %v2619_v32  ;;  %v2496_v5 = vadd.f32 %v2495_v29, %v2407_v16 }
 0x23c   : > { %2683 = vst.msk [vmem:[#allocation2 + $0x4c] sm:$0xf] %vm278_vm0, %v2651_v30  ;;  %v2552_v17 = vmul.f32 %v7227_v57, %v2496_v5  ;;  %v2322_v61 = vpop.f32.mrf.mxu2 }
 0x23d   : > { %v2323_v16 = vadd.f32 %v2322_v61, %v7079_v14 }
 0x23e   : > { %v2588_v20 = vadd.f32 %v7234_v59, %v2552_v17  ;;  %v3665_v15 = vpop.permute.xlu2 %3664 }
 0x23f   : > { %v2408_v41 = vpop.f32.mrf.mxu3  ;;  %v3832_v36 = vsel %vm1508_vm7, %v2941_v24, %v3665_v15 }
 0x240   : > { %v2620_v29 = vmax.f32 %v2588_v20, 0.0  ;;  %v2409_v22 = vadd.f32 %v2408_v41, %v2320_v23  ;;  %4417 = vmatmul.bf16.gmra.mxu1 %v3832_v36  ;;  %v2505_v41 = vpop.f32.mrf.mxu0 }
 0x242   : > { %v2652_v18 = vpack.c.bf16 %v2620_v29, %v2620_v29  ;;  %v2498_v27 = vadd.f32 %v2497_v52, %v2409_v22 }
 0x243   : > { %v7581_v42 = vld [vmem:[#allocation2 + $0x48] sm:$0xff] }
 0x244   : > { %2684 = vst.msk [vmem:[#allocation2 + $0x50] sm:$0xf] %vm278_vm0, %v2652_v18  ;;  %v2553_v31 = vmul.f32 %v7227_v57, %v2498_v27  ;;  %v2324_v40 = vpop.f32.mrf.mxu2  ;;  %3676 = vrot.lane.b32.xlu2 %v7581_v42, %s6147_s18  ;;  %v2877_v32 = vshll.u32 %v7581_v42, 16  ;;  %v2874_v30 = vshrl.u32 %v7581_v42, 16 }
 0x245   : > { %v2325_v15 = vadd.f32 %v2324_v40, %v7092_v8 }
 0x246   : > { %v2589_v52 = vadd.f32 %v7234_v59, %v2553_v31  ;;  %v2972_v39 = vrot.slane %v2877_v32, 1 }
 0x247   : > { %v2411_v5 = vpop.f32.mrf.mxu3 }
 0x248   : > { %v2621_v49 = vmax.f32 %v2589_v52, 0.0  ;;  %v2412_v17 = vadd.f32 %v2411_v5, %v2323_v16  ;;  %v7598_v4 = vor.u32 %v2972_v39, %v2874_v30  ;;  %v5979_v16 = vld [vmem:[%s8748_s4 + $0x68] sm:$0xff]  ;;  %v2507_v8 = vpop.f32.mrf.mxu0 }
 0x249   : > { %4485 = vmatpush.bf16.msra.mxu2 %v5979_v16 }
 0x24a   : > { %v2653_v23 = vpack.c.bf16 %v2621_v49, %v2621_v49  ;;  %v2501_v20 = vadd.f32 %v2500_v3, %v2412_v17 }
 0x24c   : > { %2685 = vst.msk [vmem:[#allocation2 + $0x54] sm:$0xf] %vm278_vm0, %v2653_v23  ;;  %v2554_v14 = vmul.f32 %v7227_v57, %v2501_v20  ;;  %v2327_v61 = vpop.f32.mrf.mxu2 }
 0x24d   : > { %v2328_v52 = vadd.f32 %v2327_v61, %v7110_v62 }
 0x24e   : > { %v2590_v24 = vadd.f32 %v7234_v59, %v2554_v14 }
 0x24f   : > { %v2413_v29 = vpop.f32.mrf.mxu3 }
 0x250   : > { %v2622_v22 = vmax.f32 %v2590_v24, 0.0  ;;  %v2414_v36 = vadd.f32 %v2413_v29, %v2325_v15  ;;  %v5987_v24 = vld [vmem:[%s8748_s4 + $0xa8] sm:$0xff] }
 0x251   : > { %v5995_v29 = vld [vmem:[%s8748_s4 + $0xe8] sm:$0xff]  ;;  %4574 = vmatpush.bf16.msra.mxu3 %v5987_v24 }
 0x252   : > { %v2654_v18 = vpack.c.bf16 %v2622_v22, %v2622_v22  ;;  %v2503_v27 = vadd.f32 %v2502_v55, %v2414_v36  ;;  %4663 = vmatpush.bf16.msra.mxu0 %v5995_v29 }
 0x253   : > { %v7604_v31 = vld [vmem:[#allocation2 + $0x50] sm:$0xff] }
 0x254   : > { %2686 = vst.msk [vmem:[#allocation2 + $0x58] sm:$0xf] %vm278_vm0, %v2654_v18  ;;  %v2555_v3 = vmul.f32 %v7227_v57, %v2503_v27  ;;  %v2329_v63 = vpop.f32.mrf.mxu2  ;;  %3678 = vrot.lane.b32.xlu0 %v7604_v31, %s6147_s18  ;;  %v2884_v40 = vshll.u32 %v7604_v31, 16  ;;  %v2881_v5 = vshrl.u32 %v7604_v31, 16  ;;  %v2510_v18 = vpop.f32.mrf.mxu0  ;;  %v2841_v27 = vrot.slane %v2839_v48, 7  ;;  %v5974_v31 = vld [vmem:[%s8748_s4 + $0x40] sm:$0xff] }
 0x255   : > { %v2330_v22 = vadd.f32 %v2329_v63, %v7121_v9  ;;  %4575 = vmatpush.bf16.msra.mxu3 %v5986_v58 }
 0x256   : > { %v2591_v55 = vadd.f32 %v7234_v59, %v2555_v3  ;;  %v2974_v49 = vrot.slane %v2884_v40, 1 }
 0x257   : > { %v2416_v39 = vpop.f32.mrf.mxu3 }
 0x258   : > { %v2623_v17 = vmax.f32 %v2591_v55, 0.0  ;;  %v2417_v23 = vadd.f32 %v2416_v39, %v2328_v52  ;;  %v7621_v20 = vor.u32 %v2974_v49, %v2881_v5  ;;  %v2844_v49 = vor.u32 %v2842_v34, %v2841_v27 }
 0x25a   : > { %v2655_v14 = vpack.c.bf16 %v2623_v17, %v2623_v17  ;;  %v2506_v15 = vadd.f32 %v2505_v41, %v2417_v23  ;;  %v6000_v17 = vld [vmem:[%s8748_s4 + $0x110] sm:$0xff] }
 0x25b   : > { %4755 = vmatpush.bf16.msra.mxu1 %v6000_v17 }
 0x25c   : > { %2687 = vst.msk [vmem:[#allocation2 + $0x5c] sm:$0xf] %vm278_vm0, %v2655_v14  ;;  %v2556_v62 = vmul.f32 %v7227_v57, %v2506_v15  ;;  %v2332_v61 = vpop.f32.mrf.mxu2  ;;  %v2942_v15 = vsel %vm6302_vm3, 0, %v2844_v49  ;;  %v2848_v49 = vrot.slane %v2846_v2, 7 }
 0x25d   : > { %v2333_v48 = vadd.f32 %v2332_v61, %v7139_v7  ;;  %v2512_v7 = vpop.f32.mrf.mxu0 }
 0x25e   : > { %v2592_v36 = vadd.f32 %v7234_v59, %v2556_v62 }
 0x25f   : > { %v2418_v41 = vpop.f32.mrf.mxu3 }
 0x260   : > { %v2624_v3 = vmax.f32 %v2592_v36, 0.0  ;;  %v2419_v16 = vadd.f32 %v2418_v41, %v2330_v22 }
 0x262   : > { %v2656_v52 = vpack.c.bf16 %v2624_v3, %v2624_v3  ;;  %v2508_v55 = vadd.f32 %v2507_v8, %v2419_v16 }
 0x263   : > { %v7635_v39 = vld [vmem:[#allocation2 + $0x58] sm:$0xff] }
 0x264   : > { %2688 = vst.msk [vmem:[#allocation2 + $0x60] sm:$0xf] %vm278_vm0, %v2656_v52  ;;  %v2557_v9 = vmul.f32 %v7227_v57, %v2508_v55  ;;  %v2334_v63 = vpop.f32.mrf.mxu2  ;;  %3680 = vrot.lane.b32.xlu1 %v7635_v39, %s6147_s18  ;;  %v8785_v12 = vshll.u32 %v7635_v39, 16  ;;  %v8786_v34 = vshrl.u32 %v7635_v39, 16 }
 0x265   : > { %v2335_v16 = vadd.f32 %v2334_v63, %v7150_v50  ;;  %v7671_v50 = vld [vmem:[#allocation2 + $0x8] sm:$0xff]  ;;  %v5978_v63 = vld [vmem:[%s8748_s4 + $0x60] sm:$0xff] }
 0x266   : > { %v2593_v8 = vadd.f32 %v7234_v59, %v2557_v9  ;;  %v3667_v14 = vpop.permute.xlu0 %3666  ;;  %v2976_v22 = vrot.slane %v8785_v12, 1  ;;  %4486 = vmatpush.bf16.msra.mxu2 %v5978_v63  ;;  %v7926_v12 = vld [vmem:[#allocation2 + $0x50] sm:$0xff] }
 0x267   : > { %v2421_v23 = vpop.f32.mrf.mxu3  ;;  %v3836_v29 = vsel %vm1508_vm7, %v2942_v15, %v3667_v14 }
 0x268   : > { %v2625_v62 = vmax.f32 %v2593_v8, 0.0  ;;  %v2422_v24 = vadd.f32 %v2421_v23, %v2333_v48  ;;  %4422 = vmatmul.bf16.gmra.mxu1 %v3836_v29  ;;  %v7657_v41 = vor.u32 %v2976_v22, %v8786_v34  ;;  %v8822_v23 = vshll.u32 %v6534_v47, 16 }
 0x269   : > { %v8823_v22 = vshrl.u32 %v6534_v47, 16 }
 0x26a   : > { %v2657_v61 = vpack.c.bf16 %v2625_v62, %v2625_v62  ;;  %v2511_v36 = vadd.f32 %v2510_v18, %v2422_v24  ;;  %v2515_v18 = vpop.f32.mrf.mxu0  ;;  %v993_v14 = vrot.slane %v8822_v23, 1  ;;  %v7692_v62 = vld [vmem:[%s8747_s3] ss:$0 sm:$0xff] }
 0x26c   : > { %2689 = vst.msk [vmem:[#allocation2 + $0x64] sm:$0xf] %vm278_vm0, %v2657_v61  ;;  %v2558_v27 = vmul.f32 %v7227_v57, %v2511_v36  ;;  %v2337_v3 = vpop.f32.mrf.mxu2  ;;  %v2851_v57 = vor.u32 %v2849_v21, %v2848_v49 }
 0x26d   : > { %v2338_v21 = vadd.f32 %v2337_v3, %v7162_v11  ;;  %v3131_v3 = vshrl.u32 %v7671_v50, 16 }
 0x26e   : > { %v2594_v52 = vadd.f32 %v7234_v59, %v2558_v27  ;;  %v7677_v59 = vld [vmem:[%s8746_s2] ss:$0 sm:$0xff]  ;;  %v2943_v11 = vsel %vm6302_vm3, 0, %v2851_v57 }
 0x26f   : > { %v2423_v55 = vpop.f32.mrf.mxu3 }
 0x270   : > { %v2626_v9 = vmax.f32 %v2594_v52, 0.0  ;;  %v2424_v17 = vadd.f32 %v2423_v55, %v2335_v16 }
 0x272   : > { %v2658_v48 = vpack.c.bf16 %v2626_v9, %v2626_v9  ;;  %v2513_v8 = vadd.f32 %v2512_v7, %v2424_v17  ;;  %v994_v7 = vor.u32 %v993_v14, %v8823_v22  ;;  %v2517_v23 = vpop.f32.mrf.mxu0  ;;  %v7711_v14 = vld [vmem:[#allocation2 + $0x10] sm:$0xff] }
 0x273   : > { %v7667_v15 = vld [vmem:[#allocation2 + $0x60] sm:$0xff] }
 0x274   : > { %2690 = vst.msk [vmem:[#allocation2 + $0x68] sm:$0xf] %vm278_vm0, %v2658_v48  ;;  %v2559_v2 = vmul.f32 %v7677_v59, %v2513_v8  ;;  %3682 = vrot.lane.b32.xlu2 %v7667_v15, %s6147_s18  ;;  %v2339_v29 = vpop.f32.mrf.mxu2  ;;  %v8779_v61 = vshll.u32 %v7667_v15, 16  ;;  %v8784_v36 = vshrl.u32 %v7667_v15, 16  ;;  %v1026_v48 = vsel %vm6576_vm6, %v994_v7, 0 }
 0x275   : > { %v2340_v63 = vadd.f32 %v2339_v29, %v7170_v44  ;;  %v3138_v7 = vshrl.u32 %v7711_v14, 16 }
 0x276   : > { %v2595_v24 = vadd.f32 %v7692_v62, %v2559_v2  ;;  %v3669_v16 = vpop.permute.xlu1 %3668  ;;  %v2978_v47 = vrot.slane %v8779_v61, 1  ;;  %v3133_v2 = vrot.slane %v3131_v3, 7 }
 0x277   : > { %v2426_v27 = vpop.f32.mrf.mxu3  ;;  %v3840_v49 = vsel %vm1508_vm7, %v2943_v11, %v3669_v16 }
 0x278   : > { %v2627_v52 = vmax.f32 %v2595_v24, 0.0  ;;  %v2427_v55 = vadd.f32 %v2426_v27, %v2338_v21  ;;  %4427 = vmatmul.bf16.gmra.mxu1 %v3840_v49  ;;  %v7709_v8 = vor.u32 %v2978_v47, %v8784_v36  ;;  %v3134_v21 = vshll.u32 %v7671_v50, 16 }
 0x279   : > { %v2855_v24 = vrot.slane %v2853_v35, 7  ;;  %v3140_v47 = vrot.slane %v3138_v7, 7  ;;  %v3671_v35 = vpop.permute.xlu2 %3670 }
 0x27a   : > { %v2659_v9 = vpack.c.bf16 %v2627_v52, %v2627_v52  ;;  %v2516_v17 = vadd.f32 %v2515_v18, %v2427_v55  ;;  %v5994_v18 = vld [vmem:[%s8748_s4 + $0xe0] sm:$0xff]  ;;  %v3136_v11 = vor.u32 %v3134_v21, %v3133_v2  ;;  %v2520_v10 = vpop.f32.mrf.mxu0 }
 0x27b   : > { %4664 = vmatpush.bf16.msra.mxu0 %v5994_v18  ;;  %v2858_v44 = vor.u32 %v2856_v45, %v2855_v24  ;;  %v3141_v45 = vshll.u32 %v7711_v14, 16 }
 0x27c   : > { %2691 = vst.msk [vmem:[#allocation2 + $0x6c] sm:$0xf] %vm278_vm0, %v2659_v9  ;;  %v2560_v57 = vmul.f32 %v7677_v59, %v2516_v17  ;;  %1474 = vrot.lane.b32.xlu2 %v1026_v48, %s6147_s18  ;;  %v2342_v52 = vpop.f32.mrf.mxu2  ;;  %v7733_v9 = vld [vmem:[#allocation2 + $0x18] sm:$0xff]  ;;  %v3258_v48 = vsel %vm6302_vm3, 0, %v3136_v11 }
 0x27d   : > { %v2944_v2 = vsel %vm6302_vm3, 0, %v2858_v44  ;;  %v3143_v24 = vor.u32 %v3141_v45, %v3140_v47  ;;  %v3276_v61 = vrot.slane %v3141_v45, 1  ;;  %v5993_v45 = vld [vmem:[%s8748_s4 + $0xd8] sm:$0xff] }
 0x27e   : > { %v2596_v58 = vadd.f32 %v7692_v62, %v2560_v57 }
 0x27f   : > { %v2428_v22 = vpop.f32.mrf.mxu3  ;;  %4665 = vmatpush.bf16.msra.mxu0 %v5993_v45 }
 0x280   : > { %v2628_v27 = vmax.f32 %v2596_v58, 0.0  ;;  %v2429_v16 = vadd.f32 %v2428_v22, %v2340_v63  ;;  %v3844_v58 = vsel %vm1508_vm7, %v2944_v2, %v3671_v35  ;;  %v3145_v22 = vshrl.u32 %v7733_v9, 16  ;;  %v7768_v2 = vld [vmem:[#allocation2 + $0x20] sm:$0xff] }
 0x282   : > { %v2660_v55 = vpack.c.bf16 %v2628_v27, %v2628_v27  ;;  %v2518_v49 = vadd.f32 %v2517_v23, %v2429_v16  ;;  %v2343_v23 = vadd.f32 %v2342_v52, %v7180_v19  ;;  %v7753_v52 = vld [vmem:[#allocation2 + $0x88] sm:$0xff] }
 0x283   : > { %v7729_v29 = vld [vmem:[#allocation2 + $0x68] sm:$0xff] }
 0x284   : > { %2692 = vst.msk [vmem:[#allocation2 + $0x70] sm:$0xf] %vm278_vm0, %v2660_v55  ;;  %v2561_v17 = vmul.f32 %v7677_v59, %v2518_v49  ;;  %3684 = vrot.lane.b32.xlu0 %v7729_v29, %s6147_s18  ;;  %3706 = vrot.lane.b32.xlu2 %v3258_v48, %s6147_s18  ;;  %v8777_v18 = vshll.u32 %v7729_v29, 16  ;;  %v8778_v16 = vshrl.u32 %v7729_v29, 16  ;;  %v5977_v55 = vld [vmem:[%s8748_s4 + $0x58] sm:$0xff]  ;;  %v2344_v35 = vpop.f32.mrf.mxu2 }
 0x285   : > { %4487 = vmatpush.bf16.msra.mxu2 %v5977_v55  ;;  %v2862_v55 = vrot.slane %v2860_v13, 7 }
 0x286   : > { %v2597_v57 = vadd.f32 %v7692_v62, %v2561_v17  ;;  %v2980_v19 = vrot.slane %v8777_v18, 1  ;;  %v3274_v17 = vrot.slane %v3134_v21, 1 }
 0x287   : > { %v2431_v63 = vpop.f32.mrf.mxu3 }
 0x288   : > { %v2629_v27 = vmax.f32 %v2597_v57, 0.0  ;;  %v2432_v11 = vadd.f32 %v2431_v63, %v2343_v23  ;;  %4432 = vmatmul.bf16.gmra.mxu1 %v3844_v58  ;;  %v7760_v47 = vor.u32 %v2980_v19, %v8778_v16  ;;  %v3259_v23 = vsel %vm6302_vm3, 0, %v3143_v24  ;;  %v5985_v24 = vld [vmem:[%s8748_s4 + $0x98] sm:$0xff] }
 0x289   : > { %v3147_v57 = vrot.slane %v3145_v22, 7  ;;  %v3148_v58 = vshll.u32 %v7733_v9, 16  ;;  %v3275_v19 = vor.u32 %v3274_v17, %v3131_v3  ;;  %4576 = vmatpush.bf16.msra.mxu3 %v5985_v24  ;;  %v2865_v16 = vor.u32 %v2863_v33, %v2862_v55 }
 0x28a   : > { %v2661_v49 = vpack.c.bf16 %v2629_v27, %v2629_v27  ;;  %v2521_v44 = vadd.f32 %v2520_v10, %v2432_v11  ;;  %8824 = vst [vmem:[#allocation9_spill] sm:$0xff] %v7760_v47  ;;  %v8825_v10 = vld [vmem:[#allocation6_spill] sm:$0xff]  ;;  %v2522_v11 = vpop.f32.mrf.mxu0 }
 0x28b   : > { %v2345_v21 = vadd.f32 %v2344_v35, %v8825_v10  ;;  %v3152_v35 = vshrl.u32 %v7768_v2, 16  ;;  %v3322_v13 = vsel %vm6576_vm6, %v3275_v19, 0  ;;  %v7815_v19 = vpop.f32.mrf.mxu1 }
 0x28c   : > { %2693 = vst.msk [vmem:[#allocation2 + $0x74] sm:$0xf] %vm278_vm0, %v2661_v49  ;;  %v2562_v48 = vmul.f32 %v7677_v59, %v2521_v44  ;;  %1506 = vrot.lane.b32.xlu0 %v7753_v52, %s6147_s18  ;;  %3708 = vrot.lane.b32.xlu2 %v3259_v23, %s6147_s18  ;;  %v3150_v23 = vor.u32 %v3148_v58, %v3147_v57 }
 0x28d   : > { %v3154_v57 = vrot.slane %v3152_v35, 7 }
 0x28e   : > { %v2598_v63 = vadd.f32 %v7692_v62, %v2562_v48  ;;  %v3260_v17 = vsel %vm6302_vm3, 0, %v3150_v23 }
 0x28f   : > { %v2433_v27 = vpop.f32.mrf.mxu3 }
 0x290   : > { %v2630_v49 = vmax.f32 %v2598_v63, 0.0  ;;  %v2434_v44 = vadd.f32 %v2433_v27, %v2345_v21  ;;  %v7796_v21 = vld [vmem:[#allocation2 + $0x28] sm:$0xff]  ;;  %v2945_v27 = vsel %vm6302_vm3, 0, %v2865_v16 }
 0x291   : > { %v3159_v23 = vshrl.u32 %v7796_v21, 16  ;;  %v5999_v16 = vld [vmem:[%s8748_s4 + $0x108] sm:$0xff] }
 0x292   : > { %v2662_v48 = vpack.c.bf16 %v2630_v49, %v2630_v49  ;;  %v2523_v10 = vadd.f32 %v2522_v11, %v2434_v44  ;;  %v3277_v11 = vor.u32 %v3276_v61, %v3138_v7  ;;  %4756 = vmatpush.bf16.msra.mxu1 %v5999_v16  ;;  %v7851_v16 = vld [vmem:[#allocation2 + $0x38] sm:$0xff] }
 0x293   : > { %v7784_v18 = vld [vmem:[#allocation2 + $0x70] sm:$0xff] }
 0x294   : > { %2694 = vst.msk [vmem:[#allocation2 + $0x78] sm:$0xf] %vm278_vm0, %v2662_v48  ;;  %v2563_v3 = vmul.f32 %v7677_v59, %v2523_v10  ;;  %3754 = vrot.lane.b32.xlu0 %v3322_v13, %s6147_s18  ;;  %3710 = vrot.lane.b32.xlu2 %v3260_v17, %s6147_s18  ;;  %v8782_v51 = vshll.u32 %v7784_v18, 16  ;;  %v3155_v59 = vshll.u32 %v7768_v2, 16  ;;  %v8783_v63 = vshrl.u32 %v7784_v18, 16  ;;  %v7826_v48 = vld [vmem:[#allocation2 + $0x30] sm:$0xff] }
 0x295   : > { %3686 = vrot.lane.b32.xlu1 %v7784_v18, %s6147_s18  ;;  %v3323_v10 = vsel %vm6576_vm6, %v3277_v11, 0  ;;  %v3278_v13 = vrot.slane %v3148_v58, 1  ;;  %v3161_v17 = vrot.slane %v3159_v23, 7  ;;  %v3166_v45 = vshrl.u32 %v7826_v48, 16  ;;  %v7841_v11 = vpop.f32.mrf.mxu1 }
 0x296   : > { %v2599_v33 = vadd.f32 %v7692_v62, %v2563_v3  ;;  %v3673_v24 = vpop.permute.xlu0 %3672  ;;  %v2982_v62 = vrot.slane %v8782_v51, 1  ;;  %v3157_v44 = vor.u32 %v3155_v59, %v3154_v57  ;;  %v3162_v57 = vshll.u32 %v7796_v21, 16 }
 0x297   : > { %v3848_v49 = vsel %vm1508_vm7, %v2945_v27, %v3673_v24  ;;  %v3279_v24 = vor.u32 %v3278_v13, %v3145_v22  ;;  %v3169_v22 = vshll.u32 %v7826_v48, 16 }
 0x298   : > { %v2631_v55 = vmax.f32 %v2599_v33, 0.0  ;;  %4437 = vmatmul.bf16.gmra.mxu1 %v3848_v49  ;;  %v7824_v61 = vor.u32 %v2982_v62, %v8783_v63  ;;  %v3261_v3 = vsel %vm6302_vm3, 0, %v3157_v44  ;;  %v2869_v33 = vrot.slane %v2867_v53, 7  ;;  %v7904_v63 = vld [vmem:[#allocation2 + $0x48] sm:$0xff] }
 0x299   : > { %v3164_v27 = vor.u32 %v3162_v57, %v3161_v17  ;;  %v3168_v49 = vrot.slane %v3166_v45, 7  ;;  %v3324_v44 = vsel %vm6576_vm6, %v3279_v24, 0  ;;  %v3173_v17 = vshrl.u32 %v7851_v16, 16  ;;  %v5976_v24 = vld [vmem:[%s8748_s4 + $0x50] sm:$0xff] }
 0x29a   : > { %8826 = vst [vmem:[#allocation6_spill] sm:$0xff] %v7824_v61  ;;  %v2663_v7 = vpack.c.bf16 %v2631_v55, %v2631_v55  ;;  %v2872_v58 = vor.u32 %v2870_v28, %v2869_v33  ;;  %v3280_v55 = vrot.slane %v3155_v59, 1  ;;  %4488 = vmatpush.bf16.msra.mxu2 %v5976_v24  ;;  %v7996_v61 = vld [vmem:[#allocation2 + $0x38] sm:$0xff] }
 0x29b   : > { %v3262_v53 = vsel %vm6302_vm3, 0, %v3164_v27 }
 0x29c   : > { %2695 = vst.msk [vmem:[#allocation2 + $0x7c] sm:$0xf] %vm278_vm0, %v2663_v7  ;;  %3756 = vrot.lane.b32.xlu0 %v3323_v10, %s6147_s18  ;;  %3712 = vrot.lane.b32.xlu2 %v3261_v3, %s6147_s18  ;;  %v2946_v59 = vsel %vm6302_vm3, 0, %v2872_v58  ;;  %v3281_v7 = vor.u32 %v3280_v55, %v3152_v35  ;;  %v3171_v10 = vor.u32 %v3169_v22, %v3168_v49  ;;  %v7881_v49 = vld [vmem:[#allocation2 + $0x10] sm:$0xff] }
 0x29d   : > { %v7875_v35 = vpop.f32.mrf.mxu1 }
 0x29e   : > { %8828 = vst [vmem:[#allocation11_spill] sm:$0xff] %v7875_v35  ;;  %v3325_v58 = vsel %vm6576_vm6, %v3281_v7, 0  ;;  %v3263_v55 = vsel %vm6302_vm3, 0, %v3171_v10  ;;  %v5984_v7 = vld [vmem:[%s8748_s4 + $0x90] sm:$0xff]  ;;  %v2876_v10 = vrot.slane %v2874_v30, 7  ;;  %v3677_v30 = vpop.permute.xlu2 %3676 }
 0x29f   : > { %4577 = vmatpush.bf16.msra.mxu3 %v5984_v7 }
 0x2a0   : > { %v2879_v24 = vor.u32 %v2877_v32, %v2876_v10  ;;  %v5992_v32 = vld [vmem:[%s8748_s4 + $0xd0] sm:$0xff]  ;;  %v3187_v10 = vshrl.u32 %v7904_v63, 16 }
 0x2a1   : > { %4666 = vmatpush.bf16.msra.mxu0 %v5992_v32  ;;  %v5975_v32 = vld [vmem:[%s8748_s4 + $0x48] sm:$0xff] }
 0x2a2   : > { %v3189_v36 = vrot.slane %v3187_v10, 7  ;;  %4489 = vmatpush.bf16.msra.mxu2 %v5975_v32 }
 0x2a3   : > { %v7843_v62 = vld [vmem:[#allocation2 + $0x78] sm:$0xff] }
 0x2a4   : > { %3758 = vrot.lane.b32.xlu0 %v3324_v44, %s6147_s18  ;;  %3714 = vrot.lane.b32.xlu2 %v3262_v53, %s6147_s18  ;;  %v8780_v1 = vshll.u32 %v7843_v62, 16  ;;  %v8781_v3 = vshrl.u32 %v7843_v62, 16  ;;  %v3282_v44 = vrot.slane %v3162_v57, 1  ;;  %v3175_v53 = vrot.slane %v3173_v17, 7 }
 0x2a5   : > { %3688 = vrot.lane.b32.xlu1 %v7843_v62, %s6147_s18 }
 0x2a6   : > { %v3675_v28 = vpop.permute.xlu1 %3674  ;;  %v2984_v33 = vrot.slane %v8780_v1, 1  ;;  %v3283_v57 = vor.u32 %v3282_v44, %v3159_v23  ;;  %v7902_v1 = vld [vmem:[#allocation2 + $0x18] sm:$0xff]  ;;  %v7908_v23 = vpop.f32.mrf.mxu1  ;;  %4490 = vmatpush.bf16.msra.mxu2 %v5974_v31  ;;  %v7973_v31 = vld [vmem:[#allocation2 + $0x60] sm:$0xff] }
 0x2a7   : > { %v3852_v13 = vsel %vm1508_vm7, %v2946_v59, %v3675_v28  ;;  %v7883_v28 = vld [vmem:[#allocation2 + $0x40] sm:$0xff]  ;;  %v3176_v59 = vshll.u32 %v7851_v16, 16  ;;  %8829 = vst [vmem:[#allocation12_spill] sm:$0xff] %v7908_v23  ;;  %v8840_v23 = vshll.u32 %v7667_v15, 16 }
 0x2a8   : > { %4442 = vmatmul.bf16.gmra.mxu1 %v3852_v13  ;;  %v7873_v27 = vor.u32 %v2984_v33, %v8781_v3  ;;  %v3180_v33 = vshrl.u32 %v7883_v28, 16  ;;  %v3284_v3 = vrot.slane %v3169_v22, 1  ;;  %v3183_v42 = vshll.u32 %v7883_v28, 16 }
 0x2a9   : > { %v3178_v13 = vor.u32 %v3176_v59, %v3175_v53  ;;  %v2947_v22 = vsel %vm6302_vm3, 0, %v2879_v24 }
 0x2aa   : > { %8827 = vst [vmem:[#allocation10_spill] sm:$0xff] %v7873_v27  ;;  %v3182_v51 = vrot.slane %v3180_v33, 7  ;;  %v3856_v44 = vsel %vm1508_vm7, %v2947_v22, %v3677_v30  ;;  %v3285_v53 = vor.u32 %v3284_v3, %v3166_v45  ;;  %v2883_v45 = vrot.slane %v2881_v5, 7 }
 0x2ac   : > { %3760 = vrot.lane.b32.xlu0 %v3325_v58, %s6147_s18  ;;  %3716 = vrot.lane.b32.xlu2 %v3263_v55, %s6147_s18  ;;  %v3326_v58 = vsel %vm6576_vm6, %v3283_v57, 0  ;;  %v3264_v55 = vsel %vm6302_vm3, 0, %v3178_v13  ;;  %v3185_v7 = vor.u32 %v3183_v42, %v3182_v51  ;;  %v3327_v57 = vsel %vm6576_vm6, %v3285_v53, 0  ;;  %v7947_v53 = vld [vmem:[#allocation2 + $0x28] sm:$0xff] }
 0x2ad   : > { %3786 = vrot.lane.b32.xlu1 %v7881_v49, %s6147_s18  ;;  %v3190_v51 = vshll.u32 %v7904_v63, 16  ;;  %v2886_v22 = vor.u32 %v2884_v40, %v2883_v45  ;;  %v3197_v40 = vshll.u32 %v7926_v12, 16 }
 0x2ae   : > { %v3265_v13 = vsel %vm6302_vm3, 0, %v3185_v7  ;;  %v7935_v3 = vpop.f32.mrf.mxu1  ;;  %v7949_v7 = vld [vmem:[#allocation2 + $0x58] sm:$0xff] }
 0x2af   : > { %8830 = vst [vmem:[#allocation13_spill] sm:$0xff] %v7935_v3  ;;  %v3192_v30 = vor.u32 %v3190_v51, %v3189_v36  ;;  %v3290_v34 = vrot.slane %v3190_v51, 1  ;;  %v8832_v51 = vshrl.u32 %v7635_v39, 16  ;;  %v8839_v3 = vshrl.u32 %v7191_v56, 16 }
 0x2b1   : > { %v3266_v5 = vsel %vm6302_vm3, 0, %v3192_v30 }
 0x2b4   : > { %3762 = vrot.lane.b32.xlu0 %v3326_v58, %s6147_s18  ;;  %3718 = vrot.lane.b32.xlu2 %v3264_v55, %s6147_s18  ;;  %v7924_v58 = vld [vmem:[#allocation2 + $0x20] sm:$0xff]  ;;  %v3286_v55 = vrot.slane %v3176_v59, 1  ;;  %v3194_v59 = vshrl.u32 %v7926_v12, 16 }
 0x2b5   : > { %3788 = vrot.lane.b32.xlu1 %v7902_v1, %s6147_s18 }
 0x2b6   : > { %v3287_v24 = vor.u32 %v3286_v55, %v3173_v17  ;;  %v3288_v17 = vrot.slane %v3183_v42, 1  ;;  %v3196_v36 = vrot.slane %v3194_v59, 7  ;;  %v2948_v42 = vsel %vm6302_vm3, 0, %v2886_v22  ;;  %v7963_v30 = vpop.f32.mrf.mxu1 }
 0x2b7   : > { %8831 = vst [vmem:[#allocation14_spill] sm:$0xff] %v7963_v30 }
 0x2b8   : > { %4447 = vmatmul.bf16.gmra.mxu1 %v3856_v44  ;;  %v3328_v44 = vsel %vm6576_vm6, %v3287_v24, 0  ;;  %v3289_v55 = vor.u32 %v3288_v17, %v3180_v33  ;;  %v3199_v45 = vor.u32 %v3197_v40, %v3196_v36  ;;  %v8787_v24 = vshrl.u32 %v7949_v7, 16  ;;  %v5983_v17 = vld [vmem:[%s8748_s4 + $0x88] sm:$0xff] }
 0x2b9   : > { %v3204_v33 = vshll.u32 %v7949_v7, 16  ;;  %4578 = vmatpush.bf16.msra.mxu3 %v5983_v17 }
 0x2ba   : > { %v3329_v32 = vsel %vm6576_vm6, %v3289_v55, 0  ;;  %v3203_v22 = vrot.slane %v8787_v24, 7  ;;  %v8788_v55 = vshrl.u32 %v7973_v31, 16 }
 0x2bc   : > { %3764 = vrot.lane.b32.xlu0 %v3327_v57, %s6147_s18  ;;  %3720 = vrot.lane.b32.xlu2 %v3265_v13, %s6147_s18 }
 0x2bd   : > { %3790 = vrot.lane.b32.xlu1 %v7924_v58, %s6147_s18 }
 0x2be   : > { %v7990_v24 = vpop.f32.mrf.mxu1 }
 0x2bf   : > { %8834 = vst [vmem:[#allocation15_spill] sm:$0xff] %v7990_v24  ;;  %v8790_v24 = vshll.u32 %v7753_v52, 16 }
 0x2c4   : > { %3766 = vrot.lane.b32.xlu0 %v3328_v44, %s6147_s18  ;;  %3722 = vrot.lane.b32.xlu2 %v3266_v5, %s6147_s18  ;;  %v3267_v44 = vsel %vm6302_vm3, 0, %v3199_v45  ;;  %v7969_v5 = vld [vmem:[#allocation2 + $0x30] sm:$0xff]  ;;  %v8833_v45 = vshll.u32 %v7635_v39, 16  ;;  %v3211_v39 = vshll.u32 %v7973_v31, 16 }
 0x2c5   : > { %3792 = vrot.lane.b32.xlu1 %v7947_v53, %s6147_s18 }
 0x2c6   : > { %v3679_v57 = vpop.permute.xlu0 %3678  ;;  %v3296_v35 = vrot.slane %v3211_v39, 1 }
 0x2c7   : > { %v3860_v13 = vsel %vm1508_vm7, %v2948_v42, %v3679_v57  ;;  %v2890_v57 = vrot.slane %v8832_v51, 7  ;;  %v3291_v42 = vor.u32 %v3290_v34, %v3187_v10  ;;  %v3210_v34 = vrot.slane %v8788_v55, 7  ;;  %v8000_v10 = vld [vmem:[#allocation2 + $0x68] sm:$0xff]  ;;  %v5998_v55 = vld [vmem:[%s8748_s4 + $0x100] sm:$0xff] }
 0x2c8   : > { %4452 = vmatmul.bf16.gmra.mxu1 %v3860_v13  ;;  %v3206_v13 = vor.u32 %v3204_v33, %v3203_v22 }
 0x2c9   : > { %v3330_v27 = vsel %vm6576_vm6, %v3291_v42, 0  ;;  %v6075_v42 = vld [vmem:[#allocation2 + $0x80] sm:$0xff]  ;;  %4757 = vmatpush.bf16.msra.mxu1 %v5998_v55  ;;  %v8835_v55 = vshll.u32 %v7191_v56, 16  ;;  %v8059_v56 = vld [vmem:[#allocation2 + $0x78] sm:$0xff] }
 0x2ca   : > { %v3268_v30 = vsel %vm6302_vm3, 0, %v3206_v13  ;;  %v3213_v13 = vor.u32 %v3211_v39, %v3210_v34  ;;  %v3294_v34 = vrot.slane %v3204_v33, 1  ;;  %v3218_v33 = vshll.u32 %v8000_v10, 16 }
 0x2cc   : > { %3768 = vrot.lane.b32.xlu0 %v3329_v32, %s6147_s18  ;;  %3724 = vrot.lane.b32.xlu2 %v3267_v44, %s6147_s18  ;;  %v2893_v32 = vor.u32 %v8833_v45, %v2890_v57  ;;  %v3292_v44 = vrot.slane %v3197_v40, 1  ;;  %v5991_v40 = vld [vmem:[%s8748_s4 + $0xc8] sm:$0xff]  ;;  %v8789_v45 = vshrl.u32 %v8000_v10, 16 }
 0x2cd   : > { %3794 = vrot.lane.b32.xlu1 %v7969_v5, %s6147_s18  ;;  %4667 = vmatpush.bf16.msra.mxu0 %v5991_v40 }
 0x2ce   : > { %v7983_v36 = vpop.permute.xlu2 %3682  ;;  %v2949_v51 = vsel %vm6302_vm3, 0, %v2893_v32  ;;  %v3293_v57 = vor.u32 %v3292_v44, %v3194_v59  ;;  %v3269_v32 = vsel %vm6302_vm3, 0, %v3213_v13  ;;  %v8023_v44 = vld [vmem:[#allocation2 + $0x40] sm:$0xff]  ;;  %v3217_v40 = vrot.slane %v8789_v45, 7 }
 0x2d0   : > { %v3331_v59 = vsel %vm6576_vm6, %v3293_v57, 0  ;;  %v1314_v57 = vrot.slane %v8790_v24, 1  ;;  %v3220_v45 = vor.u32 %v3218_v33, %v3217_v40  ;;  %v8057_v40 = vld [vmem:[#allocation2 + $0x48] sm:$0xff] }
 0x2d4   : > { %3770 = vrot.lane.b32.xlu0 %v3330_v27, %s6147_s18  ;;  %3726 = vrot.lane.b32.xlu2 %v3268_v30, %s6147_s18 }
 0x2d5   : > { %3796 = vrot.lane.b32.xlu1 %v7996_v61, %s6147_s18 }
 0x2d6   : > { %v1475_v22 = vpop.permute.xlu2 %1474  ;;  %v3681_v17 = vpop.permute.xlu1 %3680 }
 0x2d7   : > { %v1683_v27 = vsel %vm1508_vm7, %v6075_v42, %v1475_v22  ;;  %v3864_v30 = vsel %vm1508_vm7, %v2949_v51, %v3681_v17  ;;  %v8027_v22 = vld [vmem:[#allocation2 + $0x70] sm:$0xff]  ;;  %v1246_v17 = vshrl.u32 %v7753_v52, 16  ;;  %v2954_v51 = vrot.slane %v8835_v55, 1  ;;  %v8036_v42 = vpop.f32.mrf.mxu1 }
 0x2d8   : > { %2346 = vmatmul.bf16.gmra.mxu2 %v1683_v27  ;;  %4457 = vmatmul.bf16.gmra.mxu1 %v3864_v30  ;;  %8836 = vst [vmem:[#allocation16_spill] sm:$0xff] %v8036_v42  ;;  %v8837_v27 = vshrl.u32 %v7667_v15, 16  ;;  %v3222_v55 = vshrl.u32 %v8027_v22, 16 }
 0x2d9   : > { %v1315_v13 = vor.u32 %v1314_v57, %v1246_v17  ;;  %v2955_v24 = vor.u32 %v2954_v51, %v8839_v3 }
 0x2da   : > { %v2897_v30 = vrot.slane %v8837_v27, 7  ;;  %v3224_v27 = vrot.slane %v3222_v55, 7 }
 0x2db   : > { %v1347_v42 = vsel %vm6576_vm6, %v1315_v13, 0  ;;  %v3002_v3 = vsel %vm6576_vm6, %v2955_v24, 0 }
 0x2dc   : > { %3772 = vrot.lane.b32.xlu0 %v3331_v59, %s6147_s18  ;;  %3728 = vrot.lane.b32.xlu2 %v3269_v32, %s6147_s18  ;;  %v8838_v59 = vshrl.u32 %v7949_v7, 16  ;;  %v2900_v47 = vor.u32 %v8840_v23, %v2897_v30  ;;  %v3225_v23 = vshll.u32 %v8027_v22, 16 }
 0x2dd   : > { %3798 = vrot.lane.b32.xlu1 %v8023_v44, %s6147_s18  ;;  %5475 = vmatmul.msk.bf16.gmra.mxu0 %vm1508_vm7, %v1347_v42 }
 0x2de   : > { %v3295_v32 = vor.u32 %v3294_v34, %v8838_v59  ;;  %v3270_v34 = vsel %vm6302_vm3, 0, %v3220_v45  ;;  %v3707_v51 = vpop.permute.xlu2 %3706  ;;  %v2950_v39 = vsel %vm6302_vm3, 0, %v2900_v47  ;;  %v8841_v45 = vshrl.u32 %v7973_v31, 16  ;;  %v8082_v47 = vld [vmem:[#allocation2 + $0x50] sm:$0xff] }
 0x2df   : > { %v3884_v24 = vsel %vm1508_vm7, %v3002_v3, %v3707_v51  ;;  %v3868_v30 = vsel %vm1508_vm7, %v2950_v39, %v7983_v36  ;;  %v3227_v13 = vor.u32 %v3225_v23, %v3224_v27  ;;  %v3229_v59 = vshrl.u32 %v8059_v56, 16  ;;  %v5982_v36 = vld [vmem:[%s8748_s4 + $0x80] sm:$0xff] }
 0x2e0   : > { %v3332_v57 = vsel %vm6576_vm6, %v3295_v32, 0  ;;  %v3297_v42 = vor.u32 %v3296_v35, %v8841_v45  ;;  %v3232_v27 = vshll.u32 %v8059_v56, 16  ;;  %v8842_v3 = vshrl.u32 %v7729_v29, 16  ;;  %4579 = vmatpush.bf16.msra.mxu3 %v5982_v36 }
 0x2e1   : > { %v3271_v22 = vsel %vm6302_vm3, 0, %v3227_v13  ;;  %v3231_v35 = vrot.slane %v3229_v59, 7  ;;  %v3300_v56 = vrot.slane %v3225_v23, 1  ;;  %v1248_v36 = vrot.slane %v1246_v17, 7 }
 0x2e2   : > { %v3333_v32 = vsel %vm6576_vm6, %v3297_v42, 0  ;;  %v2904_v51 = vrot.slane %v8842_v3, 7  ;;  %v8844_v42 = vshll.u32 %v7729_v29, 16  ;;  %v3003_v23 = vsel %vm6576_vm6, %v7308_v60, 0 }
 0x2e3   : > { %v3234_v45 = vor.u32 %v3232_v27, %v3231_v35 }
 0x2e4   : > { %3774 = vrot.lane.b32.xlu0 %v3332_v57, %s6147_s18  ;;  %3730 = vrot.lane.b32.xlu2 %v3270_v34, %s6147_s18  ;;  %v3298_v57 = vrot.slane %v3218_v33, 1  ;;  %v8843_v33 = vshrl.u32 %v8000_v10, 16 }
 0x2e5   : > { %3800 = vrot.lane.b32.xlu1 %v8057_v40, %s6147_s18  ;;  %v8067_v15 = vpop.f32.mrf.mxu1  ;;  %v3272_v13 = vsel %vm6302_vm3, 0, %v3234_v45 }
 0x2e6   : > { %v3299_v39 = vor.u32 %v3298_v57, %v8843_v33  ;;  %v5990_v57 = vld [vmem:[%s8748_s4 + $0xc0] sm:$0xff]  ;;  %v3301_v33 = vor.u32 %v3300_v56, %v3222_v55 }
 0x2e7   : > { %4668 = vmatpush.bf16.msra.mxu0 %v5990_v57  ;;  %v8140_v57 = vld [vmem:[#allocation2 + $0x68] sm:$0xff] }
 0x2e8   : > { %4462 = vmatmul.bf16.gmra.mxu1 %v3868_v30  ;;  %4491 = vmatmul.bf16.vlgmr.msra.gmra.mxu2 %v3884_v24  ;;  %v2907_v24 = vor.u32 %v8844_v42, %v2904_v51  ;;  %v3334_v30 = vsel %vm6576_vm6, %v3299_v39, 0  ;;  %v8845_v39 = vshll.u32 %v7753_v52, 16  ;;  %v3335_v42 = vsel %vm6576_vm6, %v3301_v33, 0 }
 0x2ea   : > { %v2951_v3 = vsel %vm6302_vm3, 0, %v2907_v24  ;;  %v1251_v45 = vor.u32 %v8845_v39, %v1248_v36  ;;  %v3302_v24 = vrot.slane %v3232_v27, 1 }
 0x2ec   : > { %3776 = vrot.lane.b32.xlu0 %v3333_v32, %s6147_s18  ;;  %3732 = vrot.lane.b32.xlu2 %v3271_v22, %s6147_s18  ;;  %v8104_v32 = vld [vmem:[#allocation2 + $0x58] sm:$0xff]  ;;  %v3709_v22 = vpop.permute.xlu2 %3708  ;;  %v1283_v60 = vsel %vm6302_vm3, 0, %v1251_v45  ;;  %v3303_v56 = vor.u32 %v3302_v24, %v3229_v59  ;;  %v3004_v59 = vsel %vm6576_vm6, %v7352_v25, 0  ;;  %v8156_v45 = vld [vmem:[#allocation2 + $0x70] sm:$0xff] }
 0x2ed   : > { %3802 = vrot.lane.b32.xlu1 %v8082_v47, %s6147_s18  ;;  %v8091_v34 = vpop.f32.mrf.mxu1  ;;  %v3888_v17 = vsel %vm1508_vm7, %v3003_v23, %v3709_v22  ;;  %v8846_v22 = vshrl.u32 %v7784_v18, 16 }
 0x2ee   : > { %v3336_v27 = vsel %vm6576_vm6, %v3303_v56, 0  ;;  %v8167_v56 = vld [vmem:[#allocation2 + $0x78] sm:$0xff] }
 0x2ef   : > { %v2911_v36 = vrot.slane %v8846_v22, 7  ;;  %v8849_v22 = vshll.u32 %v7843_v62, 16 }
 0x2f4   : > { %3778 = vrot.lane.b32.xlu0 %v3334_v30, %s6147_s18  ;;  %3734 = vrot.lane.b32.xlu2 %v3272_v13, %s6147_s18  ;;  %v8126_v30 = vld [vmem:[#allocation2 + $0x60] sm:$0xff]  ;;  %v3711_v23 = vpop.permute.xlu2 %3710 }
 0x2f5   : > { %3804 = vrot.lane.b32.xlu1 %v8104_v32, %s6147_s18  ;;  %v8110_v29 = vpop.f32.mrf.mxu1  ;;  %v3892_v39 = vsel %vm1508_vm7, %v3004_v59, %v3711_v23 }
 0x2f6   : > { %v3685_v35 = vpop.permute.xlu0 %3684 }
 0x2f7   : > { %v3872_v51 = vsel %vm1508_vm7, %v2951_v3, %v3685_v35  ;;  %v8847_v35 = vshll.u32 %v7784_v18, 16 }
 0x2f8   : > { %4467 = vmatmul.bf16.gmra.mxu1 %v3872_v51  ;;  %4496 = vmatmul.bf16.gmra.mxu2 %v3888_v17 }
 0x2f9   : > { %v2914_v3 = vor.u32 %v8847_v35, %v2911_v36 }
 0x2fb   : > { %v2952_v33 = vsel %vm6302_vm3, 0, %v2914_v3 }
 0x2fc   : > { %3780 = vrot.lane.b32.xlu0 %v3335_v42, %s6147_s18 }
 0x2fd   : > { %3806 = vrot.lane.b32.xlu1 %v8126_v30, %s6147_s18  ;;  %v8133_v55 = vpop.f32.mrf.mxu1 }
 0x2fe   : > { %v1507_v13 = vpop.permute.xlu0 %1506 }
 0x2ff   : > { %v1747_v52 = vsel %vm1508_vm7, %v1283_v60, %v1507_v13  ;;  %v8848_v60 = vshrl.u32 %v7843_v62, 16 }
 0x300   : > { %2435 = vmatmul.bf16.gmra.mxu3 %v1747_v52  ;;  %v3451_v52 = vshrl.u32 %v7881_v49, 16 }
 0x301   : > { %v2918_v13 = vrot.slane %v8848_v60, 7 }
 0x303   : > { %v2921_v36 = vor.u32 %v8849_v22, %v2918_v13 }
 0x304   : > { %3782 = vrot.lane.b32.xlu0 %v3336_v27, %s6147_s18  ;;  %v3713_v27 = vpop.permute.xlu2 %3712 }
 0x305   : > { %3808 = vrot.lane.b32.xlu1 %v8140_v57, %s6147_s18  ;;  %v8147_v51 = vpop.f32.mrf.mxu1  ;;  %v2953_v23 = vsel %vm6302_vm3, 0, %v2921_v36  ;;  %v3458_v36 = vshrl.u32 %v7902_v1, 16 }
 0x306   : > { %v3755_v42 = vpop.permute.xlu0 %3754 }
 0x307   : > { %v3687_v17 = vpop.permute.xlu1 %3686  ;;  %v3947_v25 = vsel %vm1508_vm7, %v7671_v50, %v3755_v42  ;;  %v3005_v50 = vsel %vm6576_vm6, %v7401_v0, 0 }
 0x308   : > { %v3876_v18 = vsel %vm1508_vm7, %v2952_v33, %v3687_v17  ;;  %4501 = vmatmul.bf16.gmra.mxu2 %v3892_v39  ;;  %v3896_v59 = vsel %vm1508_vm7, %v3005_v50, %v3713_v27  ;;  %v3453_v17 = vrot.slane %v3451_v52, 7  ;;  %v3454_v33 = vshll.u32 %v7881_v49, 16 }
 0x309   : > { %4472 = vmatmul.bf16.gmra.mxu1 %v3876_v18 }
 0x30a   : > { %v3456_v39 = vor.u32 %v3454_v33, %v3453_v17  ;;  %v3594_v13 = vrot.slane %v3454_v33, 1  ;;  %v3461_v17 = vshll.u32 %v7902_v1, 16 }
 0x30c   : > { %v3578_v0 = vsel %vm6302_vm3, 0, %v3456_v39  ;;  %v3715_v27 = vpop.permute.xlu2 %3714  ;;  %v3595_v49 = vor.u32 %v3594_v13, %v3451_v52 }
 0x30d   : > { %3810 = vrot.lane.b32.xlu1 %v8156_v45, %s6147_s18  ;;  %v8160_v24 = vpop.f32.mrf.mxu1 }
 0x30e   : > { %v3757_v18 = vpop.permute.xlu0 %3756 }
 0x30f   : > { %v3950_v60 = vsel %vm1508_vm7, %v7711_v14, %v3757_v18  ;;  %v3642_v14 = vsel %vm6576_vm6, %v3595_v49, 0 }
 0x310   : > { %4580 = vmatmul.bf16.vlgmr.msra.gmra.mxu3 %v3947_v25 }
 0x314   : > { %v3717_v13 = vpop.permute.xlu2 %3716 }
 0x315   : > { %3812 = vrot.lane.b32.xlu1 %v8167_v56, %s6147_s18  ;;  %v8173_v35 = vpop.f32.mrf.mxu1 }
 0x316   : > { %v3759_v33 = vpop.permute.xlu0 %3758 }
 0x317   : > { %v3689_v3 = vpop.permute.xlu1 %3688  ;;  %v3953_v18 = vsel %vm1508_vm7, %v7733_v9, %v3759_v33 }
 0x318   : > { %v3880_v62 = vsel %vm1508_vm7, %v2953_v23, %v3689_v3  ;;  %4506 = vmatmul.bf16.gmra.mxu2 %v3896_v59  ;;  %v3006_v3 = vsel %vm6576_vm6, %v7445_v54, 0  ;;  %v3460_v59 = vrot.slane %v3458_v36, 7 }
 0x319   : > { %4477 = vmatmul.bf16.gmra.mxu1 %v3880_v62  ;;  %v3900_v23 = vsel %vm1508_vm7, %v3006_v3, %v3715_v27  ;;  %v3007_v27 = vsel %vm6576_vm6, %v7472_v38, 0 }
 0x31a   : > { %v3463_v62 = vor.u32 %v3461_v17, %v3460_v59  ;;  %v3904_v9 = vsel %vm1508_vm7, %v3007_v27, %v3717_v13  ;;  %v3475_v27 = vshll.u32 %v7947_v53, 16 }
 0x31c   : > { %v3579_v54 = vsel %vm6302_vm3, 0, %v3463_v62 }
 0x31d   : > { %v8183_v42 = vpop.f32.mrf.mxu1 }
 0x31f   : > { %v3787_v25 = vpop.permute.xlu1 %3786 }
 0x320   : > { %v3996_v22 = vsel %vm1508_vm7, %v3578_v0, %v3787_v25  ;;  %4585 = vmatmul.bf16.gmra.mxu3 %v3950_v60  ;;  %v3596_v25 = vrot.slane %v3461_v17, 1  ;;  %v3465_v60 = vshrl.u32 %v7924_v58, 16 }
 0x321   : > { %4669 = vmatmul.bf16.vlgmr.msra.gmra.mxu0 %v3996_v22 }
 0x322   : > { %v3597_v1 = vor.u32 %v3596_v25, %v3458_v36  ;;  %v3467_v49 = vrot.slane %v3465_v60, 7  ;;  %v3008_v25 = vsel %vm6576_vm6, %v7500_v37, 0 }
 0x324   : > { %v3643_v3 = vsel %vm6576_vm6, %v3597_v1, 0 }
 0x325   : > { %v8191_v50 = vpop.f32.mrf.mxu1 }
 0x327   : > { %v3789_v52 = vpop.permute.xlu1 %3788 }
 0x328   : > { %4511 = vmatmul.bf16.gmra.mxu2 %v3900_v23  ;;  %v4000_v0 = vsel %vm1508_vm7, %v3579_v54, %v3789_v52  ;;  %v3468_v23 = vshll.u32 %v7924_v58, 16  ;;  %v3719_v54 = vpop.permute.xlu2 %3718 }
 0x329   : > { %5812 = vmatmul.msk.bf16.vlgmr.msra.gmra.mxu1 %vm1508_vm7, %v3642_v14  ;;  %v3761_v14 = vpop.permute.xlu0 %3760 }
 0x32a   : > { %v3470_v59 = vor.u32 %v3468_v23, %v3467_v49  ;;  %v3956_v62 = vsel %vm1508_vm7, %v7768_v2, %v3761_v14  ;;  %v3598_v52 = vrot.slane %v3468_v23, 1  ;;  %v3908_v2 = vsel %vm1508_vm7, %v3008_v25, %v3719_v54 }
 0x32b   : > { %v3600_v14 = vrot.slane %v3475_v27, 1 }
 0x32c   : > { %v3580_v38 = vsel %vm6302_vm3, 0, %v3470_v59  ;;  %v3599_v58 = vor.u32 %v3598_v52, %v3465_v60 }
 0x32d   : > { %v8201_v39 = vpop.f32.mrf.mxu1 }
 0x32e   : > { %v3644_v1 = vsel %vm6576_vm6, %v3599_v58, 0  ;;  %v3482_v58 = vshll.u32 %v7969_v5, 16 }
 0x32f   : > { %v3791_v36 = vpop.permute.xlu1 %3790 }
 0x330   : > { %4590 = vmatmul.bf16.gmra.mxu3 %v3953_v18  ;;  %v4004_v33 = vsel %vm1508_vm7, %v3580_v38, %v3791_v36  ;;  %v3472_v18 = vshrl.u32 %v7947_v53, 16  ;;  %v3479_v36 = vshrl.u32 %v7969_v5, 16 }
 0x331   : > { %4674 = vmatmul.bf16.gmra.mxu0 %v4000_v0  ;;  %v3763_v49 = vpop.permute.xlu0 %3762 }
 0x332   : > { %v3474_v13 = vrot.slane %v3472_v18, 7  ;;  %v3959_v23 = vsel %vm1508_vm7, %v7796_v21, %v3763_v49  ;;  %v3601_v53 = vor.u32 %v3600_v14, %v3472_v18  ;;  %v3481_v52 = vrot.slane %v3479_v36, 7 }
 0x333   : > { %v3602_v49 = vrot.slane %v3482_v58, 1 }
 0x334   : > { %v3645_v54 = vsel %vm6576_vm6, %v3601_v53, 0 }
 0x335   : > { %v8209_v22 = vpop.f32.mrf.mxu1 }
 0x337   : > { %v3793_v60 = vpop.permute.xlu1 %3792 }
 0x338   : > { %4516 = vmatmul.bf16.gmra.mxu2 %v3904_v9  ;;  %v3477_v9 = vor.u32 %v3475_v27, %v3474_v13 }
 0x339   : > { %5813 = vmatmul.msk.bf16.gmra.mxu1 %vm1508_vm7, %v3643_v3  ;;  %v3765_v18 = vpop.permute.xlu0 %3764 }
 0x33a   : > { %v3581_v37 = vsel %vm6302_vm3, 0, %v3477_v9 }
 0x33b   : > { %v4008_v59 = vsel %vm1508_vm7, %v3581_v37, %v3793_v60  ;;  %v3486_v60 = vshrl.u32 %v7996_v61, 16  ;;  %v3603_v37 = vor.u32 %v3602_v49, %v3479_v36 }
 0x33d   : > { %v8219_v17 = vpop.f32.mrf.mxu1  ;;  %v3646_v53 = vsel %vm6576_vm6, %v3603_v37, 0 }
 0x33f   : > { %v3795_v13 = vpop.permute.xlu1 %3794 }
 0x340   : > { %4595 = vmatmul.bf16.gmra.mxu3 %v3956_v62  ;;  %v3721_v62 = vpop.permute.xlu2 %3720 }
 0x341   : > { %4679 = vmatmul.bf16.gmra.mxu0 %v4004_v33  ;;  %v3009_v33 = vsel %vm6576_vm6, %v7536_v26, 0  ;;  %v3962_v26 = vsel %vm1508_vm7, %v7826_v48, %v3765_v18  ;;  %v3010_v48 = vsel %vm6576_vm6, %v7567_v46, 0 }
 0x342   : > { %v3912_v21 = vsel %vm1508_vm7, %v3009_v33, %v3721_v62  ;;  %v3488_v62 = vrot.slane %v3486_v60, 7  ;;  %v3489_v33 = vshll.u32 %v7996_v61, 16  ;;  %v3493_v61 = vshrl.u32 %v8023_v44, 16 }
 0x344   : > { %v3491_v36 = vor.u32 %v3489_v33, %v3488_v62  ;;  %v3495_v37 = vrot.slane %v3493_v61, 7 }
 0x345   : > { %v8227_v0 = vpop.f32.mrf.mxu1 }
 0x348   : > { %4521 = vmatmul.bf16.gmra.mxu2 %v3908_v2  ;;  %v3484_v2 = vor.u32 %v3482_v58, %v3481_v52  ;;  %v3767_v52 = vpop.permute.xlu0 %3766 }
 0x349   : > { %5814 = vmatmul.msk.bf16.gmra.mxu1 %vm1508_vm7, %v3644_v1  ;;  %v3965_v46 = vsel %vm1508_vm7, %v7851_v16, %v3767_v52  ;;  %v3011_v16 = vsel %vm6576_vm6, %v7598_v4, 0 }
 0x34a   : > { %v3582_v27 = vsel %vm6302_vm3, 0, %v3484_v2  ;;  %v3583_v2 = vsel %vm6302_vm3, 0, %v3491_v36 }
 0x34b   : > { %v4012_v9 = vsel %vm1508_vm7, %v3582_v27, %v3795_v13  ;;  %v3604_v13 = vrot.slane %v3489_v33, 1 }
 0x34d   : > { %v8237_v3 = vpop.f32.mrf.mxu1 }
 0x350   : > { %4600 = vmatmul.bf16.gmra.mxu3 %v3959_v23  ;;  %v3723_v23 = vpop.permute.xlu2 %3722 }
 0x351   : > { %4684 = vmatmul.bf16.gmra.mxu0 %v4008_v59  ;;  %v3916_v14 = vsel %vm1508_vm7, %v3010_v48, %v3723_v23 }
 0x355   : > { %v8245_v38 = vpop.f32.mrf.mxu1 }
 0x358   : > { %4526 = vmatmul.bf16.gmra.mxu2 %v3912_v21  ;;  %v3725_v27 = vpop.permute.xlu2 %3724 }
 0x359   : > { %5815 = vmatmul.msk.bf16.gmra.mxu1 %vm1508_vm7, %v3645_v54  ;;  %v3797_v54 = vpop.permute.xlu1 %3796  ;;  %v3920_v23 = vsel %vm1508_vm7, %v3011_v16, %v3725_v27 }
 0x35a   : > { %v4016_v18 = vsel %vm1508_vm7, %v3583_v2, %v3797_v54  ;;  %v8850_v2 = vld [vmem:[#allocation7_spill] sm:$0xff] }
 0x35b   : > { %v2347_v25 = vpop.f32.mrf.mxu2 }
 0x35d   : > { %v8255_v1 = vpop.f32.mrf.mxu1 }
 0x360   : > { %4605 = vmatmul.bf16.gmra.mxu3 %v3962_v26 }
 0x361   : > { %4689 = vmatmul.bf16.gmra.mxu0 %v4012_v9  ;;  %v3605_v9 = vor.u32 %v3604_v13, %v3486_v60  ;;  %v3799_v33 = vpop.permute.xlu1 %3798  ;;  %v2525_v13 = vpop.f32.mrf.mxu0 }
 0x363   : > { %v8263_v5 = vpop.f32.mrf.mxu2  ;;  %v3647_v48 = vsel %vm6576_vm6, %v3605_v9, 0  ;;  %v3727_v9 = vpop.permute.xlu2 %3726 }
 0x365   : > { %v8265_v59 = vpop.f32.mrf.mxu1 }
 0x368   : > { %4531 = vmatmul.bf16.gmra.mxu2 %v3916_v14  ;;  %v3496_v14 = vshll.u32 %v8023_v44, 16  ;;  %v2348_v44 = vadd.f32 %v2347_v25, %v8850_v2  ;;  %v6076_v25 = vld [vmem:[%s8746_s2] ss:$0 sm:$0xff] }
 0x369   : > { %5816 = vmatmul.msk.bf16.gmra.mxu1 %vm1508_vm7, %v3646_v53  ;;  %v3769_v53 = vpop.permute.xlu0 %3768 }
 0x36a   : > { %v3498_v60 = vor.u32 %v3496_v14, %v3495_v37  ;;  %v3968_v4 = vsel %vm1508_vm7, %v7883_v28, %v3769_v53 }
 0x36b   : > { %v8275_v21 = vpop.f32.mrf.mxu2 }
 0x36c   : > { %v3584_v52 = vsel %vm6302_vm3, 0, %v3498_v60  ;;  %v3012_v60 = vsel %vm6576_vm6, %v7621_v20, 0  ;;  %v6077_v20 = vld [vmem:[%s8747_s3] ss:$0 sm:$0xff] }
 0x36d   : > { %v8277_v58 = vpop.f32.mrf.mxu1  ;;  %v4020_v54 = vsel %vm1508_vm7, %v3584_v52, %v3799_v33  ;;  %v8851_v52 = vld [vmem:[#allocation8_spill] sm:$0xff] }
 0x370   : > { %4610 = vmatmul.bf16.gmra.mxu3 %v3965_v46  ;;  %v3606_v46 = vrot.slane %v3496_v14, 1  ;;  %v3924_v14 = vsel %vm1508_vm7, %v3012_v60, %v3727_v9 }
 0x371   : > { %4694 = vmatmul.bf16.gmra.mxu0 %v4016_v18  ;;  %v3500_v18 = vshrl.u32 %v8057_v40, 16 }
 0x373   : > { %v8285_v26 = vpop.f32.mrf.mxu2  ;;  %v3502_v53 = vrot.slane %v3500_v18, 7 }
 0x375   : > { %v8287_v49 = vpop.f32.mrf.mxu1 }
 0x378   : > { %4536 = vmatmul.bf16.gmra.mxu2 %v3920_v23  ;;  %v3607_v23 = vor.u32 %v3606_v46, %v3493_v61 }
 0x379   : > { %5817 = vmatmul.msk.bf16.gmra.mxu1 %vm1508_vm7, %v3647_v48 }
 0x37a   : > { %v3648_v61 = vsel %vm6576_vm6, %v3607_v23, 0 }
 0x37b   : > { %v8297_v62 = vpop.f32.mrf.mxu2 }
 0x37d   : > { %v8299_v36 = vpop.f32.mrf.mxu1 }
 0x380   : > { %4615 = vmatmul.bf16.gmra.mxu3 %v3968_v4  ;;  %v3503_v4 = vshll.u32 %v8057_v40, 16 }
 0x381   : > { %4699 = vmatmul.bf16.gmra.mxu0 %v4020_v54  ;;  %v2350_v54 = vadd.f32 %v8263_v5, %v8851_v52 }
 0x382   : > { %v3608_v52 = vrot.slane %v3503_v4, 1 }
 0x383   : > { %v2436_v27 = vpop.f32.mrf.mxu3  ;;  %v8308_v37 = vpop.f32.mrf.mxu2 }
 0x384   : > { %v2437_v16 = vadd.f32 %v2436_v27, %v2348_v44  ;;  %v3505_v44 = vor.u32 %v3503_v4, %v3502_v53 }
 0x386   : > { %v2526_v28 = vadd.f32 %v2525_v13, %v2437_v16  ;;  %v8310_v48 = vpop.f32.mrf.mxu1  ;;  %v3771_v13 = vpop.permute.xlu0 %3770 }
 0x387   : > { %v3801_v16 = vpop.permute.xlu1 %3800  ;;  %v3971_v5 = vsel %vm1508_vm7, %v7904_v63, %v3771_v13 }
 0x388   : > { %v2564_v33 = vmul.f32 %v6076_v25, %v2526_v28  ;;  %4541 = vmatmul.bf16.gmra.mxu2 %v3924_v14  ;;  %v2527_v28 = vpop.f32.mrf.mxu0 }
 0x389   : > { %5818 = vmatmul.msk.bf16.gmra.mxu1 %vm1508_vm7, %v3648_v61  ;;  %v3585_v61 = vsel %vm6302_vm3, 0, %v3505_v44  ;;  %v3013_v44 = vsel %vm6576_vm6, %v7657_v41, 0 }
 0x38a   : > { %v2600_v46 = vadd.f32 %v6077_v20, %v2564_v33  ;;  %v4024_v33 = vsel %vm1508_vm7, %v3585_v61, %v3801_v16 }
 0x38b   : > { %v2438_v2 = vpop.f32.mrf.mxu3  ;;  %v8330_v40 = vpop.f32.mrf.mxu2 }
 0x38c   : > { %v2632_v27 = vmax.f32 %v2600_v46, 0.0  ;;  %v2439_v9 = vadd.f32 %v2438_v2, %v2350_v54  ;;  %v3507_v46 = vshrl.u32 %v8082_v47, 16 }
 0x38e   : > { %v2664_v23 = vpack.c.bf16 %v2632_v27, %v2632_v27  ;;  %v2528_v60 = vadd.f32 %v2527_v28, %v2439_v9  ;;  %v8328_v14 = vpop.f32.mrf.mxu1  ;;  %v3729_v27 = vpop.permute.xlu2 %3728  ;;  %v3609_v28 = vor.u32 %v3608_v52, %v3500_v18  ;;  %v3509_v13 = vrot.slane %v3507_v46, 7 }
 0x38f   : > { %8852 = vst [vmem:[#allocation7_spill] sm:$0xff] %v8328_v14  ;;  %v3510_v18 = vshll.u32 %v8082_v47, 16 }
 0x390   : > { %2696 = vst.msk [vmem:[#allocation2 + $0x80] sm:$0xf] %vm278_vm0, %v2664_v23  ;;  %v2565_v53 = vmul.f32 %v6076_v25, %v2528_v60  ;;  %4620 = vmatmul.bf16.gmra.mxu3 %v3971_v5  ;;  %v3928_v25 = vsel %vm1508_vm7, %v3013_v44, %v3729_v27  ;;  %v3649_v4 = vsel %vm6576_vm6, %v3609_v28, 0  ;;  %v3773_v60 = vpop.permute.xlu0 %3772  ;;  %v3803_v5 = vpop.permute.xlu1 %3802  ;;  %v4493_v27 = vadd.f32 %v8275_v21, %v7815_v19  ;;  %v8375_v21 = vld [vmem:[%s8749_s5] ss:$0 sm:$0xff] }
 0x391   : > { %4704 = vmatmul.bf16.gmra.mxu0 %v4024_v33  ;;  %v3512_v23 = vor.u32 %v3510_v18, %v3509_v13  ;;  %v8791_v28 = vshrl.u32 %v8104_v32, 16 }
 0x392   : > { %v2601_v54 = vadd.f32 %v6077_v20, %v2565_v53 }
 0x393   : > { %v4581_v2 = vpop.f32.mrf.mxu3  ;;  %v8348_v20 = vpop.f32.mrf.mxu2  ;;  %v3586_v53 = vsel %vm6302_vm3, 0, %v3512_v23 }
 0x394   : > { %v2633_v9 = vmax.f32 %v2601_v54, 0.0  ;;  %v4028_v47 = vsel %vm1508_vm7, %v3586_v53, %v3803_v5  ;;  %v3610_v54 = vrot.slane %v3510_v18, 1  ;;  %v4582_v44 = vadd.f32 %v4581_v2, %v4493_v27 }
 0x395   : > { %v3014_v2 = vsel %vm6576_vm6, %v7709_v8, 0  ;;  %v3516_v27 = vrot.slane %v8791_v28, 7  ;;  %v8855_v28 = vld [vmem:[#allocation11_spill] sm:$0xff] }
 0x396   : > { %v2665_v14 = vpack.c.bf16 %v2633_v9, %v2633_v9  ;;  %v8339_v63 = vpop.f32.mrf.mxu1  ;;  %v3731_v18 = vpop.permute.xlu2 %3730 }
 0x397   : > { %8853 = vst [vmem:[#allocation8_spill] sm:$0xff] %v8339_v63  ;;  %v4498_v63 = vadd.f32 %v8297_v62, %v8855_v28 }
 0x398   : > { %2697 = vst.msk [vmem:[#allocation2 + $0x84] sm:$0xf] %vm278_vm0, %v2665_v14  ;;  %4546 = vmatmul.bf16.gmra.mxu2 %v3928_v25  ;;  %v3974_v14 = vsel %vm1508_vm7, %v7926_v12, %v3773_v60  ;;  %v3611_v60 = vor.u32 %v3610_v54, %v3507_v46  ;;  %v3932_v54 = vsel %vm1508_vm7, %v3014_v2, %v3731_v18  ;;  %v4911_v18 = vld [vmem:[%s6247_s17] sm:$0xff] }
 0x399   : > { %5819 = vmatmul.msk.bf16.gmra.mxu1 %vm1508_vm7, %v3649_v4 }
 0x39b   : > { %v4583_v16 = vpop.f32.mrf.mxu3  ;;  %v8370_v25 = vpop.f32.mrf.mxu2 }
 0x39e   : > { %v8352_v41 = vpop.f32.mrf.mxu1  ;;  %v4670_v61 = vpop.f32.mrf.mxu0 }
 0x39f   : > { %8854 = vst [vmem:[#allocation17_spill] sm:$0xff] %v8352_v41  ;;  %v8358_v33 = vld [vmem:[#allocation2 + $0x80] sm:$0xff]  ;;  %v4671_v19 = vadd.f32 %v4670_v61, %v4582_v44  ;;  %v8382_v41 = vld [vmem:[#allocation2 + $0x88] sm:$0xff]  ;;  %v4495_v44 = vadd.f32 %v8285_v26, %v7841_v11  ;;  %v3775_v11 = vpop.permute.xlu0 %3774  ;;  %v3805_v26 = vpop.permute.xlu1 %3804 }
 0x3a0   : > { %v8360_v52 = vld [vmem:[#allocation2 + $0x80] sm:$0xff]  ;;  %4625 = vmatmul.bf16.gmra.mxu3 %v3974_v14  ;;  %3814 = vrot.lane.b32.xlu1 %v8358_v33, %s6147_s18 }
 0x3a1   : > { %4709 = vmatmul.bf16.gmra.mxu0 %v4028_v47  ;;  %v3236_v12 = vshrl.u32 %v8360_v52, 16  ;;  %v3239_v9 = vshll.u32 %v8360_v52, 16  ;;  %v8387_v61 = vld [vmem:[%s8750_s6] ss:$0 sm:$0xff] }
 0x3a3   : > { %v4586_v13 = vpop.f32.mrf.mxu3  ;;  %v3304_v4 = vrot.slane %v3239_v9, 1  ;;  %v3238_v23 = vrot.slane %v3236_v12, 7 }
 0x3a5   : > { %v3305_v5 = vor.u32 %v3304_v4, %v3236_v12  ;;  %v3241_v14 = vor.u32 %v3239_v9, %v3238_v23  ;;  %v3650_v9 = vsel %vm6576_vm6, %v3611_v60, 0  ;;  %v3517_v23 = vshll.u32 %v8104_v32, 16 }
 0x3a6   : > { %v4672_v53 = vpop.f32.mrf.mxu0  ;;  %v4759_v47 = vpop.f32.mrf.mxu1 }
 0x3a7   : > { %v4760_v46 = vadd.f32 %v4759_v47, %v4671_v19  ;;  %v3337_v12 = vsel %vm6576_vm6, %v3305_v5, 0  ;;  %v3273_v8 = vsel %vm6302_vm3, 0, %v3241_v14  ;;  %v4584_v19 = vadd.f32 %v4583_v16, %v4495_v44  ;;  %v8410_v47 = vpop.f32.mrf.mxu2 }
 0x3a8   : > { %4551 = vmatmul.bf16.gmra.mxu2 %v3932_v54  ;;  %3784 = vrot.lane.b32.xlu0 %v3337_v12, %s6147_s18  ;;  %v3519_v14 = vor.u32 %v3517_v23, %v3516_v27  ;;  %v3977_v16 = vsel %vm1508_vm7, %v7949_v7, %v3775_v11  ;;  %v3521_v7 = vshrl.u32 %v8126_v30, 16  ;;  %v8856_v11 = vshrl.u32 %v8104_v32, 16 }
 0x3a9   : > { %v4843_v4 = vmul.f32 %v8375_v21, %v4760_v46  ;;  %5820 = vmatmul.msk.bf16.gmra.mxu1 %vm1508_vm7, %v3650_v9  ;;  %3736 = vrot.lane.b32.xlu2 %v3273_v8, %s6147_s18  ;;  %v4673_v2 = vadd.f32 %v4672_v53, %v4584_v19  ;;  %v4587_v19 = vadd.f32 %v4586_v13, %v4498_v63 }
 0x3aa   : > { %3816 = vrot.lane.b32.xlu1 %v8382_v41, %s6147_s18  ;;  %v3587_v44 = vsel %vm6302_vm3, 0, %v3519_v14  ;;  %s8419_s18 = scalar_lea.vmem [#allocation3], %s5121_s29  ;;  %s6096_s29 = sshra.s32 %s5055_s22, 4  ;;  %s6097_s29 = int_to_ptr.hbm [resolvable:$true] %s6096_s29 }
 0x3ab   : > { %v4879_v60 = vadd.f32 %v8387_v61, %v4843_v4  ;;  %v4588_v5 = vpop.f32.mrf.mxu3  ;;  %v4032_v27 = vsel %vm1508_vm7, %v3587_v44, %v3805_v26  ;;  %v3612_v4 = vrot.slane %v3517_v23, 1  ;;  %v3733_v23 = vpop.permute.xlu2 %3732  ;;  %v3523_v44 = vrot.slane %v3521_v7, 7  ;;  %s5052_s21 = sshll.u32 %s8419_s18, 4  ;;  %s6098_s8 = scalar_lea.hbm %s6097_s29, 256  ;;  %s5053_s21 = int_to_ptr.vmem [resolvable:$true] %s5052_s21 }
 0x3ac   : > { %p6099_p11 = scmp.ne.s32.totalorder %s6097_s29, %s6098_s8  ;;  %p6103_p0 = scmp.lt.s32.totalorder %s6097_s29, %s8751_s7 }
 0x3ad   : > { %v4943_v46 = vadd.f32 %v4911_v18, %v4879_v60  ;;  %v4912_v18 = vld [vmem:[%s6247_s17 + $0x8] sm:$0xff]  ;;  %v3613_v62 = vor.u32 %v3612_v4, %v8856_v11  ;;  %p6104_p1 = scmp.lt.s32.totalorder %s6102_s13, %s6098_s8 }
 0x3ae   : > { %v4675_v54 = vpop.f32.mrf.mxu0  ;;  %v4761_v12 = vpop.f32.mrf.mxu1  ;;  %p6100_p12 = pnand %p6099_p11, %p6228_p5 }
 0x3af   : > { %v4975_v8 = vmax.f32 %v4943_v46, 0.0  ;;  %v4762_v9 = vadd.f32 %v4761_v12, %v4673_v2  ;;  %v4676_v28 = vadd.f32 %v4675_v54, %v4587_v19  ;;  %v8857_v12 = vld [vmem:[#allocation9_spill] sm:$0xff]  ;;  %v3651_v32 = vsel %vm6576_vm6, %v3613_v62, 0  ;;  %v8858_v54 = vld [vmem:[#allocation12_spill] sm:$0xff]  ;;  %v3807_v62 = vpop.permute.xlu1 %3806  ;;  %p6105_p2 = por %p6104_p1, %p6103_p0 }
 0x3b0   : > { %4630 = vmatmul.bf16.gmra.mxu3 %v3977_v16  ;;  %p6101_p13 = pneg %p6100_p12 }
 0x3b1   : > { %5007 = vst.msk [vmem:[%s8419_s18] sm:$0xff] %vm1508_vm7, %v4975_v8  ;;  %v4844_v53 = vmul.f32 %v8375_v21, %v4762_v9  ;;  %4714 = vmatmul.bf16.gmra.mxu0 %v4032_v27  ;;  %v3015_v8 = vsel %vm6576_vm6, %v8857_v12, 0  ;;  %v8432_v9 = vpop.f32.mrf.mxu2  ;;  %v4500_v27 = vadd.f32 %v8308_v37, %v8858_v54 }
 0x3b2   : > { %v3936_v16 = vsel %vm1508_vm7, %v3015_v8, %v3733_v23  ;;  %p6106_p3 = pnand %p6105_p2, %p6101_p13 }
 0x3b3   : > { %v4880_v60 = vadd.f32 %v8387_v61, %v4844_v53  ;;  %v4591_v14 = vpop.f32.mrf.mxu3  ;;  %v3524_v53 = vshll.u32 %v8126_v30, 16  ;;  %v4589_v19 = vadd.f32 %v4588_v5, %v4500_v27  ;;  %v4914_v27 = vld [vmem:[%s6247_s17 + $0x18] sm:$0xff] }
 0x3b5   : > { %v4944_v26 = vadd.f32 %v4912_v18, %v4880_v60  ;;  %v4913_v18 = vld [vmem:[%s6247_s17 + $0x10] sm:$0xff]  ;;  %v3526_v11 = vor.u32 %v3524_v53, %v3523_v44  ;;  %v8859_v44 = vld [vmem:[#allocation13_spill] sm:$0xff] }
 0x3b6   : > { %v4677_v2 = vpop.f32.mrf.mxu0  ;;  %v4764_v46 = vpop.f32.mrf.mxu1 }
 0x3b7   : > { %v4976_v63 = vmax.f32 %v4944_v26, 0.0  ;;  %v4765_v13 = vadd.f32 %v4764_v46, %v4676_v28  ;;  %v3777_v28 = vpop.permute.xlu0 %3776  ;;  %v4678_v26 = vadd.f32 %v4677_v2, %v4589_v19  ;;  %v3588_v30 = vsel %vm6302_vm3, 0, %v3526_v11 }
 0x3b8   : > { %4556 = vmatmul.bf16.gmra.mxu2 %v3936_v16  ;;  %v4036_v5 = vsel %vm1508_vm7, %v3588_v30, %v3807_v62  ;;  %v3614_v16 = vrot.slane %v3524_v53, 1  ;;  %v8861_v30 = vld [vmem:[#allocation14_spill] sm:$0xff] }
 0x3b9   : > { %5008 = vst.msk [vmem:[%s8419_s18 + $0x8] sm:$0xff] %vm1508_vm7, %v4976_v63  ;;  %v4845_v4 = vmul.f32 %v8375_v21, %v4765_v13  ;;  %5821 = vmatmul.msk.bf16.gmra.mxu1 %vm1508_vm7, %v3651_v32  ;;  %v3980_v13 = vsel %vm1508_vm7, %v7973_v31, %v3777_v28  ;;  %v4503_v32 = vadd.f32 %v8330_v40, %v8859_v44  ;;  %v8453_v2 = vpop.f32.mrf.mxu2  ;;  %v3528_v31 = vshrl.u32 %v8140_v57, 16 }
 0x3ba   : > { %v3615_v53 = vor.u32 %v3614_v16, %v3521_v7  ;;  %v4505_v7 = vadd.f32 %v8348_v20, %v8861_v30  ;;  %v4915_v16 = vld [vmem:[%s6247_s17 + $0x20] sm:$0xff] }
 0x3bb   : > { %v4881_v60 = vadd.f32 %v8387_v61, %v4845_v4  ;;  %v4593_v23 = vpop.f32.mrf.mxu3  ;;  %v4592_v4 = vadd.f32 %v4591_v14, %v4503_v32  ;;  %v3530_v14 = vrot.slane %v3528_v31, 7 }
 0x3bc   : > { %v4594_v32 = vadd.f32 %v4593_v23, %v4505_v7 }
 0x3bd   : > { %v4945_v37 = vadd.f32 %v4913_v18, %v4881_v60  ;;  %v3735_v60 = vpop.permute.xlu2 %3734 }
 0x3be   : > { %v4680_v46 = vpop.f32.mrf.mxu0  ;;  %v4766_v12 = vpop.f32.mrf.mxu1 }
 0x3bf   : > { %v4977_v8 = vmax.f32 %v4945_v37, 0.0  ;;  %v4767_v63 = vadd.f32 %v4766_v12, %v4678_v26  ;;  %v4681_v11 = vadd.f32 %v4680_v46, %v4592_v4  ;;  %v8860_v26 = vld [vmem:[#allocation6_spill] sm:$0xff] }
 0x3c0   : > { %4635 = vmatmul.bf16.gmra.mxu3 %v3980_v13  ;;  %v3016_v37 = vsel %vm6576_vm6, %v8860_v26, 0  ;;  %v3652_v13 = vsel %vm6576_vm6, %v3615_v53, 0 }
 0x3c1   : > { %5009 = vst.msk [vmem:[%s8419_s18 + $0x10] sm:$0xff] %vm1508_vm7, %v4977_v8  ;;  %v4846_v54 = vmul.f32 %v8375_v21, %v4767_v63  ;;  %4719 = vmatmul.bf16.gmra.mxu0 %v4036_v5  ;;  %v3940_v63 = vsel %vm1508_vm7, %v3016_v37, %v3735_v60  ;;  %v3531_v5 = vshll.u32 %v8140_v57, 16  ;;  %v8475_v44 = vpop.f32.mrf.mxu2  ;;  %v3809_v60 = vpop.permute.xlu1 %3808 }
 0x3c3   : > { %v4882_v18 = vadd.f32 %v8387_v61, %v4846_v54  ;;  %v4596_v19 = vpop.f32.mrf.mxu3  ;;  %v3533_v4 = vor.u32 %v3531_v5, %v3530_v14  ;;  %v4916_v14 = vld [vmem:[%s6247_s17 + $0x28] sm:$0xff] }
 0x3c5   : > { %v4946_v40 = vadd.f32 %v4914_v27, %v4882_v18  ;;  %v3779_v18 = vpop.permute.xlu0 %3778  ;;  %v3589_v23 = vsel %vm6302_vm3, 0, %v3533_v4 }
 0x3c6   : > { %v4682_v28 = vpop.f32.mrf.mxu0  ;;  %v4769_v62 = vpop.f32.mrf.mxu1  ;;  %v3983_v57 = vsel %vm1508_vm7, %v8000_v10, %v3779_v18  ;;  %v4040_v37 = vsel %vm1508_vm7, %v3589_v23, %v3809_v60 }
 0x3c7   : > { %v4978_v12 = vmax.f32 %v4946_v40, 0.0  ;;  %v4770_v8 = vadd.f32 %v4769_v62, %v4681_v11  ;;  %v4683_v20 = vadd.f32 %v4682_v28, %v4594_v32 }
 0x3c8   : > { %4561 = vmatmul.bf16.gmra.mxu2 %v3940_v63 }
 0x3c9   : > { %5010 = vst.msk [vmem:[%s8419_s18 + $0x18] sm:$0xff] %vm1508_vm7, %v4978_v12  ;;  %v4847_v46 = vmul.f32 %v8375_v21, %v4770_v8  ;;  %5822 = vmatmul.msk.bf16.gmra.mxu1 %vm1508_vm7, %v3652_v13  ;;  %v3616_v12 = vrot.slane %v3531_v5, 1  ;;  %v8862_v8 = vld [vmem:[#allocation15_spill] sm:$0xff]  ;;  %v3535_v13 = vshrl.u32 %v8156_v45, 16 }
 0x3ca   : > { %v4508_v63 = vadd.f32 %v8370_v25, %v8862_v8 }
 0x3cb   : > { %v4883_v54 = vadd.f32 %v8387_v61, %v4847_v46  ;;  %v4598_v27 = vpop.f32.mrf.mxu3  ;;  %v3617_v46 = vor.u32 %v3616_v12, %v3528_v31  ;;  %v3537_v60 = vrot.slane %v3535_v13, 7  ;;  %v3538_v31 = vshll.u32 %v8156_v45, 16  ;;  %v3811_v12 = vpop.permute.xlu1 %3810 }
 0x3cc   : > { %v4597_v10 = vadd.f32 %v4596_v19, %v4508_v63 }
 0x3cd   : > { %v4947_v53 = vadd.f32 %v4915_v16, %v4883_v54  ;;  %v8491_v16 = vpop.f32.mrf.mxu2  ;;  %v3540_v23 = vor.u32 %v3538_v31, %v3537_v60 }
 0x3ce   : > { %v4685_v11 = vpop.f32.mrf.mxu0  ;;  %v4771_v40 = vpop.f32.mrf.mxu1 }
 0x3cf   : > { %v4979_v62 = vmax.f32 %v4947_v53, 0.0  ;;  %v4772_v26 = vadd.f32 %v4771_v40, %v4683_v20  ;;  %v4686_v5 = vadd.f32 %v4685_v11, %v4597_v10  ;;  %v3653_v20 = vsel %vm6576_vm6, %v3617_v46, 0  ;;  %v8863_v53 = vld [vmem:[#allocation16_spill] sm:$0xff]  ;;  %v4917_v11 = vld [vmem:[%s6247_s17 + $0x30] sm:$0xff] }
 0x3d0   : > { %4640 = vmatmul.bf16.gmra.mxu3 %v3983_v57  ;;  %v4510_v19 = vadd.f32 %v8410_v47, %v8863_v53  ;;  %v6078_v46 = vld [vmem:[#allocation2 + $0x70] sm:$0xff] }
 0x3d1   : > { %5011 = vst.msk [vmem:[%s8419_s18 + $0x20] sm:$0xff] %vm1508_vm7, %v4979_v62  ;;  %v4848_v28 = vmul.f32 %v8375_v21, %v4772_v26  ;;  %4724 = vmatmul.bf16.gmra.mxu0 %v4040_v37  ;;  %v3781_v37 = vpop.permute.xlu0 %3780 }
 0x3d2   : > { %v4599_v62 = vadd.f32 %v4598_v27, %v4510_v19  ;;  %v3986_v45 = vsel %vm1508_vm7, %v6078_v46, %v3781_v37  ;;  %v3590_v27 = vsel %vm6302_vm3, 0, %v3540_v23  ;;  %v4515_v37 = vadd.f32 %v8453_v2, %v8091_v34 }
 0x3d3   : > { %v4884_v30 = vadd.f32 %v8387_v61, %v4848_v28  ;;  %v4601_v7 = vpop.f32.mrf.mxu3  ;;  %v3813_v46 = vpop.permute.xlu1 %3812 }
 0x3d5   : > { %v4948_v32 = vadd.f32 %v4916_v14, %v4884_v30  ;;  %v8504_v14 = vpop.f32.mrf.mxu2 }
 0x3d6   : > { %v4687_v25 = vpop.f32.mrf.mxu0  ;;  %v4774_v54 = vpop.f32.mrf.mxu1 }
 0x3d7   : > { %v4980_v4 = vmax.f32 %v4948_v32, 0.0  ;;  %v4775_v18 = vadd.f32 %v4774_v54, %v4686_v5  ;;  %v4688_v8 = vadd.f32 %v4687_v25, %v4599_v62  ;;  %v4044_v5 = vsel %vm1508_vm7, %v3590_v27, %v3811_v12 }
 0x3d8   : > { %v3618_v32 = vrot.slane %v3538_v31, 1  ;;  %v4513_v25 = vadd.f32 %v8432_v9, %v8067_v15 }
 0x3d9   : > { %5012 = vst.msk [vmem:[%s8419_s18 + $0x28] sm:$0xff] %vm1508_vm7, %v4980_v4  ;;  %v4849_v40 = vmul.f32 %v8375_v21, %v4775_v18  ;;  %5823 = vmatmul.msk.bf16.gmra.mxu1 %vm1508_vm7, %v3653_v20  ;;  %v4918_v4 = vld [vmem:[%s6247_s17 + $0x38] sm:$0xff]  ;;  %v3542_v18 = vshrl.u32 %v8167_v56, 16 }
 0x3da   : > { %v4602_v60 = vadd.f32 %v4601_v7, %v4513_v25  ;;  %v3619_v19 = vor.u32 %v3618_v32, %v3535_v13  ;;  %v3545_v13 = vshll.u32 %v8167_v56, 16  ;;  %v6079_v25 = vld [vmem:[#allocation2 + $0x78] sm:$0xff] }
 0x3db   : > { %v4885_v26 = vadd.f32 %v8387_v61, %v4849_v40  ;;  %v4603_v57 = vpop.f32.mrf.mxu3 }
 0x3dc   : > { %v3654_v23 = vsel %vm6576_vm6, %v3619_v19, 0  ;;  %v4920_v19 = vld [vmem:[%s6247_s17 + $0x48] sm:$0xff] }
 0x3dd   : > { %v4949_v63 = vadd.f32 %v4917_v11, %v4885_v26  ;;  %v3544_v26 = vrot.slane %v3542_v18, 7  ;;  %v8522_v12 = vpop.f32.mrf.mxu2 }
 0x3de   : > { %v4690_v47 = vpop.f32.mrf.mxu0  ;;  %v4776_v28 = vpop.f32.mrf.mxu1 }
 0x3df   : > { %v4981_v10 = vmax.f32 %v4949_v63, 0.0  ;;  %v4777_v30 = vadd.f32 %v4776_v28, %v4688_v8  ;;  %v4691_v40 = vadd.f32 %v4690_v47, %v4602_v60  ;;  %v4919_v8 = vld [vmem:[%s6247_s17 + $0x40] sm:$0xff]  ;;  %v4604_v63 = vadd.f32 %v4603_v57, %v4515_v37 }
 0x3e0   : > { %4645 = vmatmul.bf16.gmra.mxu3 %v3986_v45  ;;  %v4518_v60 = vadd.f32 %v8475_v44, %v8110_v29 }
 0x3e1   : > { %5013 = vst.msk [vmem:[%s8419_s18 + $0x30] sm:$0xff] %vm1508_vm7, %v4981_v10  ;;  %v4850_v54 = vmul.f32 %v8375_v21, %v4777_v30  ;;  %4729 = vmatmul.bf16.gmra.mxu0 %v4044_v5  ;;  %v3547_v10 = vor.u32 %v3545_v13, %v3544_v26  ;;  %v3783_v30 = vpop.permute.xlu0 %3782 }
 0x3e3   : > { %v4886_v20 = vadd.f32 %v8387_v61, %v4850_v54  ;;  %v4606_v53 = vpop.f32.mrf.mxu3  ;;  %v3989_v54 = vsel %vm1508_vm7, %v6079_v25, %v3783_v30  ;;  %v3591_v56 = vsel %vm6302_vm3, 0, %v3547_v10  ;;  %v3552_v10 = vshll.u32 %v8358_v33, 16 }
 0x3e4   : > { %v4048_v57 = vsel %vm1508_vm7, %v3591_v56, %v3813_v46  ;;  %v3549_v25 = vshrl.u32 %v8358_v33, 16 }
 0x3e5   : > { %v4950_v31 = vadd.f32 %v4918_v4, %v4886_v20  ;;  %v3620_v4 = vrot.slane %v3545_v13, 1  ;;  %v4520_v13 = vadd.f32 %v8491_v16, %v8133_v55 }
 0x3e6   : > { %v4692_v11 = vpop.f32.mrf.mxu0  ;;  %v4779_v62 = vpop.f32.mrf.mxu1 }
 0x3e7   : > { %v4982_v15 = vmax.f32 %v4950_v31, 0.0  ;;  %v4780_v9 = vadd.f32 %v4779_v62, %v4691_v40  ;;  %v4693_v34 = vadd.f32 %v4692_v11, %v4604_v63  ;;  %v8541_v40 = vpop.f32.mrf.mxu2  ;;  %v4607_v31 = vadd.f32 %v4606_v53, %v4518_v60  ;;  %v8864_v60 = vld [vmem:[#allocation10_spill] sm:$0xff] }
 0x3e9   : > { %5014 = vst.msk [vmem:[%s8419_s18 + $0x38] sm:$0xff] %vm1508_vm7, %v4982_v15  ;;  %v4851_v7 = vmul.f32 %v8375_v21, %v4780_v9  ;;  %5824 = vmatmul.msk.bf16.gmra.mxu1 %vm1508_vm7, %v3654_v23  ;;  %v3621_v15 = vor.u32 %v3620_v4, %v3542_v18  ;;  %v4921_v18 = vld [vmem:[%s6247_s17 + $0x50] sm:$0xff] }
 0x3eb   : > { %v4887_v47 = vadd.f32 %v8387_v61, %v4851_v7  ;;  %v4608_v28 = vpop.f32.mrf.mxu3  ;;  %v3655_v7 = vsel %vm6576_vm6, %v3621_v15, 0 }
 0x3ed   : > { %v4951_v2 = vadd.f32 %v4919_v8, %v4887_v47  ;;  %v4609_v8 = vadd.f32 %v4608_v28, %v4520_v13 }
 0x3ee   : > { %v4695_v45 = vpop.f32.mrf.mxu0  ;;  %v4781_v27 = vpop.f32.mrf.mxu1 }
 0x3ef   : > { %v4983_v5 = vmax.f32 %v4951_v2, 0.0  ;;  %v4782_v32 = vadd.f32 %v4781_v27, %v4693_v34  ;;  %v4696_v9 = vadd.f32 %v4695_v45, %v4607_v31  ;;  %v8555_v30 = vpop.f32.mrf.mxu2  ;;  %v3622_v27 = vrot.slane %v3552_v10, 1 }
 0x3f0   : > { %4650 = vmatmul.bf16.gmra.mxu3 %v3989_v54 }
 0x3f1   : > { %5015 = vst.msk [vmem:[%s8419_s18 + $0x40] sm:$0xff] %vm1508_vm7, %v4983_v5  ;;  %v4852_v20 = vmul.f32 %v8375_v21, %v4782_v32  ;;  %4734 = vmatmul.bf16.gmra.mxu0 %v4048_v57  ;;  %v4523_v5 = vadd.f32 %v8504_v14, %v8147_v51  ;;  %v4922_v32 = vld [vmem:[%s6247_s17 + $0x58] sm:$0xff]  ;;  %v3623_v51 = vor.u32 %v3622_v27, %v3549_v25 }
 0x3f3   : > { %v4888_v11 = vadd.f32 %v8387_v61, %v4852_v20  ;;  %v4611_v62 = vpop.f32.mrf.mxu3  ;;  %v3017_v20 = vsel %vm6576_vm6, %v8864_v60, 0 }
 0x3f4   : > { %v4612_v54 = vadd.f32 %v4611_v62, %v4523_v5  ;;  %v4924_v5 = vld [vmem:[%s6247_s17 + $0x68] sm:$0xff] }
 0x3f5   : > { %v4952_v26 = vadd.f32 %v4920_v19, %v4888_v11 }
 0x3f6   : > { %v4697_v23 = vpop.f32.mrf.mxu0  ;;  %v4784_v37 = vpop.f32.mrf.mxu1 }
 0x3f7   : > { %v4984_v29 = vmax.f32 %v4952_v26, 0.0  ;;  %v4785_v44 = vadd.f32 %v4784_v37, %v4696_v9  ;;  %v4698_v46 = vadd.f32 %v4697_v23, %v4609_v8  ;;  %v8569_v33 = vpop.f32.mrf.mxu2  ;;  %v3656_v26 = vsel %vm6576_vm6, %v3623_v51, 0 }
 0x3f8   : > { %v4525_v23 = vadd.f32 %v8522_v12, %v8160_v24  ;;  %v3556_v12 = vshrl.u32 %v8382_v41, 16 }
 0x3f9   : > { %5016 = vst.msk [vmem:[%s8419_s18 + $0x48] sm:$0xff] %vm1508_vm7, %v4984_v29  ;;  %v4853_v53 = vmul.f32 %v8375_v21, %v4785_v44  ;;  %5825 = vmatmul.msk.bf16.gmra.mxu1 %vm1508_vm7, %v3655_v7  ;;  %v3559_v29 = vshll.u32 %v8382_v41, 16  ;;  %v4923_v44 = vld [vmem:[%s6247_s17 + $0x60] sm:$0xff] }
 0x3fa   : > { %v3558_v51 = vrot.slane %v3556_v12, 7 }
 0x3fb   : > { %v4889_v63 = vadd.f32 %v8387_v61, %v4853_v53  ;;  %v4613_v47 = vpop.f32.mrf.mxu3 }
 0x3fc   : > { %v4614_v7 = vadd.f32 %v4613_v47, %v4525_v23 }
 0x3fd   : > { %v4953_v34 = vadd.f32 %v4921_v18, %v4889_v63  ;;  %v3551_v18 = vrot.slane %v3549_v25, 7 }
 0x3fe   : > { %v4700_v55 = vpop.f32.mrf.mxu0  ;;  %v4786_v16 = vpop.f32.mrf.mxu1 }
 0x3ff   : > { %v4985_v2 = vmax.f32 %v4953_v34, 0.0  ;;  %v4787_v45 = vadd.f32 %v4786_v16, %v4698_v46  ;;  %v4701_v14 = vadd.f32 %v4700_v55, %v4612_v54  ;;  %v3624_v34 = vrot.slane %v3559_v29, 1  ;;  %v4534_v27 = vpop.f32.mrf.mxu2 }
 0x401   : > { %5017 = vst.msk [vmem:[%s8419_s18 + $0x50] sm:$0xff] %vm1508_vm7, %v4985_v2  ;;  %v4854_v28 = vmul.f32 %v8375_v21, %v4787_v45  ;;  %v3554_v2 = vor.u32 %v3552_v10, %v3551_v18  ;;  %v4528_v45 = vadd.f32 %v8541_v40, %v8173_v35 }
 0x403   : > { %v4890_v56 = vadd.f32 %v8387_v61, %v4854_v28  ;;  %v4616_v57 = vpop.f32.mrf.mxu3  ;;  %v3737_v4 = vpop.permute.xlu2 %3736  ;;  %v3625_v28 = vor.u32 %v3624_v34, %v3556_v12  ;;  %v3592_v10 = vsel %vm6302_vm3, 0, %v3554_v2 }
 0x404   : > { %v3944_v19 = vsel %vm1508_vm7, %v3017_v20, %v3737_v4 }
 0x405   : > { %v4954_v31 = vadd.f32 %v4922_v32, %v4890_v56  ;;  %4566 = vmatmul.bf16.gmra.mxu2 %v3944_v19  ;;  %v4617_v32 = vadd.f32 %v4616_v57, %v4528_v45  ;;  %v3657_v20 = vsel %vm6576_vm6, %v3625_v28, 0  ;;  %v4927_v28 = vld [vmem:[%s6247_s17 + $0x80] sm:$0xff] }
 0x406   : > { %v4702_v11 = vpop.f32.mrf.mxu0  ;;  %v4789_v15 = vpop.f32.mrf.mxu1 }
 0x407   : > { %v4986_v62 = vmax.f32 %v4954_v31, 0.0  ;;  %v4790_v9 = vadd.f32 %v4789_v15, %v4701_v14  ;;  %v4703_v8 = vadd.f32 %v4702_v11, %v4614_v7  ;;  %v4530_v14 = vadd.f32 %v8555_v30, %v8183_v42  ;;  %v4925_v11 = vld [vmem:[%s6247_s17 + $0x70] sm:$0xff] }
 0x409   : > { %5018 = vst.msk [vmem:[%s8419_s18 + $0x58] sm:$0xff] %vm1508_vm7, %v4986_v62  ;;  %v4855_v37 = vmul.f32 %v8375_v21, %v4790_v9  ;;  %5826 = vmatmul.msk.bf16.gmra.mxu1 %vm1508_vm7, %v3656_v26  ;;  %v4537_v62 = vpop.f32.mrf.mxu2 }
 0x40b   : > { %v4891_v13 = vadd.f32 %v8387_v61, %v4855_v37  ;;  %v4618_v53 = vpop.f32.mrf.mxu3  ;;  %v3561_v37 = vor.u32 %v3559_v29, %v3558_v51  ;;  %v4926_v29 = vld [vmem:[%s6247_s17 + $0x78] sm:$0xff] }
 0x40c   : > { %v4619_v9 = vadd.f32 %v4618_v53, %v4530_v14  ;;  %v4533_v53 = vadd.f32 %v8569_v33, %v8191_v50 }
 0x40d   : > { %v4955_v63 = vadd.f32 %v4923_v44, %v4891_v13 }
 0x40e   : > { %v4705_v46 = vpop.f32.mrf.mxu0  ;;  %v4791_v24 = vpop.f32.mrf.mxu1 }
 0x40f   : > { %v4987_v55 = vmax.f32 %v4955_v63, 0.0  ;;  %v4792_v16 = vadd.f32 %v4791_v24, %v4703_v8  ;;  %v4706_v35 = vadd.f32 %v4705_v46, %v4617_v32  ;;  %v3593_v63 = vsel %vm6302_vm3, 0, %v3561_v37 }
 0x411   : > { %5019 = vst.msk [vmem:[%s8419_s18 + $0x60] sm:$0xff] %vm1508_vm7, %v4987_v55  ;;  %v4856_v47 = vmul.f32 %v8375_v21, %v4792_v16  ;;  %v4539_v55 = vpop.f32.mrf.mxu2 }
 0x412   : > { %v3815_v41 = vpop.permute.xlu1 %3814 }
 0x413   : > { %v4892_v25 = vadd.f32 %v8387_v61, %v4856_v47  ;;  %v4621_v54 = vpop.f32.mrf.mxu3  ;;  %v4052_v56 = vsel %vm1508_vm7, %v3592_v10, %v3815_v41  ;;  %v4535_v47 = vadd.f32 %v4534_v27, %v8201_v39  ;;  %v4538_v39 = vadd.f32 %v4537_v62, %v8209_v22 }
 0x414   : > { %4739 = vmatmul.bf16.gmra.mxu0 %v4052_v56  ;;  %v4622_v24 = vadd.f32 %v4621_v54, %v4533_v53 }
 0x415   : > { %v4956_v40 = vadd.f32 %v4924_v5, %v4892_v25 }
 0x416   : > { %v4707_v4 = vpop.f32.mrf.mxu0  ;;  %v4794_v60 = vpop.f32.mrf.mxu1 }
 0x417   : > { %v4988_v57 = vmax.f32 %v4956_v40, 0.0  ;;  %v4795_v19 = vadd.f32 %v4794_v60, %v4706_v35  ;;  %v4708_v42 = vadd.f32 %v4707_v4, %v4619_v9 }
 0x419   : > { %5020 = vst.msk [vmem:[%s8419_s18 + $0x68] sm:$0xff] %vm1508_vm7, %v4988_v57  ;;  %v4857_v31 = vmul.f32 %v8375_v21, %v4795_v19  ;;  %5827 = vmatmul.msk.bf16.gmra.mxu1 %vm1508_vm7, %v3657_v20  ;;  %v4542_v40 = vpop.f32.mrf.mxu2  ;;  %v4928_v20 = vld [vmem:[%s6247_s17 + $0x88] sm:$0xff] }
 0x41a   : > { %v3785_v15 = vpop.permute.xlu0 %3784 }
 0x41b   : > { %v4893_v6 = vadd.f32 %v8387_v61, %v4857_v31  ;;  %v4623_v26 = vpop.f32.mrf.mxu3  ;;  %v3992_v23 = vsel %vm1508_vm7, %v8360_v52, %v3785_v15 }
 0x41c   : > { %4655 = vmatmul.bf16.gmra.mxu3 %v3992_v23  ;;  %v3817_v8 = vpop.permute.xlu1 %3816  ;;  %v4624_v32 = vadd.f32 %v4623_v26, %v4535_v47  ;;  %v4540_v26 = vadd.f32 %v4539_v55, %v8219_v17  ;;  %v4929_v23 = vld [vmem:[%s6247_s17 + $0x90] sm:$0xff]  ;;  %v4543_v17 = vadd.f32 %v4542_v40, %v8227_v0 }
 0x41d   : > { %v4957_v30 = vadd.f32 %v4925_v11, %v4893_v6  ;;  %v4056_v46 = vsel %vm1508_vm7, %v3593_v63, %v3817_v8 }
 0x41e   : > { %v4710_v44 = vpop.f32.mrf.mxu0  ;;  %v4796_v7 = vpop.f32.mrf.mxu1 }
 0x41f   : > { %v4989_v13 = vmax.f32 %v4957_v30, 0.0  ;;  %v4797_v18 = vadd.f32 %v4796_v7, %v4708_v42  ;;  %v4711_v16 = vadd.f32 %v4710_v44, %v4622_v24 }
 0x421   : > { %5021 = vst.msk [vmem:[%s8419_s18 + $0x70] sm:$0xff] %vm1508_vm7, %v4989_v13  ;;  %v4858_v52 = vmul.f32 %v8375_v21, %v4797_v18  ;;  %v4544_v22 = vpop.f32.mrf.mxu2 }
 0x422   : > { %v4545_v0 = vadd.f32 %v4544_v22, %v8237_v3 }
 0x423   : > { %v4894_v12 = vadd.f32 %v8387_v61, %v4858_v52  ;;  %v4626_v34 = vpop.f32.mrf.mxu3  ;;  %v4930_v52 = vld [vmem:[%s6247_s17 + $0x98] sm:$0xff] }
 0x424   : > { %4744 = vmatmul.bf16.gmra.mxu0 %v4056_v46  ;;  %v4627_v57 = vadd.f32 %v4626_v34, %v4538_v39 }
 0x425   : > { %v4958_v43 = vadd.f32 %v4926_v29, %v4894_v12 }
 0x426   : > { %v4712_v2 = vpop.f32.mrf.mxu0  ;;  %v4799_v45 = vpop.f32.mrf.mxu1 }
 0x427   : > { %v4990_v50 = vmax.f32 %v4958_v43, 0.0  ;;  %v4800_v33 = vadd.f32 %v4799_v45, %v4711_v16  ;;  %v4713_v41 = vadd.f32 %v4712_v2, %v4624_v32 }
 0x429   : > { %5022 = vst.msk [vmem:[%s8419_s18 + $0x78] sm:$0xff] %vm1508_vm7, %v4990_v50  ;;  %v4859_v5 = vmul.f32 %v8375_v21, %v4800_v33  ;;  %v4547_v29 = vpop.f32.mrf.mxu2  ;;  %v4931_v33 = vld [vmem:[%s6247_s17 + $0xa0] sm:$0xff] }
 0x42a   : > { %v4548_v3 = vadd.f32 %v4547_v29, %v8245_v38 }
 0x42b   : > { %v4895_v25 = vadd.f32 %v8387_v61, %v4859_v5  ;;  %v4628_v54 = vpop.f32.mrf.mxu3 }
 0x42c   : > { %v4629_v37 = vadd.f32 %v4628_v54, %v4540_v26 }
 0x42d   : > { %v4959_v10 = vadd.f32 %v4927_v28, %v4895_v25 }
 0x42e   : > { %v4715_v56 = vpop.f32.mrf.mxu0  ;;  %v4801_v35 = vpop.f32.mrf.mxu1 }
 0x42f   : > { %v4991_v4 = vmax.f32 %v4959_v10, 0.0  ;;  %v4802_v60 = vadd.f32 %v4801_v35, %v4713_v41  ;;  %v4716_v14 = vadd.f32 %v4715_v56, %v4627_v57 }
 0x431   : > { %5023 = vst.msk [vmem:[%s8419_s18 + $0x80] sm:$0xff] %vm1508_vm7, %v4991_v4  ;;  %v4860_v27 = vmul.f32 %v8375_v21, %v4802_v60  ;;  %v4549_v28 = vpop.f32.mrf.mxu2  ;;  %v4932_v4 = vld [vmem:[%s6247_s17 + $0xa8] sm:$0xff] }
 0x433   : > { %v4896_v19 = vadd.f32 %v8387_v61, %v4860_v27  ;;  %v4631_v51 = vpop.f32.mrf.mxu3 }
 0x434   : > { %v4632_v46 = vadd.f32 %v4631_v51, %v4543_v17 }
 0x435   : > { %v4960_v31 = vadd.f32 %v4928_v20, %v4896_v19 }
 0x436   : > { %v4717_v11 = vpop.f32.mrf.mxu0  ;;  %v4804_v15 = vpop.f32.mrf.mxu1 }
 0x437   : > { %v4992_v9 = vmax.f32 %v4960_v31, 0.0  ;;  %v4805_v6 = vadd.f32 %v4804_v15, %v4716_v14  ;;  %v4718_v44 = vadd.f32 %v4717_v11, %v4629_v37  ;;  %v4550_v11 = vadd.f32 %v4549_v28, %v8255_v1 }
 0x439   : > { %5024 = vst.msk [vmem:[%s8419_s18 + $0x88] sm:$0xff] %vm1508_vm7, %v4992_v9  ;;  %v4861_v62 = vmul.f32 %v8375_v21, %v4805_v6  ;;  %v4552_v31 = vpop.f32.mrf.mxu2  ;;  %v4933_v9 = vld [vmem:[%s6247_s17 + $0xb0] sm:$0xff] }
 0x43b   : > { %v4897_v42 = vadd.f32 %v8387_v61, %v4861_v62  ;;  %v4633_v30 = vpop.f32.mrf.mxu3 }
 0x43c   : > { %v4634_v47 = vadd.f32 %v4633_v30, %v4545_v0 }
 0x43d   : > { %v4961_v7 = vadd.f32 %v4929_v23, %v4897_v42 }
 0x43e   : > { %v4720_v13 = vpop.f32.mrf.mxu0  ;;  %v4806_v18 = vpop.f32.mrf.mxu1 }
 0x43f   : > { %v4993_v8 = vmax.f32 %v4961_v7, 0.0  ;;  %v4807_v63 = vadd.f32 %v4806_v18, %v4718_v44  ;;  %v4721_v12 = vadd.f32 %v4720_v13, %v4632_v46  ;;  %v4553_v44 = vadd.f32 %v4552_v31, %v8265_v59  ;;  %v4934_v13 = vld [vmem:[%s6247_s17 + $0xb8] sm:$0xff] }
 0x441   : > { %5025 = vst.msk [vmem:[%s8419_s18 + $0x90] sm:$0xff] %vm1508_vm7, %v4993_v8  ;;  %v4862_v53 = vmul.f32 %v8375_v21, %v4807_v63  ;;  %v4554_v7 = vpop.f32.mrf.mxu2 }
 0x442   : > { %v4555_v59 = vadd.f32 %v4554_v7, %v8277_v58 }
 0x443   : > { %v4898_v24 = vadd.f32 %v8387_v61, %v4862_v53  ;;  %v4636_v55 = vpop.f32.mrf.mxu3 }
 0x444   : > { %v4637_v60 = vadd.f32 %v4636_v55, %v4548_v3 }
 0x445   : > { %v4962_v34 = vadd.f32 %v4930_v52, %v4898_v24 }
 0x446   : > { %v4722_v16 = vpop.f32.mrf.mxu0  ;;  %v4809_v43 = vpop.f32.mrf.mxu1 }
 0x447   : > { %v4994_v2 = vmax.f32 %v4962_v34, 0.0  ;;  %v4810_v45 = vadd.f32 %v4809_v43, %v4721_v12  ;;  %v4723_v32 = vadd.f32 %v4722_v16, %v4634_v47  ;;  %v4935_v34 = vld [vmem:[%s6247_s17 + $0xc0] sm:$0xff] }
 0x449   : > { %5026 = vst.msk [vmem:[%s8419_s18 + $0x98] sm:$0xff] %vm1508_vm7, %v4994_v2  ;;  %v4863_v50 = vmul.f32 %v8375_v21, %v4810_v45  ;;  %v4557_v43 = vpop.f32.mrf.mxu2 }
 0x44a   : > { %v4558_v58 = vadd.f32 %v4557_v43, %v8287_v49 }
 0x44b   : > { %v4899_v5 = vadd.f32 %v8387_v61, %v4863_v50  ;;  %v4638_v35 = vpop.f32.mrf.mxu3 }
 0x44c   : > { %v4639_v6 = vadd.f32 %v4638_v35, %v4550_v11 }
 0x44d   : > { %v4963_v25 = vadd.f32 %v4931_v33, %v4899_v5 }
 0x44e   : > { %v4725_v54 = vpop.f32.mrf.mxu0  ;;  %v4811_v41 = vpop.f32.mrf.mxu1 }
 0x44f   : > { %v4995_v10 = vmax.f32 %v4963_v25, 0.0  ;;  %v4812_v56 = vadd.f32 %v4811_v41, %v4723_v32  ;;  %v4726_v27 = vadd.f32 %v4725_v54, %v4637_v60  ;;  %v4936_v32 = vld [vmem:[%s6247_s17 + $0xc8] sm:$0xff] }
 0x451   : > { %5027 = vst.msk [vmem:[%s8419_s18 + $0xa0] sm:$0xff] %vm1508_vm7, %v4995_v10  ;;  %v4864_v40 = vmul.f32 %v8375_v21, %v4812_v56  ;;  %v4559_v56 = vpop.f32.mrf.mxu2 }
 0x452   : > { %v4560_v49 = vadd.f32 %v4559_v56, %v8299_v36  ;;  %v4938_v36 = vld [vmem:[%s6247_s17 + $0xd8] sm:$0xff]  ;;  %v4941_v56 = vld [vmem:[%s6247_s17 + $0xf0] sm:$0xff] }
 0x453   : > { %v4900_v39 = vadd.f32 %v8387_v61, %v4864_v40  ;;  %v4641_v15 = vpop.f32.mrf.mxu3 }
 0x454   : > { %v4642_v18 = vadd.f32 %v4641_v15, %v4553_v44 }
 0x455   : > { %v4964_v20 = vadd.f32 %v4932_v4, %v4900_v39 }
 0x456   : > { %v4727_v57 = vpop.f32.mrf.mxu0  ;;  %v4814_v19 = vpop.f32.mrf.mxu1 }
 0x457   : > { %v4996_v51 = vmax.f32 %v4964_v20, 0.0  ;;  %v4815_v14 = vadd.f32 %v4814_v19, %v4726_v27  ;;  %v4728_v22 = vadd.f32 %v4727_v57, %v4639_v6  ;;  %v4937_v27 = vld [vmem:[%s6247_s17 + $0xd0] sm:$0xff] }
 0x459   : > { %5028 = vst.msk [vmem:[%s8419_s18 + $0xa8] sm:$0xff] %vm1508_vm7, %v4996_v51  ;;  %v4865_v38 = vmul.f32 %v8375_v21, %v4815_v14  ;;  %v4562_v6 = vpop.f32.mrf.mxu2 }
 0x45b   : > { %v4901_v26 = vadd.f32 %v8387_v61, %v4865_v38  ;;  %v4643_v63 = vpop.f32.mrf.mxu3 }
 0x45c   : > { %v4644_v55 = vadd.f32 %v4643_v63, %v4555_v59 }
 0x45d   : > { %v4965_v62 = vadd.f32 %v4933_v9, %v4901_v26 }
 0x45e   : > { %v4730_v23 = vpop.f32.mrf.mxu0  ;;  %v4816_v37 = vpop.f32.mrf.mxu1 }
 0x45f   : > { %v4997_v42 = vmax.f32 %v4965_v62, 0.0  ;;  %v4817_v30 = vadd.f32 %v4816_v37, %v4728_v22  ;;  %v4731_v17 = vadd.f32 %v4730_v23, %v4642_v18  ;;  %v4563_v62 = vadd.f32 %v4562_v6, %v8310_v48  ;;  %v6081_v48 = vld [vmem:[%s8750_s6] ss:$0 sm:$0xff] }
 0x461   : > { %5029 = vst.msk [vmem:[%s8419_s18 + $0xb0] sm:$0xff] %vm1508_vm7, %v4997_v42  ;;  %v4866_v1 = vmul.f32 %v8375_v21, %v4817_v30  ;;  %v4564_v37 = vpop.f32.mrf.mxu2 }
 0x463   : > { %v4902_v8 = vadd.f32 %v8387_v61, %v4866_v1  ;;  %v4646_v0 = vpop.f32.mrf.mxu3 }
 0x464   : > { %v4647_v25 = vadd.f32 %v4646_v0, %v4558_v58 }
 0x465   : > { %v4966_v53 = vadd.f32 %v4934_v13, %v4902_v8  ;;  %v4939_v8 = vld [vmem:[%s6247_s17 + $0xe0] sm:$0xff] }
 0x466   : > { %v4732_v52 = vpop.f32.mrf.mxu0  ;;  %v4819_v29 = vpop.f32.mrf.mxu1 }
 0x467   : > { %v4998_v46 = vmax.f32 %v4966_v53, 0.0  ;;  %v4820_v24 = vadd.f32 %v4819_v29, %v4731_v17  ;;  %v4733_v2 = vadd.f32 %v4732_v52, %v4644_v55 }
 0x469   : > { %5030 = vst.msk [vmem:[%s8419_s18 + $0xb8] sm:$0xff] %vm1508_vm7, %v4998_v46  ;;  %v4867_v12 = vmul.f32 %v8375_v21, %v4820_v24 }
 0x46b   : > { %v4903_v16 = vadd.f32 %v8387_v61, %v4867_v12  ;;  %v4648_v4 = vpop.f32.mrf.mxu3 }
 0x46c   : > { %v4649_v20 = vadd.f32 %v4648_v4, %v4560_v49 }
 0x46d   : > { %v4967_v45 = vadd.f32 %v4935_v34, %v4903_v16  ;;  %v8866_v34 = vld [vmem:[#allocation8_spill] sm:$0xff] }
 0x46e   : > { %v4821_v50 = vpop.f32.mrf.mxu1  ;;  %v4735_v5 = vpop.f32.mrf.mxu0 }
 0x46f   : > { %v4999_v33 = vmax.f32 %v4967_v45, 0.0  ;;  %v4822_v47 = vadd.f32 %v4821_v50, %v4733_v2  ;;  %v4736_v41 = vadd.f32 %v4735_v5, %v4647_v25  ;;  %v4940_v2 = vld [vmem:[%s6247_s17 + $0xe8] sm:$0xff] }
 0x470   : > { %v8867_v25 = vld [vmem:[#allocation17_spill] sm:$0xff] }
 0x471   : > { %5031 = vst.msk [vmem:[%s8419_s18 + $0xc0] sm:$0xff] %vm1508_vm7, %v4999_v33  ;;  %v4868_v28 = vmul.f32 %v8375_v21, %v4822_v47 }
 0x473   : > { %v4904_v54 = vadd.f32 %v8387_v61, %v4868_v28  ;;  %v4651_v22 = vpop.f32.mrf.mxu3 }
 0x474   : > { %v4652_v42 = vadd.f32 %v4651_v22, %v4563_v62 }
 0x475   : > { %v4968_v10 = vadd.f32 %v4936_v32, %v4904_v54 }
 0x476   : > { %v4824_v35 = vpop.f32.mrf.mxu1  ;;  %v4737_v39 = vpop.f32.mrf.mxu0 }
 0x477   : > { %v5000_v3 = vmax.f32 %v4968_v10, 0.0  ;;  %v4825_v40 = vadd.f32 %v4824_v35, %v4736_v41  ;;  %v4738_v19 = vadd.f32 %v4737_v39, %v4649_v20 }
 0x479   : > { %5032 = vst.msk [vmem:[%s8419_s18 + $0xc8] sm:$0xff] %vm1508_vm7, %v5000_v3  ;;  %v4869_v60 = vmul.f32 %v8375_v21, %v4825_v40 }
 0x47b   : > { %v4905_v57 = vadd.f32 %v8387_v61, %v4869_v60  ;;  %v4653_v7 = vpop.f32.mrf.mxu3 }
 0x47d   : > { %v4969_v51 = vadd.f32 %v4937_v27, %v4905_v57  ;;  %v4942_v57 = vld [vmem:[%s6247_s17 + $0xf8] sm:$0xff] }
 0x47e   : > { %v4826_v14 = vpop.f32.mrf.mxu1 }
 0x47f   : > { %v5001_v31 = vmax.f32 %v4969_v51, 0.0  ;;  %v4827_v11 = vadd.f32 %v4826_v14, %v4738_v19 }
 0x481   : > { %5033 = vst.msk [vmem:[%s8419_s18 + $0xd0] sm:$0xff] %vm1508_vm7, %v5001_v31  ;;  %v4870_v38 = vmul.f32 %v8375_v21, %v4827_v11  ;;  %v8865_v21 = vld [vmem:[#allocation7_spill] sm:$0xff] }
 0x482   : > { %v4565_v13 = vadd.f32 %v4564_v37, %v8865_v21 }
 0x483   : > { %v4906_v15 = vadd.f32 %v8387_v61, %v4870_v38  ;;  %v6080_v61 = vld [vmem:[%s8749_s5] ss:$0 sm:$0xff] }
 0x484   : > { %v4654_v63 = vadd.f32 %v4653_v7, %v4565_v13 }
 0x485   : > { %v4970_v9 = vadd.f32 %v4938_v36, %v4906_v15 }
 0x486   : > { %v4829_v23 = vpop.f32.mrf.mxu1 }
 0x487   : > { %v5002_v26 = vmax.f32 %v4970_v9, 0.0 }
 0x488   : > { %v4567_v17 = vpop.f32.mrf.mxu2 }
 0x489   : > { %5034 = vst.msk [vmem:[%s8419_s18 + $0xd8] sm:$0xff] %vm1508_vm7, %v5002_v26  ;;  %v4568_v55 = vadd.f32 %v4567_v17, %v8866_v34 }
 0x48e   : > { %v4831_v52 = vpop.f32.mrf.mxu1 }
 0x490   : > { %v4569_v47 = vpop.f32.mrf.mxu2 }
 0x491   : > { %v4740_v30 = vpop.f32.mrf.mxu0  ;;  %v4570_v54 = vadd.f32 %v4569_v47, %v8867_v25 }
 0x492   : > { %v4741_v44 = vadd.f32 %v4740_v30, %v4652_v42 }
 0x494   : > { %v4830_v1 = vadd.f32 %v4829_v23, %v4741_v44 }
 0x496   : > { %v4871_v18 = vmul.f32 %v6080_v61, %v4830_v1  ;;  %v4834_v50 = vpop.f32.mrf.mxu1 }
 0x498   : > { %v4907_v53 = vadd.f32 %v6081_v48, %v4871_v18 }
 0x499   : > { %v4742_v29 = vpop.f32.mrf.mxu0 }
 0x49a   : > { %v4971_v46 = vadd.f32 %v4939_v8, %v4907_v53  ;;  %v4743_v24 = vadd.f32 %v4742_v29, %v4654_v63 }
 0x49c   : > { %v5003_v59 = vmax.f32 %v4971_v46, 0.0  ;;  %v4832_v12 = vadd.f32 %v4831_v52, %v4743_v24 }
 0x49e   : > { %5035 = vst.msk [vmem:[%s8419_s18 + $0xe0] sm:$0xff] %vm1508_vm7, %v5003_v59  ;;  %v4872_v16 = vmul.f32 %v6080_v61, %v4832_v12  ;;  %v4836_v60 = vpop.f32.mrf.mxu1 }
 0x49f   : > { %v4656_v43 = vpop.f32.mrf.mxu3 }
 0x4a0   : > { %v4657_v45 = vadd.f32 %v4656_v43, %v4568_v55  ;;  %v4908_v0 = vadd.f32 %v6081_v48, %v4872_v16 }
 0x4a1   : > { %v4745_v33 = vpop.f32.mrf.mxu0 }
 0x4a2   : > { %v4972_v5 = vadd.f32 %v4940_v2, %v4908_v0  ;;  %v4746_v58 = vadd.f32 %v4745_v33, %v4657_v45 }
 0x4a4   : > { %v5004_v28 = vmax.f32 %v4972_v5, 0.0  ;;  %v4835_v32 = vadd.f32 %v4834_v50, %v4746_v58 }
 0x4a6   : > { %5036 = vst.msk [vmem:[%s8419_s18 + $0xe8] sm:$0xff] %vm1508_vm7, %v5004_v28  ;;  %v4873_v41 = vmul.f32 %v6080_v61, %v4835_v32 }
 0x4a7   : > { %v4658_v10 = vpop.f32.mrf.mxu3 }
 0x4a8   : > { %v4659_v35 = vadd.f32 %v4658_v10, %v4570_v54  ;;  %v4909_v3 = vadd.f32 %v6081_v48, %v4873_v41 }
 0x4a9   : > { %v4747_v40 = vpop.f32.mrf.mxu0 }
 0x4aa   : > { %v4973_v4 = vadd.f32 %v4941_v56, %v4909_v3  ;;  %v4748_v49 = vadd.f32 %v4747_v40, %v4659_v35 }
 0x4ac   : > { %v5005_v39 = vmax.f32 %v4973_v4, 0.0  ;;  %v4837_v27 = vadd.f32 %v4836_v60, %v4748_v49 }
 0x4ae   : > { %5037 = vst.msk [vmem:[%s8419_s18 + $0xf0] sm:$0xff] %vm1508_vm7, %v5005_v39  ;;  %v4874_v20 = vmul.f32 %v6080_v61, %v4837_v27 }
 0x4b0   : > { %v4910_v19 = vadd.f32 %v6081_v48, %v4874_v20 }
 0x4b2   : > { %v4974_v51 = vadd.f32 %v4942_v57, %v4910_v19 }
 0x4b4   : > { %v5006_v14 = vmax.f32 %v4974_v51, 0.0 }
 0x4b6   : > { %5038 = vst.msk [vmem:[%s8419_s18 + $0xf8] sm:$0xff] %vm1508_vm7, %v5006_v14 }
 0x4b7   : > { %6109 = shalt.err (!%p6106_p3)
}
 0x4b8   : > { %s6148_s23 = smov 128   ;;  %s6149_s18 = smov 8  }
 0x4b9   : > { %6019 = dma.vmem_to_hbm [thread:$0]  (%p6228_p5), %s5053_s21, 4096, %s5055_s22, %s5040_s28, %s6148_s23, %s6148_s23, %s6149_s18  }
 0x4ba PF: > { %p6025_p4 = scmp.ge.s32.totalorder %s6144_s27, 2  ;;  %s5069_s16 = sand.u32 1, %s6132_s24  }
 0x4bb   : > { %s5070_s19 = scalar_lea.sflag [#allocation4], %s5069_s16 }
 0x4bc   : > { %p6022_p7 = pnand %p6025_p4, %p6232_p6 }
 0x4be   : > { %p6023_p8 = pneg %p6022_p7 }
 0x4c0   : > { %6127 = dma.done.wait (%p6023_p8), %s5070_s19, 4096  }
 0x4c1   : > { %6129 = vsyncadd (%p6023_p8), %s5070_s19, 4294963200  ;;  %p17_p9 = scmp.ge.s32.totalorder %s6215_s30, 4   ;;  %s8868_s24 = smov %s6136_s25 }
 0x4c2   : > { %s8869_s25 = smov %s6140_s26  ;;  %s8870_s26 = smov %s6226_s10 }
 0x4c3   : > { %s8871_s27 = smov %s6215_s30  ;;  %19 = sbr.rel (!%p17_p9) target bundleno = 3 (0x3), region = 86 }
 0x4c8   :  { %5076 = vsyncpa [#allocation4], 1 }
 0x4c9   :  { %5078 = vsyncpa [#allocation4 + $0x1], 1 }

</bundles_post_ra>
